<compile_context>
chip_gen: v6e
topology: v6e:2x2x1
jax: 0.10.0
libtpu: 0.0.40
codegen_flags: <defaults>
</compile_context>

<pallas_src>
import math
import jax
import jax.numpy as jnp
from jax.experimental import pallas as pl
from jax.experimental.pallas import tpu as pltpu

# ---------------- model hyper-params (the torch module's `params`) ------------
HOPS        = 7                  # params.hops           -> seq_len = hops + 1
SEQ_LEN     = HOPS + 1
FEATURE_DIM = 16                 # params.graph_feature_dim
HIDDEN      = 32                 # params.hidden_dim
FFN         = HIDDEN             # ffn_dim == hidden_dim in the module
NUM_HEADS   = 4                  # params.num_heads
HEAD_DIM    = HIDDEN // NUM_HEADS
N_LAYERS    = 2                  # params.encoder_layers
N_CLASS     = 5                  # params.n_class
VALUE_NUM   = 10                 # params.graph_value_num
N_NODES     = 16                 # power of two (mask uses & (N_NODES-1))
NL          = N_NODES * SEQ_LEN  # 128 rows -> full sublane tile
LN_EPS      = 1e-5
SCALE       = HEAD_DIM ** (-0.5)
OUT_LANES   = 128                # lane-dense padded classifier / output width
NEG_INF     = -1e30

# rows of the packed [VEC_ROWS, HIDDEN] bias / LayerNorm / attn-vector table
(_B_EMB, _LN1_G, _LN1_B, _BQ, _BK, _BV, _BO, _LN2_G, _LN2_B,
 _B1, _B2, _FLN_G, _FLN_B, _WATT_N, _B_PROJ) = range(15)
VEC_ROWS = 16

# row offsets inside the packed [WROW_ROWS, HIDDEN] weight slab
R_WQ, R_WK, R_WV, R_WO = 0, HIDDEN, 2 * HIDDEN, 3 * HIDDEN
R_W1, R_W2, R_WPROJ, R_VEC = 4 * HIDDEN, 5 * HIDDEN, 6 * HIDDEN, 7 * HIDDEN
WROW_ROWS = R_VEC + VEC_ROWS            # 240

# rows inside the packed [CLS_ROWS, OUT_LANES] classifier slab
R_WCLS, R_BCLS = 0, HIDDEN               # w_cls (rows 0:32, rows 16:32 zero), b_cls
CLS_ROWS = 40


# ------------------------------ kernel helpers --------------------------------
def _layer_norm(x, g, b):
    mu = jnp.mean(x, axis=-1, keepdims=True)
    var = jnp.mean((x - mu) ** 2, axis=-1, keepdims=True)
    return (x - mu) * jax.lax.rsqrt(var + LN_EPS) * g + b


def _gelu(x):  # exact (erf) GELU, matching torch nn.GELU() default
    return 0.5 * x * (1.0 + jax.lax.erf(x * 0.7071067811865476))


# ------------------------------ fused kernel -----------------------------------
def nag_fused_kernel(adj_ref, x0_ref, wrow_ref, cls_ref, out_ref, pmat_sc):
    f32 = jnp.float32
    dot = lambda a, b: jnp.dot(a, b, preferred_element_type=f32)

    vec = wrow_ref[R_VEC:R_VEC + VEC_ROWS, :]        # [16, H] packed vectors

    def row(i):                                      # one packed [1, H] vector
        return vec[i:i + 1, :]

    # ---- adjacency powers, log depth (3 dependent levels instead of 7) -------
    a1 = adj_ref[...]                                # [N, N]
    a2 = dot(a1, a1)
    a3 = dot(a2, a1)
    a4 = dot(a2, a2)
    a5 = dot(a4, a1)
    a6 = dot(a4, a2)
    a7 = dot(a4, a3)
    ri = jax.lax.broadcasted_iota(jnp.int32, (N_NODES, N_NODES), 0)
    ci = jax.lax.broadcasted_iota(jnp.int32, (N_NODES, N_NODES), 1)
    eye = (ri == ci).astype(f32)

    # stack P = [I; A; A^2; ...; A^7] into the [128, 16] scratch (hop-major,
    # contiguous sublane-aligned stores -- no masked strided writes).
    powers = (eye, a1, a2, a3, a4, a5, a6, a7)
    for hop in range(SEQ_LEN):
        pmat_sc[hop * N_NODES:(hop + 1) * N_NODES, :] = powers[hop]

    # ---- all hop features, already embedded: one [128,16]@[16,32] matmul -----
    # x0 = features @ w_emb was folded into the gather table at pack time.
    x = dot(pmat_sc[...], x0_ref[...]) + row(_B_EMB)          # [128, H], hop-major

    # ---- encoder layer (only the LAST layer survives the reference loop) -----
    y = _layer_norm(x, row(_LN1_G), row(_LN1_B))
    q = dot(y, wrow_ref[R_WQ:R_WQ + HIDDEN, :]) + row(_BQ)    # wq/bq pre-scaled
    k = dot(y, wrow_ref[R_WK:R_WK + HIDDEN, :]) + row(_BK)
    v = dot(y, wrow_ref[R_WV:R_WV + HIDDEN, :]) + row(_BV)

    # same-node additive mask: rows i, j share a node iff i % N == j % N
    rr = jax.lax.broadcasted_iota(jnp.int32, (NL, NL), 0)
    cc = jax.lax.broadcasted_iota(jnp.int32, (NL, NL), 1)
    neg_bias = jnp.where((rr & (N_NODES - 1)) == (cc & (N_NODES - 1)),
                         0.0, NEG_INF)                        # [128, 128]

    li = jax.lax.broadcasted_iota(jnp.int32, (1, HIDDEN), 1)
    o_terms = []
    for h in range(NUM_HEADS):
        hm = ((li >= h * HEAD_DIM) & (li < (h + 1) * HEAD_DIM)).astype(f32)  # [1,H]
        s = jnp.einsum('ld,md->lm', q * hm, k,
                       preferred_element_type=f32) + neg_bias  # [128, 128]
        s = s - jnp.max(s, axis=-1, keepdims=True)
        p = jnp.exp(s)
        p = p * pl.reciprocal(jnp.sum(p, axis=-1, keepdims=True), approx=True)
        o_terms.append(dot(p, v * hm))                         # head-h lanes only
    # sum of masked per-head outputs == concat(heads); single wo matmul.
    o_heads = (o_terms[0] + o_terms[1]) + (o_terms[2] + o_terms[3])
    x = x + dot(o_heads, wrow_ref[R_WO:R_WO + HIDDEN, :]) + row(_BO)

    # ---- FFN (batched over all 128 rows) --------------------------------------
    y = _layer_norm(x, row(_LN2_G), row(_LN2_B))
    h1 = _gelu(dot(y, wrow_ref[R_W1:R_W1 + HIDDEN, :]) + row(_B1))
    x = x + dot(h1, wrow_ref[R_W2:R_W2 + HIDDEN, :]) + row(_B2)

    # ---- final LayerNorm + hop-attention pooling (hop-major layout) -----------
    o = _layer_norm(x, row(_FLN_G), row(_FLN_B))              # [128, H]
    o3 = o.reshape(SEQ_LEN, N_NODES, HIDDEN)                  # [L, N, H]
    node = o3[0]                                              # [N, H]
    neigh = o3[1:]                                            # [L-1, N, H]
    # target half of w_attn and b_attn are constant along the hop/softmax axis
    # -> they cancel exactly; only the neighbour half matters.
    att = jnp.sum(neigh * row(_WATT_N), axis=-1, keepdims=True)   # [L-1, N, 1]
    att = att - jnp.max(att, axis=0, keepdims=True)
    att = jnp.exp(att)
    att = att * pl.reciprocal(jnp.sum(att, axis=0, keepdims=True), approx=True)
    pooled = jnp.sum(neigh * att, axis=0)                         # [N, H]
    h_node = node + pooled                                        # [N, H]

    # ---- head: relu(out_proj) -> padded classifier -> mean over nodes ---------
    # w_proj / b_proj are zero-padded to 32 lanes; w_cls rows 16:32 are zero, so
    # the padded lanes contribute nothing (exact).
    hid = jnp.maximum(
        dot(h_node, wrow_ref[R_WPROJ:R_WPROJ + HIDDEN, :]) + row(_B_PROJ), 0.0)
    logits = dot(hid, cls_ref[R_WCLS:R_WCLS + HIDDEN, :])         # [N, 128]
    # dgl.readout_nodes(op='mean') for the single batched graph, lane-dense out
    out_ref[...] = (jnp.mean(logits, axis=0, keepdims=True)
                    + cls_ref[R_BCLS:R_BCLS + 1, :])              # [1, 128]


# ------------------------- parameter packing (init time) -----------------------
def pack_params(params):
    """Pack all weights into two lane/sublane-friendly slabs.  Done ONCE."""
    lw = params["layers"][-1]     # only the LAST layer reaches the output

    # fold the input embedding into the value-embedding table (exact: linearity)
    ve_proj = params["value_embedding"] @ params["w_emb"]          # [V, H]

    b_proj_row = jnp.zeros((1, HIDDEN), jnp.float32)
    b_proj_row = b_proj_row.at[0, :HIDDEN // 2].set(params["b_proj"][0])

    vec = jnp.concatenate([
        params["b_emb"],
        lw["ln1_g"], lw["ln1_b"],
        lw["bq"] * SCALE,                      # SCALE folded into q path
        lw["bk"], lw["bv"],
        lw["bo"],
        lw["ln2_g"], lw["ln2_b"],
        lw["b1"], lw["b2"],
        params["fln_g"], params["fln_b"],
        params["w_attn"][HIDDEN:, 0][None, :],  # neighbour half of attn vector
        b_proj_row,
        jnp.zeros((VEC_ROWS - 15, HIDDEN), jnp.float32),
    ], axis=0)                                                     # [16, H]

    w_proj_pad = jnp.zeros((HIDDEN, HIDDEN), jnp.float32)
    w_proj_pad = w_proj_pad.at[:, :HIDDEN // 2].set(params["w_proj"])

    wrow = jnp.concatenate([
        lw["wq"] * SCALE, lw["wk"], lw["wv"], lw["wo"],
        lw["w1"], lw["w2"], w_proj_pad, vec,
    ], axis=0)                                                     # [240, H]

    cls = jnp.zeros((CLS_ROWS, OUT_LANES), jnp.float32)
    cls = cls.at[:HIDDEN // 2, :N_CLASS].set(params["w_cls"])
    cls = cls.at[R_BCLS, :N_CLASS].set(params["b_cls"][0])         # [40, 128]

    return {"ve_proj": ve_proj, "wrow": wrow, "cls": cls}


# ------------------------------- forward (jitted) ------------------------------
def _nag_forward(h_id, src, dst, ve_proj, wrow, cls):
    # glue with no clean Pallas equivalent: embedding gather + adjacency scatter
    x0 = jnp.take(ve_proj, h_id, axis=0)                           # [N, H]
    n = x0.shape[0]
    assert n == N_NODES, "kernel masks/reshapes are specialized to N_NODES"
    adj = jnp.zeros((n, n), jnp.float32).at[src, dst].set(1.0)

    out = pl.pallas_call(
        nag_fused_kernel,
        out_shape=jax.ShapeDtypeStruct((1, OUT_LANES), jnp.float32),
        scratch_shapes=[pltpu.VMEM((NL, N_NODES), jnp.float32)],   # stacked A^k
    )(adj, x0, wrow, cls)

    return out[:, :N_CLASS]                                        # [1, n_class]


nag_encoder_forward = jax.jit(_nag_forward)


# ----------------------- deterministic parameter init --------------------------
def init_nag_params(key):
    std = 0.02 / math.sqrt(N_LAYERS)     # init_params() std for every nn.Linear
    keys = iter(jax.random.split(key, 64))

    def lin(shape, s):
        return jax.random.normal(next(keys), shape, jnp.float32) * s

    params = {
        "value_embedding": lin((VALUE_NUM, FEATURE_DIM), 0.02),
        "w_emb": lin((FEATURE_DIM, HIDDEN), std),
        "b_emb": jnp.zeros((1, HIDDEN), jnp.float32),
        "fln_g": jnp.ones((1, HIDDEN), jnp.float32),
        "fln_b": jnp.zeros((1, HIDDEN), jnp.float32),
        "w_attn": lin((2 * HIDDEN, 1), std),
        "b_attn": jnp.zeros((1, 1), jnp.float32),
        "w_proj": lin((HIDDEN, HIDDEN // 2), std),
        "b_proj": jnp.zeros((1, HIDDEN // 2), jnp.float32),
        "w_cls": lin((HIDDEN // 2, N_CLASS), std),
        "b_cls": jnp.zeros((1, N_CLASS), jnp.float32),
        "layers": [],
    }
    for _ in range(N_LAYERS):
        params["layers"].append({
            "ln1_g": jnp.ones((1, HIDDEN), jnp.float32),
            "ln1_b": jnp.zeros((1, HIDDEN), jnp.float32),
            "wq": lin((HIDDEN, HIDDEN), std), "bq": jnp.zeros((1, HIDDEN), jnp.float32),
            "wk": lin((HIDDEN, HIDDEN), std), "bk": jnp.zeros((1, HIDDEN), jnp.float32),
            "wv": lin((HIDDEN, HIDDEN), std), "bv": jnp.zeros((1, HIDDEN), jnp.float32),
            "wo": lin((HIDDEN, HIDDEN), std), "bo": jnp.zeros((1, HIDDEN), jnp.float32),
            "ln2_g": jnp.ones((1, HIDDEN), jnp.float32),
            "ln2_b": jnp.zeros((1, HIDDEN), jnp.float32),
            "w1": lin((HIDDEN, FFN), std), "b1": jnp.zeros((1, FFN), jnp.float32),
            "w2": lin((FFN, HIDDEN), std), "b2": jnp.zeros((1, HIDDEN), jnp.float32),
        })
    return params


# ----------------------------- pure-JAX reference ------------------------------
def nag_reference(h_id, src, dst, params):
    features = params["value_embedding"][h_id]
    n = features.shape[0]
    adj = jnp.zeros((n, n), jnp.float32).at[src, dst].set(1.0)
    feats, f = [features], features
    for _ in range(SEQ_LEN - 1):
        f = adj @ f
        feats.append(f)
    result = jnp.transpose(jnp.stack(feats, 0), (1, 0, 2))              # [N, L, F]
    x = result @ params["w_emb"] + params["b_emb"]

    def enc_layer(x, lw):
        y = _layer_norm(x, lw["ln1_g"], lw["ln1_b"])
        q = (y @ lw["wq"] + lw["bq"]).reshape(n, SEQ_LEN, NUM_HEADS, HEAD_DIM)
        k = (y @ lw["wk"] + lw["bk"]).reshape(n, SEQ_LEN, NUM_HEADS, HEAD_DIM)
        v = (y @ lw["wv"] + lw["bv"]).reshape(n, SEQ_LEN, NUM_HEADS, HEAD_DIM)
        s = jnp.einsum("blhd,bmhd->bhlm", q * SCALE, k)
        p = jax.nn.softmax(s, axis=-1)
        a = jnp.einsum("bhlm,bmhd->blhd", p, v).reshape(n, SEQ_LEN, HIDDEN)
        x = x + (a @ lw["wo"] + lw["bo"])
        y = _layer_norm(x, lw["ln2_g"], lw["ln2_b"])
        y = _gelu(y @ lw["w1"] + lw["b1"]) @ lw["w2"] + lw["b2"]
        return x + y

    for lw in params["layers"]:          # reproduces the reference's `tensor = enc_layer(x)` bug
        tensor = enc_layer(x, lw)
    o = _layer_norm(tensor, params["fln_g"], params["fln_b"])
    node = o[:, 0:1, :]
    neigh = o[:, 1:, :]
    target = jnp.broadcast_to(node, (n, SEQ_LEN - 1, HIDDEN))
    att = jnp.concatenate([target, neigh], axis=2) @ params["w_attn"] + params["b_attn"]
    att = jax.nn.softmax(att, axis=1)
    pooled = jnp.sum(neigh * att, axis=1, keepdims=True)
    out = (node + pooled)[:, 0, :]
    out = jnp.maximum(out @ params["w_proj"] + params["b_proj"], 0.0)
    logits = out @ params["w_cls"] + params["b_cls"]
    return jnp.mean(logits, axis=0, keepdims=True)


# ----------------------------------- main ---------------------------------------
if __name__ == "__main__":
    key = jax.random.PRNGKey(0)
    pkey, ikey = jax.random.split(key)
    params = init_nag_params(pkey)
    packed = pack_params(params)          # packed ONCE, reused every forward

    # deterministic toy graph: bidirectional ring over N_NODES nodes
    h_id = jax.random.randint(ikey, (N_NODES,), 0, VALUE_NUM)
    idx = jnp.arange(N_NODES)
    src = jnp.concatenate([idx, (idx + 1) % N_NODES])
    dst = jnp.concatenate([(idx + 1) % N_NODES, idx])

    out = jax.block_until_ready(
        nag_encoder_forward(h_id, src, dst,
                            packed["ve_proj"], packed["wrow"], packed["cls"]))
    ref = jax.block_until_ready(nag_reference(h_id, src, dst, params))
    assert out.shape == (1, N_CLASS)
    assert bool(jnp.allclose(out, ref, atol=2e-3, rtol=2e-2)), (out, ref)
    print("KERNEL_OK")
</pallas_src>

<mosaic_0001>
module attributes {stable_mosaic.version = 11 : i64} {
  func.func @nag_fused_kernel(%arg0: memref<16x16xf32, #tpu.memory_space<vmem>>, %arg1: memref<16x32xf32, #tpu.memory_space<vmem>>, %arg2: memref<240x32xf32, #tpu.memory_space<vmem>>, %arg3: memref<40x128xf32, #tpu.memory_space<vmem>>, %arg4: memref<1x128xf32, #tpu.memory_space<vmem>>, %arg5: memref<128x16xf32, #tpu.memory_space<vmem>>) attributes {dimension_semantics = [], scalar_prefetch = 0 : i64, scratch_operands = 1 : i64, tpu.core_type = #tpu.core_type<tc>} {
    %c224 = arith.constant 224 : index
    %c0 = arith.constant 0 : index
    %0 = vector.load %arg2[%c224, %c0] : memref<240x32xf32, #tpu.memory_space<vmem>>, vector<16x32xf32>
    %c0_0 = arith.constant 0 : index
    %c0_1 = arith.constant 0 : index
    %1 = vector.load %arg0[%c0_0, %c0_1] : memref<16x16xf32, #tpu.memory_space<vmem>>, vector<16x16xf32>
    %cst = arith.constant dense<0.000000e+00> : vector<16x16xf32>
    %2 = tpu.matmul %1, %1, %cst {dimension_numbers = #tpu.dot_dimension_numbers<[1], [0], [0], [1], [0, 0, 1, 1], [], []>} : vector<16x16xf32>, vector<16x16xf32>, vector<16x16xf32> -> vector<16x16xf32>
    %cst_2 = arith.constant dense<0.000000e+00> : vector<16x16xf32>
    %3 = tpu.matmul %2, %1, %cst_2 {dimension_numbers = #tpu.dot_dimension_numbers<[1], [0], [0], [1], [0, 0, 1, 1], [], []>} : vector<16x16xf32>, vector<16x16xf32>, vector<16x16xf32> -> vector<16x16xf32>
    %cst_3 = arith.constant dense<0.000000e+00> : vector<16x16xf32>
    %4 = tpu.matmul %2, %2, %cst_3 {dimension_numbers = #tpu.dot_dimension_numbers<[1], [0], [0], [1], [0, 0, 1, 1], [], []>} : vector<16x16xf32>, vector<16x16xf32>, vector<16x16xf32> -> vector<16x16xf32>
    %cst_4 = arith.constant dense<0.000000e+00> : vector<16x16xf32>
    %5 = tpu.matmul %4, %1, %cst_4 {dimension_numbers = #tpu.dot_dimension_numbers<[1], [0], [0], [1], [0, 0, 1, 1], [], []>} : vector<16x16xf32>, vector<16x16xf32>, vector<16x16xf32> -> vector<16x16xf32>
    %cst_5 = arith.constant dense<0.000000e+00> : vector<16x16xf32>
    %6 = tpu.matmul %4, %2, %cst_5 {dimension_numbers = #tpu.dot_dimension_numbers<[1], [0], [0], [1], [0, 0, 1, 1], [], []>} : vector<16x16xf32>, vector<16x16xf32>, vector<16x16xf32> -> vector<16x16xf32>
    %cst_6 = arith.constant dense<0.000000e+00> : vector<16x16xf32>
    %7 = tpu.matmul %4, %3, %cst_6 {dimension_numbers = #tpu.dot_dimension_numbers<[1], [0], [0], [1], [0, 0, 1, 1], [], []>} : vector<16x16xf32>, vector<16x16xf32>, vector<16x16xf32> -> vector<16x16xf32>
    %8 = tpu.iota {dimensions = array<i32: 0>} : vector<16x16xi32>
    %9 = tpu.iota {dimensions = array<i32: 1>} : vector<16x16xi32>
    %10 = arith.cmpi eq, %8, %9 : vector<16x16xi32>
    %11 = arith.extui %10 : vector<16x16xi1> to vector<16x16xi32>
    %12 = arith.sitofp %11 : vector<16x16xi32> to vector<16x16xf32>
    %c0_7 = arith.constant 0 : index
    %c0_8 = arith.constant 0 : index
    %13 = vector.load %arg5[%c0_7, %c0_8] : memref<128x16xf32, #tpu.memory_space<vmem>>, vector<16x16xf32>
    tpu.vector_store %arg5[%c0_7, %c0_8], %12 {strides = array<i32>} : memref<128x16xf32, #tpu.memory_space<vmem>>, vector<16x16xf32>,
    %c16 = arith.constant 16 : index
    %c0_9 = arith.constant 0 : index
    %14 = vector.load %arg5[%c16, %c0_9] : memref<128x16xf32, #tpu.memory_space<vmem>>, vector<16x16xf32>
    tpu.vector_store %arg5[%c16, %c0_9], %1 {strides = array<i32>} : memref<128x16xf32, #tpu.memory_space<vmem>>, vector<16x16xf32>,
    %c32 = arith.constant 32 : index
    %c0_10 = arith.constant 0 : index
    %15 = vector.load %arg5[%c32, %c0_10] : memref<128x16xf32, #tpu.memory_space<vmem>>, vector<16x16xf32>
    tpu.vector_store %arg5[%c32, %c0_10], %2 {strides = array<i32>} : memref<128x16xf32, #tpu.memory_space<vmem>>, vector<16x16xf32>,
    %c48 = arith.constant 48 : index
    %c0_11 = arith.constant 0 : index
    %16 = vector.load %arg5[%c48, %c0_11] : memref<128x16xf32, #tpu.memory_space<vmem>>, vector<16x16xf32>
    tpu.vector_store %arg5[%c48, %c0_11], %3 {strides = array<i32>} : memref<128x16xf32, #tpu.memory_space<vmem>>, vector<16x16xf32>,
    %c64 = arith.constant 64 : index
    %c0_12 = arith.constant 0 : index
    %17 = vector.load %arg5[%c64, %c0_12] : memref<128x16xf32, #tpu.memory_space<vmem>>, vector<16x16xf32>
    tpu.vector_store %arg5[%c64, %c0_12], %4 {strides = array<i32>} : memref<128x16xf32, #tpu.memory_space<vmem>>, vector<16x16xf32>,
    %c80 = arith.constant 80 : index
    %c0_13 = arith.constant 0 : index
    %18 = vector.load %arg5[%c80, %c0_13] : memref<128x16xf32, #tpu.memory_space<vmem>>, vector<16x16xf32>
    tpu.vector_store %arg5[%c80, %c0_13], %5 {strides = array<i32>} : memref<128x16xf32, #tpu.memory_space<vmem>>, vector<16x16xf32>,
    %c96 = arith.constant 96 : index
    %c0_14 = arith.constant 0 : index
    %19 = vector.load %arg5[%c96, %c0_14] : memref<128x16xf32, #tpu.memory_space<vmem>>, vector<16x16xf32>
    tpu.vector_store %arg5[%c96, %c0_14], %6 {strides = array<i32>} : memref<128x16xf32, #tpu.memory_space<vmem>>, vector<16x16xf32>,
    %c112 = arith.constant 112 : index
    %c0_15 = arith.constant 0 : index
    %20 = vector.load %arg5[%c112, %c0_15] : memref<128x16xf32, #tpu.memory_space<vmem>>, vector<16x16xf32>
    tpu.vector_store %arg5[%c112, %c0_15], %7 {strides = array<i32>} : memref<128x16xf32, #tpu.memory_space<vmem>>, vector<16x16xf32>,
    %c0_16 = arith.constant 0 : index
    %c0_17 = arith.constant 0 : index
    %21 = vector.load %arg5[%c0_16, %c0_17] : memref<128x16xf32, #tpu.memory_space<vmem>>, vector<128x16xf32>
    %c0_18 = arith.constant 0 : index
    %c0_19 = arith.constant 0 : index
    %22 = vector.load %arg1[%c0_18, %c0_19] : memref<16x32xf32, #tpu.memory_space<vmem>>, vector<16x32xf32>
    %cst_20 = arith.constant dense<0.000000e+00> : vector<128x32xf32>
    %23 = tpu.matmul %21, %22, %cst_20 {dimension_numbers = #tpu.dot_dimension_numbers<[1], [0], [0], [1], [0, 0, 1, 1], [], []>} : vector<128x16xf32>, vector<16x32xf32>, vector<128x32xf32> -> vector<128x32xf32>
    %24 = vector.extract_strided_slice %0 {offsets = [0, 0], sizes = [1, 32], strides = [1, 1]} : vector<16x32xf32> to vector<1x32xf32>
    %25 = vector.broadcast %24 : vector<1x32xf32> to vector<128x32xf32>
    %26 = arith.addf %23, %25 : vector<128x32xf32>
    %27 = vector.extract_strided_slice %0 {offsets = [1, 0], sizes = [1, 32], strides = [1, 1]} : vector<16x32xf32> to vector<1x32xf32>
    %28 = vector.extract_strided_slice %0 {offsets = [2, 0], sizes = [1, 32], strides = [1, 1]} : vector<16x32xf32> to vector<1x32xf32>
    %cst_21 = arith.constant dense<0.000000e+00> : vector<128xf32>
    %29 = vector.multi_reduction <add>, %26, %cst_21 [1] : vector<128x32xf32> to vector<128xf32>
    %30 = vector.shape_cast %29 : vector<128xf32> to vector<128x1xf32>
    %cst_22 = arith.constant 3.200000e+01 : f32
    %31 = vector.broadcast %cst_22 : f32 to vector<128x1xf32>
    %32 = arith.divf %30, %31 : vector<128x1xf32>
    %33 = vector.broadcast %32 : vector<128x1xf32> to vector<128x32xf32>
    %34 = arith.subf %26, %33 : vector<128x32xf32>
    %35 = arith.mulf %34, %34 : vector<128x32xf32>
    %cst_23 = arith.constant dense<0.000000e+00> : vector<128xf32>
    %36 = vector.multi_reduction <add>, %35, %cst_23 [1] : vector<128x32xf32> to vector<128xf32>
    %37 = vector.shape_cast %36 : vector<128xf32> to vector<128x1xf32>
    %cst_24 = arith.constant 3.200000e+01 : f32
    %38 = vector.broadcast %cst_24 : f32 to vector<128x1xf32>
    %39 = arith.divf %37, %38 : vector<128x1xf32>
    %40 = vector.broadcast %32 : vector<128x1xf32> to vector<128x32xf32>
    %41 = arith.subf %26, %40 : vector<128x32xf32>
    %cst_25 = arith.constant 9.99999974E-6 : f32
    %42 = vector.broadcast %cst_25 : f32 to vector<128x1xf32>
    %43 = arith.addf %39, %42 : vector<128x1xf32>
    %44 = math.rsqrt %43 : vector<128x1xf32>
    %45 = vector.broadcast %44 : vector<128x1xf32> to vector<128x32xf32>
    %46 = arith.mulf %41, %45 : vector<128x32xf32>
    %47 = vector.broadcast %27 : vector<1x32xf32> to vector<128x32xf32>
    %48 = arith.mulf %46, %47 : vector<128x32xf32>
    %49 = vector.broadcast %28 : vector<1x32xf32> to vector<128x32xf32>
    %50 = arith.addf %48, %49 : vector<128x32xf32>
    %c0_26 = arith.constant 0 : index
    %c0_27 = arith.constant 0 : index
    %51 = vector.load %arg2[%c0_26, %c0_27] : memref<240x32xf32, #tpu.memory_space<vmem>>, vector<32x32xf32>
    %cst_28 = arith.constant dense<0.000000e+00> : vector<128x32xf32>
    %52 = tpu.matmul %50, %51, %cst_28 {dimension_numbers = #tpu.dot_dimension_numbers<[1], [0], [0], [1], [0, 0, 1, 1], [], []>} : vector<128x32xf32>, vector<32x32xf32>, vector<128x32xf32> -> vector<128x32xf32>
    %53 = vector.extract_strided_slice %0 {offsets = [3, 0], sizes = [1, 32], strides = [1, 1]} : vector<16x32xf32> to vector<1x32xf32>
    %54 = vector.broadcast %53 : vector<1x32xf32> to vector<128x32xf32>
    %55 = arith.addf %52, %54 : vector<128x32xf32>
    %c32_29 = arith.constant 32 : index
    %c0_30 = arith.constant 0 : index
    %56 = vector.load %arg2[%c32_29, %c0_30] : memref<240x32xf32, #tpu.memory_space<vmem>>, vector<32x32xf32>
    %cst_31 = arith.constant dense<0.000000e+00> : vector<128x32xf32>
    %57 = tpu.matmul %50, %56, %cst_31 {dimension_numbers = #tpu.dot_dimension_numbers<[1], [0], [0], [1], [0, 0, 1, 1], [], []>} : vector<128x32xf32>, vector<32x32xf32>, vector<128x32xf32> -> vector<128x32xf32>
    %58 = vector.extract_strided_slice %0 {offsets = [4, 0], sizes = [1, 32], strides = [1, 1]} : vector<16x32xf32> to vector<1x32xf32>
    %59 = vector.broadcast %58 : vector<1x32xf32> to vector<128x32xf32>
    %60 = arith.addf %57, %59 : vector<128x32xf32>
    %c64_32 = arith.constant 64 : index
    %c0_33 = arith.constant 0 : index
    %61 = vector.load %arg2[%c64_32, %c0_33] : memref<240x32xf32, #tpu.memory_space<vmem>>, vector<32x32xf32>
    %cst_34 = arith.constant dense<0.000000e+00> : vector<128x32xf32>
    %62 = tpu.matmul %50, %61, %cst_34 {dimension_numbers = #tpu.dot_dimension_numbers<[1], [0], [0], [1], [0, 0, 1, 1], [], []>} : vector<128x32xf32>, vector<32x32xf32>, vector<128x32xf32> -> vector<128x32xf32>
    %63 = vector.extract_strided_slice %0 {offsets = [5, 0], sizes = [1, 32], strides = [1, 1]} : vector<16x32xf32> to vector<1x32xf32>
    %64 = vector.broadcast %63 : vector<1x32xf32> to vector<128x32xf32>
    %65 = arith.addf %62, %64 : vector<128x32xf32>
    %66 = tpu.iota {dimensions = array<i32: 0>} : vector<128x128xi32>
    %67 = tpu.iota {dimensions = array<i32: 1>} : vector<128x128xi32>
    %c15_i32 = arith.constant 15 : i32
    %68 = vector.broadcast %c15_i32 : i32 to vector<128x128xi32>
    %69 = arith.andi %66, %68 : vector<128x128xi32>
    %c15_i32_35 = arith.constant 15 : i32
    %70 = vector.broadcast %c15_i32_35 : i32 to vector<128x128xi32>
    %71 = arith.andi %67, %70 : vector<128x128xi32>
    %72 = arith.cmpi eq, %69, %71 : vector<128x128xi32>
    %cst_36 = arith.constant 0.000000e+00 : f32
    %cst_37 = arith.constant -1.000000e+30 : f32
    %73 = vector.broadcast %cst_36 : f32 to vector<128x128xf32>
    %74 = vector.broadcast %cst_37 : f32 to vector<128x128xf32>
    %75 = arith.select %72, %73, %74 : vector<128x128xi1>, vector<128x128xf32>
    %76 = tpu.iota {dimensions = array<i32: 1>} : vector<1x32xi32>
    %c0_i32 = arith.constant 0 : i32
    %77 = vector.broadcast %c0_i32 : i32 to vector<1x32xi32>
    %78 = arith.cmpi sge, %76, %77 : vector<1x32xi32>
    %c8_i32 = arith.constant 8 : i32
    %79 = vector.broadcast %c8_i32 : i32 to vector<1x32xi32>
    %80 = arith.cmpi slt, %76, %79 : vector<1x32xi32>
    %81 = arith.andi %78, %80 : vector<1x32xi1>
    %82 = arith.extui %81 : vector<1x32xi1> to vector<1x32xi32>
    %83 = arith.sitofp %82 : vector<1x32xi32> to vector<1x32xf32>
    %84 = vector.broadcast %83 : vector<1x32xf32> to vector<128x32xf32>
    %85 = arith.mulf %55, %84 : vector<128x32xf32>
    "tpu.trace_start"() <{level = 10 : i32, message = "ld,md->lm"}> : () -> ()
    %cst_38 = arith.constant dense<0.000000e+00> : vector<128x128xf32>
    %86 = tpu.matmul %85, %60, %cst_38 {dimension_numbers = #tpu.dot_dimension_numbers<[1], [1], [0], [0], [0, 0, 1, 0], [], []>} : vector<128x32xf32>, vector<128x32xf32>, vector<128x128xf32> -> vector<128x128xf32>
    "tpu.trace_stop"() : () -> ()
    %87 = arith.addf %86, %75 : vector<128x128xf32>
    %cst_39 = arith.constant dense<0xFF800000> : vector<128xf32>
    %88 = vector.multi_reduction <maximumf>, %87, %cst_39 [1] : vector<128x128xf32> to vector<128xf32>
    %89 = vector.shape_cast %88 : vector<128xf32> to vector<128x1xf32>
    %90 = vector.broadcast %89 : vector<128x1xf32> to vector<128x128xf32>
    %91 = arith.subf %87, %90 : vector<128x128xf32>
    %92 = math.exp %91 : vector<128x128xf32>
    %cst_40 = arith.constant dense<0.000000e+00> : vector<128xf32>
    %93 = vector.multi_reduction <add>, %92, %cst_40 [1] : vector<128x128xf32> to vector<128xf32>
    %94 = vector.shape_cast %93 : vector<128xf32> to vector<128x1xf32>
    %95 = tpu.reciprocal %94 {approx = true} : vector<128x1xf32> -> vector<128x1xf32>
    %96 = vector.broadcast %95 : vector<128x1xf32> to vector<128x128xf32>
    %97 = arith.mulf %92, %96 : vector<128x128xf32>
    %98 = vector.broadcast %83 : vector<1x32xf32> to vector<128x32xf32>
    %99 = arith.mulf %65, %98 : vector<128x32xf32>
    %cst_41 = arith.constant dense<0.000000e+00> : vector<128x32xf32>
    %100 = tpu.matmul %97, %99, %cst_41 {dimension_numbers = #tpu.dot_dimension_numbers<[1], [0], [0], [1], [0, 0, 1, 1], [], []>} : vector<128x128xf32>, vector<128x32xf32>, vector<128x32xf32> -> vector<128x32xf32>
    %c8_i32_42 = arith.constant 8 : i32
    %101 = vector.broadcast %c8_i32_42 : i32 to vector<1x32xi32>
    %102 = arith.cmpi sge, %76, %101 : vector<1x32xi32>
    %c16_i32 = arith.constant 16 : i32
    %103 = vector.broadcast %c16_i32 : i32 to vector<1x32xi32>
    %104 = arith.cmpi slt, %76, %103 : vector<1x32xi32>
    %105 = arith.andi %102, %104 : vector<1x32xi1>
    %106 = arith.extui %105 : vector<1x32xi1> to vector<1x32xi32>
    %107 = arith.sitofp %106 : vector<1x32xi32> to vector<1x32xf32>
    %108 = vector.broadcast %107 : vector<1x32xf32> to vector<128x32xf32>
    %109 = arith.mulf %55, %108 : vector<128x32xf32>
    "tpu.trace_start"() <{level = 10 : i32, message = "ld,md->lm"}> : () -> ()
    %cst_43 = arith.constant dense<0.000000e+00> : vector<128x128xf32>
    %110 = tpu.matmul %109, %60, %cst_43 {dimension_numbers = #tpu.dot_dimension_numbers<[1], [1], [0], [0], [0, 0, 1, 0], [], []>} : vector<128x32xf32>, vector<128x32xf32>, vector<128x128xf32> -> vector<128x128xf32>
    "tpu.trace_stop"() : () -> ()
    %111 = arith.addf %110, %75 : vector<128x128xf32>
    %cst_44 = arith.constant dense<0xFF800000> : vector<128xf32>
    %112 = vector.multi_reduction <maximumf>, %111, %cst_44 [1] : vector<128x128xf32> to vector<128xf32>
    %113 = vector.shape_cast %112 : vector<128xf32> to vector<128x1xf32>
    %114 = vector.broadcast %113 : vector<128x1xf32> to vector<128x128xf32>
    %115 = arith.subf %111, %114 : vector<128x128xf32>
    %116 = math.exp %115 : vector<128x128xf32>
    %cst_45 = arith.constant dense<0.000000e+00> : vector<128xf32>
    %117 = vector.multi_reduction <add>, %116, %cst_45 [1] : vector<128x128xf32> to vector<128xf32>
    %118 = vector.shape_cast %117 : vector<128xf32> to vector<128x1xf32>
    %119 = tpu.reciprocal %118 {approx = true} : vector<128x1xf32> -> vector<128x1xf32>
    %120 = vector.broadcast %119 : vector<128x1xf32> to vector<128x128xf32>
    %121 = arith.mulf %116, %120 : vector<128x128xf32>
    %122 = vector.broadcast %107 : vector<1x32xf32> to vector<128x32xf32>
    %123 = arith.mulf %65, %122 : vector<128x32xf32>
    %cst_46 = arith.constant dense<0.000000e+00> : vector<128x32xf32>
    %124 = tpu.matmul %121, %123, %cst_46 {dimension_numbers = #tpu.dot_dimension_numbers<[1], [0], [0], [1], [0, 0, 1, 1], [], []>} : vector<128x128xf32>, vector<128x32xf32>, vector<128x32xf32> -> vector<128x32xf32>
    %c16_i32_47 = arith.constant 16 : i32
    %125 = vector.broadcast %c16_i32_47 : i32 to vector<1x32xi32>
    %126 = arith.cmpi sge, %76, %125 : vector<1x32xi32>
    %c24_i32 = arith.constant 24 : i32
    %127 = vector.broadcast %c24_i32 : i32 to vector<1x32xi32>
    %128 = arith.cmpi slt, %76, %127 : vector<1x32xi32>
    %129 = arith.andi %126, %128 : vector<1x32xi1>
    %130 = arith.extui %129 : vector<1x32xi1> to vector<1x32xi32>
    %131 = arith.sitofp %130 : vector<1x32xi32> to vector<1x32xf32>
    %132 = vector.broadcast %131 : vector<1x32xf32> to vector<128x32xf32>
    %133 = arith.mulf %55, %132 : vector<128x32xf32>
    "tpu.trace_start"() <{level = 10 : i32, message = "ld,md->lm"}> : () -> ()
    %cst_48 = arith.constant dense<0.000000e+00> : vector<128x128xf32>
    %134 = tpu.matmul %133, %60, %cst_48 {dimension_numbers = #tpu.dot_dimension_numbers<[1], [1], [0], [0], [0, 0, 1, 0], [], []>} : vector<128x32xf32>, vector<128x32xf32>, vector<128x128xf32> -> vector<128x128xf32>
    "tpu.trace_stop"() : () -> ()
    %135 = arith.addf %134, %75 : vector<128x128xf32>
    %cst_49 = arith.constant dense<0xFF800000> : vector<128xf32>
    %136 = vector.multi_reduction <maximumf>, %135, %cst_49 [1] : vector<128x128xf32> to vector<128xf32>
    %137 = vector.shape_cast %136 : vector<128xf32> to vector<128x1xf32>
    %138 = vector.broadcast %137 : vector<128x1xf32> to vector<128x128xf32>
    %139 = arith.subf %135, %138 : vector<128x128xf32>
    %140 = math.exp %139 : vector<128x128xf32>
    %cst_50 = arith.constant dense<0.000000e+00> : vector<128xf32>
    %141 = vector.multi_reduction <add>, %140, %cst_50 [1] : vector<128x128xf32> to vector<128xf32>
    %142 = vector.shape_cast %141 : vector<128xf32> to vector<128x1xf32>
    %143 = tpu.reciprocal %142 {approx = true} : vector<128x1xf32> -> vector<128x1xf32>
    %144 = vector.broadcast %143 : vector<128x1xf32> to vector<128x128xf32>
    %145 = arith.mulf %140, %144 : vector<128x128xf32>
    %146 = vector.broadcast %131 : vector<1x32xf32> to vector<128x32xf32>
    %147 = arith.mulf %65, %146 : vector<128x32xf32>
    %cst_51 = arith.constant dense<0.000000e+00> : vector<128x32xf32>
    %148 = tpu.matmul %145, %147, %cst_51 {dimension_numbers = #tpu.dot_dimension_numbers<[1], [0], [0], [1], [0, 0, 1, 1], [], []>} : vector<128x128xf32>, vector<128x32xf32>, vector<128x32xf32> -> vector<128x32xf32>
    %c24_i32_52 = arith.constant 24 : i32
    %149 = vector.broadcast %c24_i32_52 : i32 to vector<1x32xi32>
    %150 = arith.cmpi sge, %76, %149 : vector<1x32xi32>
    %c32_i32 = arith.constant 32 : i32
    %151 = vector.broadcast %c32_i32 : i32 to vector<1x32xi32>
    %152 = arith.cmpi slt, %76, %151 : vector<1x32xi32>
    %153 = arith.andi %150, %152 : vector<1x32xi1>
    %154 = arith.extui %153 : vector<1x32xi1> to vector<1x32xi32>
    %155 = arith.sitofp %154 : vector<1x32xi32> to vector<1x32xf32>
    %156 = vector.broadcast %155 : vector<1x32xf32> to vector<128x32xf32>
    %157 = arith.mulf %55, %156 : vector<128x32xf32>
    "tpu.trace_start"() <{level = 10 : i32, message = "ld,md->lm"}> : () -> ()
    %cst_53 = arith.constant dense<0.000000e+00> : vector<128x128xf32>
    %158 = tpu.matmul %157, %60, %cst_53 {dimension_numbers = #tpu.dot_dimension_numbers<[1], [1], [0], [0], [0, 0, 1, 0], [], []>} : vector<128x32xf32>, vector<128x32xf32>, vector<128x128xf32> -> vector<128x128xf32>
    "tpu.trace_stop"() : () -> ()
    %159 = arith.addf %158, %75 : vector<128x128xf32>
    %cst_54 = arith.constant dense<0xFF800000> : vector<128xf32>
    %160 = vector.multi_reduction <maximumf>, %159, %cst_54 [1] : vector<128x128xf32> to vector<128xf32>
    %161 = vector.shape_cast %160 : vector<128xf32> to vector<128x1xf32>
    %162 = vector.broadcast %161 : vector<128x1xf32> to vector<128x128xf32>
    %163 = arith.subf %159, %162 : vector<128x128xf32>
    %164 = math.exp %163 : vector<128x128xf32>
    %cst_55 = arith.constant dense<0.000000e+00> : vector<128xf32>
    %165 = vector.multi_reduction <add>, %164, %cst_55 [1] : vector<128x128xf32> to vector<128xf32>
    %166 = vector.shape_cast %165 : vector<128xf32> to vector<128x1xf32>
    %167 = tpu.reciprocal %166 {approx = true} : vector<128x1xf32> -> vector<128x1xf32>
    %168 = vector.broadcast %167 : vector<128x1xf32> to vector<128x128xf32>
    %169 = arith.mulf %164, %168 : vector<128x128xf32>
    %170 = vector.broadcast %155 : vector<1x32xf32> to vector<128x32xf32>
    %171 = arith.mulf %65, %170 : vector<128x32xf32>
    %cst_56 = arith.constant dense<0.000000e+00> : vector<128x32xf32>
    %172 = tpu.matmul %169, %171, %cst_56 {dimension_numbers = #tpu.dot_dimension_numbers<[1], [0], [0], [1], [0, 0, 1, 1], [], []>} : vector<128x128xf32>, vector<128x32xf32>, vector<128x32xf32> -> vector<128x32xf32>
    %173 = arith.addf %100, %124 : vector<128x32xf32>
    %174 = arith.addf %148, %172 : vector<128x32xf32>
    %175 = arith.addf %173, %174 : vector<128x32xf32>
    %c96_57 = arith.constant 96 : index
    %c0_58 = arith.constant 0 : index
    %176 = vector.load %arg2[%c96_57, %c0_58] : memref<240x32xf32, #tpu.memory_space<vmem>>, vector<32x32xf32>
    %cst_59 = arith.constant dense<0.000000e+00> : vector<128x32xf32>
    %177 = tpu.matmul %175, %176, %cst_59 {dimension_numbers = #tpu.dot_dimension_numbers<[1], [0], [0], [1], [0, 0, 1, 1], [], []>} : vector<128x32xf32>, vector<32x32xf32>, vector<128x32xf32> -> vector<128x32xf32>
    %178 = arith.addf %26, %177 : vector<128x32xf32>
    %179 = vector.extract_strided_slice %0 {offsets = [6, 0], sizes = [1, 32], strides = [1, 1]} : vector<16x32xf32> to vector<1x32xf32>
    %180 = vector.broadcast %179 : vector<1x32xf32> to vector<128x32xf32>
    %181 = arith.addf %178, %180 : vector<128x32xf32>
    %182 = vector.extract_strided_slice %0 {offsets = [7, 0], sizes = [1, 32], strides = [1, 1]} : vector<16x32xf32> to vector<1x32xf32>
    %183 = vector.extract_strided_slice %0 {offsets = [8, 0], sizes = [1, 32], strides = [1, 1]} : vector<16x32xf32> to vector<1x32xf32>
    %cst_60 = arith.constant dense<0.000000e+00> : vector<128xf32>
    %184 = vector.multi_reduction <add>, %181, %cst_60 [1] : vector<128x32xf32> to vector<128xf32>
    %185 = vector.shape_cast %184 : vector<128xf32> to vector<128x1xf32>
    %cst_61 = arith.constant 3.200000e+01 : f32
    %186 = vector.broadcast %cst_61 : f32 to vector<128x1xf32>
    %187 = arith.divf %185, %186 : vector<128x1xf32>
    %188 = vector.broadcast %187 : vector<128x1xf32> to vector<128x32xf32>
    %189 = arith.subf %181, %188 : vector<128x32xf32>
    %190 = arith.mulf %189, %189 : vector<128x32xf32>
    %cst_62 = arith.constant dense<0.000000e+00> : vector<128xf32>
    %191 = vector.multi_reduction <add>, %190, %cst_62 [1] : vector<128x32xf32> to vector<128xf32>
    %192 = vector.shape_cast %191 : vector<128xf32> to vector<128x1xf32>
    %cst_63 = arith.constant 3.200000e+01 : f32
    %193 = vector.broadcast %cst_63 : f32 to vector<128x1xf32>
    %194 = arith.divf %192, %193 : vector<128x1xf32>
    %195 = vector.broadcast %187 : vector<128x1xf32> to vector<128x32xf32>
    %196 = arith.subf %181, %195 : vector<128x32xf32>
    %cst_64 = arith.constant 9.99999974E-6 : f32
    %197 = vector.broadcast %cst_64 : f32 to vector<128x1xf32>
    %198 = arith.addf %194, %197 : vector<128x1xf32>
    %199 = math.rsqrt %198 : vector<128x1xf32>
    %200 = vector.broadcast %199 : vector<128x1xf32> to vector<128x32xf32>
    %201 = arith.mulf %196, %200 : vector<128x32xf32>
    %202 = vector.broadcast %182 : vector<1x32xf32> to vector<128x32xf32>
    %203 = arith.mulf %201, %202 : vector<128x32xf32>
    %204 = vector.broadcast %183 : vector<1x32xf32> to vector<128x32xf32>
    %205 = arith.addf %203, %204 : vector<128x32xf32>
    %c128 = arith.constant 128 : index
    %c0_65 = arith.constant 0 : index
    %206 = vector.load %arg2[%c128, %c0_65] : memref<240x32xf32, #tpu.memory_space<vmem>>, vector<32x32xf32>
    %cst_66 = arith.constant dense<0.000000e+00> : vector<128x32xf32>
    %207 = tpu.matmul %205, %206, %cst_66 {dimension_numbers = #tpu.dot_dimension_numbers<[1], [0], [0], [1], [0, 0, 1, 1], [], []>} : vector<128x32xf32>, vector<32x32xf32>, vector<128x32xf32> -> vector<128x32xf32>
    %208 = vector.extract_strided_slice %0 {offsets = [9, 0], sizes = [1, 32], strides = [1, 1]} : vector<16x32xf32> to vector<1x32xf32>
    %209 = vector.broadcast %208 : vector<1x32xf32> to vector<128x32xf32>
    %210 = arith.addf %207, %209 : vector<128x32xf32>
    %cst_67 = arith.constant 5.000000e-01 : f32
    %211 = vector.broadcast %cst_67 : f32 to vector<128x32xf32>
    %212 = arith.mulf %211, %210 : vector<128x32xf32>
    %cst_68 = arith.constant 0.707106769 : f32
    %213 = vector.broadcast %cst_68 : f32 to vector<128x32xf32>
    %214 = arith.mulf %210, %213 : vector<128x32xf32>
    %215 = math.erf %214 : vector<128x32xf32>
    %cst_69 = arith.constant 1.000000e+00 : f32
    %216 = vector.broadcast %cst_69 : f32 to vector<128x32xf32>
    %217 = arith.addf %216, %215 : vector<128x32xf32>
    %218 = arith.mulf %212, %217 : vector<128x32xf32>
    %c160 = arith.constant 160 : index
    %c0_70 = arith.constant 0 : index
    %219 = vector.load %arg2[%c160, %c0_70] : memref<240x32xf32, #tpu.memory_space<vmem>>, vector<32x32xf32>
    %cst_71 = arith.constant dense<0.000000e+00> : vector<128x32xf32>
    %220 = tpu.matmul %218, %219, %cst_71 {dimension_numbers = #tpu.dot_dimension_numbers<[1], [0], [0], [1], [0, 0, 1, 1], [], []>} : vector<128x32xf32>, vector<32x32xf32>, vector<128x32xf32> -> vector<128x32xf32>
    %221 = arith.addf %181, %220 : vector<128x32xf32>
    %222 = vector.extract_strided_slice %0 {offsets = [10, 0], sizes = [1, 32], strides = [1, 1]} : vector<16x32xf32> to vector<1x32xf32>
    %223 = vector.broadcast %222 : vector<1x32xf32> to vector<128x32xf32>
    %224 = arith.addf %221, %223 : vector<128x32xf32>
    %225 = vector.extract_strided_slice %0 {offsets = [11, 0], sizes = [1, 32], strides = [1, 1]} : vector<16x32xf32> to vector<1x32xf32>
    %226 = vector.extract_strided_slice %0 {offsets = [12, 0], sizes = [1, 32], strides = [1, 1]} : vector<16x32xf32> to vector<1x32xf32>
    %cst_72 = arith.constant dense<0.000000e+00> : vector<128xf32>
    %227 = vector.multi_reduction <add>, %224, %cst_72 [1] : vector<128x32xf32> to vector<128xf32>
    %228 = vector.shape_cast %227 : vector<128xf32> to vector<128x1xf32>
    %cst_73 = arith.constant 3.200000e+01 : f32
    %229 = vector.broadcast %cst_73 : f32 to vector<128x1xf32>
    %230 = arith.divf %228, %229 : vector<128x1xf32>
    %231 = vector.broadcast %230 : vector<128x1xf32> to vector<128x32xf32>
    %232 = arith.subf %224, %231 : vector<128x32xf32>
    %233 = arith.mulf %232, %232 : vector<128x32xf32>
    %cst_74 = arith.constant dense<0.000000e+00> : vector<128xf32>
    %234 = vector.multi_reduction <add>, %233, %cst_74 [1] : vector<128x32xf32> to vector<128xf32>
    %235 = vector.shape_cast %234 : vector<128xf32> to vector<128x1xf32>
    %cst_75 = arith.constant 3.200000e+01 : f32
    %236 = vector.broadcast %cst_75 : f32 to vector<128x1xf32>
    %237 = arith.divf %235, %236 : vector<128x1xf32>
    %238 = vector.broadcast %230 : vector<128x1xf32> to vector<128x32xf32>
    %239 = arith.subf %224, %238 : vector<128x32xf32>
    %cst_76 = arith.constant 9.99999974E-6 : f32
    %240 = vector.broadcast %cst_76 : f32 to vector<128x1xf32>
    %241 = arith.addf %237, %240 : vector<128x1xf32>
    %242 = math.rsqrt %241 : vector<128x1xf32>
    %243 = vector.broadcast %242 : vector<128x1xf32> to vector<128x32xf32>
    %244 = arith.mulf %239, %243 : vector<128x32xf32>
    %245 = vector.broadcast %225 : vector<1x32xf32> to vector<128x32xf32>
    %246 = arith.mulf %244, %245 : vector<128x32xf32>
    %247 = vector.broadcast %226 : vector<1x32xf32> to vector<128x32xf32>
    %248 = arith.addf %246, %247 : vector<128x32xf32>
    %249 = vector.shape_cast %248 : vector<128x32xf32> to vector<8x16x32xf32>
    %250 = vector.extract_strided_slice %249 {offsets = [0, 0, 0], sizes = [1, 16, 32], strides = [1, 1, 1]} : vector<8x16x32xf32> to vector<1x16x32xf32>
    %251 = vector.shape_cast %250 : vector<1x16x32xf32> to vector<16x32xf32>
    %252 = vector.extract_strided_slice %249 {offsets = [1, 0, 0], sizes = [7, 16, 32], strides = [1, 1, 1]} : vector<8x16x32xf32> to vector<7x16x32xf32>
    %253 = vector.extract_strided_slice %0 {offsets = [13, 0], sizes = [1, 32], strides = [1, 1]} : vector<16x32xf32> to vector<1x32xf32>
    %254 = vector.shape_cast %253 : vector<1x32xf32> to vector<1x1x32xf32>
    %255 = vector.broadcast %254 : vector<1x1x32xf32> to vector<7x16x32xf32>
    %256 = arith.mulf %252, %255 : vector<7x16x32xf32>
    %cst_77 = arith.constant dense<0.000000e+00> : vector<7x16xf32>
    %257 = vector.multi_reduction <add>, %256, %cst_77 [2] : vector<7x16x32xf32> to vector<7x16xf32>
    %258 = vector.shape_cast %257 : vector<7x16xf32> to vector<7x16x1xf32>
    %cst_78 = arith.constant dense<0xFF800000> : vector<16x1xf32>
    %259 = vector.multi_reduction <maximumf>, %258, %cst_78 [0] : vector<7x16x1xf32> to vector<16x1xf32>
    %260 = vector.shape_cast %259 : vector<16x1xf32> to vector<1x16x1xf32>
    %261 = vector.broadcast %260 : vector<1x16x1xf32> to vector<7x16x1xf32>
    %262 = arith.subf %258, %261 : vector<7x16x1xf32>
    %263 = math.exp %262 : vector<7x16x1xf32>
    %cst_79 = arith.constant dense<0.000000e+00> : vector<16x1xf32>
    %264 = vector.multi_reduction <add>, %263, %cst_79 [0] : vector<7x16x1xf32> to vector<16x1xf32>
    %265 = vector.shape_cast %264 : vector<16x1xf32> to vector<1x16x1xf32>
    %266 = tpu.reciprocal %265 {approx = true} : vector<1x16x1xf32> -> vector<1x16x1xf32>
    %267 = vector.broadcast %266 : vector<1x16x1xf32> to vector<7x16x1xf32>
    %268 = arith.mulf %263, %267 : vector<7x16x1xf32>
    %269 = vector.broadcast %268 : vector<7x16x1xf32> to vector<7x16x32xf32>
    %270 = arith.mulf %252, %269 : vector<7x16x32xf32>
    %cst_80 = arith.constant dense<0.000000e+00> : vector<16x32xf32>
    %271 = vector.multi_reduction <add>, %270, %cst_80 [0] : vector<7x16x32xf32> to vector<16x32xf32>
    %272 = arith.addf %251, %271 : vector<16x32xf32>
    %c192 = arith.constant 192 : index
    %c0_81 = arith.constant 0 : index
    %273 = vector.load %arg2[%c192, %c0_81] : memref<240x32xf32, #tpu.memory_space<vmem>>, vector<32x32xf32>
    %cst_82 = arith.constant dense<0.000000e+00> : vector<16x32xf32>
    %274 = tpu.matmul %272, %273, %cst_82 {dimension_numbers = #tpu.dot_dimension_numbers<[1], [0], [0], [1], [0, 0, 1, 1], [], []>} : vector<16x32xf32>, vector<32x32xf32>, vector<16x32xf32> -> vector<16x32xf32>
    %275 = vector.extract_strided_slice %0 {offsets = [14, 0], sizes = [1, 32], strides = [1, 1]} : vector<16x32xf32> to vector<1x32xf32>
    %276 = vector.broadcast %275 : vector<1x32xf32> to vector<16x32xf32>
    %277 = arith.addf %274, %276 : vector<16x32xf32>
    %cst_83 = arith.constant 0.000000e+00 : f32
    %278 = vector.broadcast %cst_83 : f32 to vector<16x32xf32>
    %279 = arith.maximumf %277, %278 : vector<16x32xf32>
    %c0_84 = arith.constant 0 : index
    %c0_85 = arith.constant 0 : index
    %280 = vector.load %arg3[%c0_84, %c0_85] : memref<40x128xf32, #tpu.memory_space<vmem>>, vector<32x128xf32>
    %cst_86 = arith.constant dense<0.000000e+00> : vector<16x128xf32>
    %281 = tpu.matmul %279, %280, %cst_86 {dimension_numbers = #tpu.dot_dimension_numbers<[1], [0], [0], [1], [0, 0, 1, 1], [], []>} : vector<16x32xf32>, vector<32x128xf32>, vector<16x128xf32> -> vector<16x128xf32>
    %cst_87 = arith.constant dense<0.000000e+00> : vector<128xf32>
    %282 = vector.multi_reduction <add>, %281, %cst_87 [0] : vector<16x128xf32> to vector<128xf32>
    %283 = vector.shape_cast %282 : vector<128xf32> to vector<1x128xf32>
    %cst_88 = arith.constant 1.600000e+01 : f32
    %284 = vector.broadcast %cst_88 : f32 to vector<1x128xf32>
    %285 = arith.divf %283, %284 : vector<1x128xf32>
    %c32_89 = arith.constant 32 : index
    %c0_90 = arith.constant 0 : index
    %286 = vector.load %arg3[%c32_89, %c0_90] : memref<40x128xf32, #tpu.memory_space<vmem>>, vector<1x128xf32>
    %287 = arith.addf %285, %286 : vector<1x128xf32>
    %c0_91 = arith.constant 0 : index
    %c0_92 = arith.constant 0 : index
    %288 = vector.load %arg4[%c0_91, %c0_92] : memref<1x128xf32, #tpu.memory_space<vmem>>, vector<1x128xf32>
    tpu.vector_store %arg4[%c0_91, %c0_92], %287 {strides = array<i32>} : memref<1x128xf32, #tpu.memory_space<vmem>>, vector<1x128xf32>,
    return
  }
}

</mosaic_0001>

<bundles_post_ra>
// kernel: _nag_forward.1
= control target key start
LH: loop header
LB: loop body
LE: loop exit
PB: predicated region body
PF: predicated region fallthrough
CT: control target
= control target key end

     0   :  { %vm22_vm0 = vcmask 130048   ;;  %s10111_s0 = inlined_call_operand.vmem [shape: f32[16,16], index: 0, kind: input, shape index: {}]   ;;  %s10112_s1 = inlined_call_operand.vmem [shape: f32[16,32], index: 1, kind: input, shape index: {}]   ;;  %s10113_s2 = inlined_call_operand.vmem [shape: f32[240,32], index: 2, kind: input, shape index: {}]   ;;  %s10114_s3 = inlined_call_operand.vmem [shape: f32[40,128], index: 3, kind: input, shape index: {}]   ;;  %s10115_s4 = inlined_call_operand.hbm [shape: f32[1,128], index: 4, kind: output, shape index: {}]  }
   0x1   :  { %v21_v0 = vld [vmem:[%s10111_s0 + $0x8] sm:$0xff]  ;;  %v20_v1 = vld [vmem:[%s10111_s0] sm:$0xff] }
   0x2   :  { %9 = vsyncpa [#allocation4], 0  ;;  %6014 = vmatprep.subr.mxu0 %v21_v0  ;;  %505 = vst.msk [vmem:[#allocation2 + $0x18] sm:$0xff] %vm22_vm0, %v21_v0  ;;  %6018 = vmatprep.mubr.msk.f32.mxu0 %vm22_vm0, %v20_v1  ;;  %v491_v4 = vlaneseq  ;;  %v10121_v8 = vmov 0.0   ;;  %v535_v11 = vld [vmem:[%s10112_s1 + $0x8] sm:$0xff]  ;;  %v534_v16 = vld [vmem:[%s10112_s1] sm:$0xff] }
   0x3   :  { %504 = vst.msk [vmem:[#allocation2 + $0x10] sm:$0xff] %vm22_vm0, %v20_v1  ;;  %6015 = vmatpush3.msra.mxu0 %v21_v0  ;;  %6021 = vmatprep.subr.mxu1 %v21_v0  ;;  %v7285_v30 = vld [vmem:[%s10113_s2 + $0xe0] sm:$0xff]  ;;  %vm733_vm3 = vcmask 261120   ;;  %s7196_s14 = smov [#allocation3]  }
   0x4   :  { %6016 = vmatprep.subr.mxu0 %v20_v1  ;;  %6022 = vmatpush3.msra.mxu1 %v21_v0  ;;  %v7238_v5 = vshrl.u32 %v491_v4, 7  ;;  %v7240_v6 = vand.u32 127, %v491_v4  ;;  %s5314_s15 = sshll.u32 %s7196_s14, 4  ;;  %s5315_s15 = int_to_ptr.vmem [resolvable:$true] %s5314_s15 }
   0x5   :  { %6017 = vmatpush3.msra.mxu0 %v20_v1  ;;  %6023 = vmatprep.subr.mxu1 %v20_v1  ;;  %s7172_s16 = scalar_lea.vmem %s5315_s15, 16  ;;  %s7176_s17 = scalar_lea.vmem %s5315_s15, 32 }
   0x6   :  { %6019 = vmatmul.mubr.msk.f32.vlgmr.msra.gmra.mxu0 %vm22_vm0, %v21_v0  ;;  %6024 = vmatpush3.msra.mxu1 %v20_v1  ;;  %10221 = vst [vmem:[#allocation6_spill] sm:$0xff] %v7238_v5  ;;  %v7243_v7 = vadd.s32 8, %v7238_v5  ;;  %vm496_vm1 = vcmp.eq.s32.totalorder %v7238_v5, %v7240_v6  ;;  %v10120_v29 = vsub.s32 0, %v7238_v5  ;;  %vm1975_vm4 = vcmp.ge.s32.totalorder %v7240_v6, 8  ;;  %p7173_p0 = scmp.ne.s32.totalorder %s5315_s15, %s7172_s16  ;;  %p7177_p1 = scmp.lt.s32.totalorder %s5315_s15, %s5315_s15 }
   0x7   :  { %6035 = vmatprep.subr.mxu1 %v21_v0  ;;  %v5334_v9 = vsel %vm496_vm1, 1.0, %v10121_v8  ;;  %vm1976_vm5 = vcmp.lt.s32.totalorder %v7240_v6, 16  ;;  %vm1554_vm6 = vcmp.lt.s32.totalorder %v7240_v6, 8  ;;  %vm2494_vm8 = vcmp.ge.s32.totalorder %v7240_v6, 16  ;;  %p7178_p2 = scmp.lt.s32.totalorder %s7176_s17, %s7172_s16 }
   0x8   :  { %vm497_vm2 = vcmp.eq.s32.totalorder %v7243_v7, %v7240_v6  ;;  %502 = vst.msk [vmem:[#allocation2] sm:$0xff] %vm22_vm0, %v5334_v9  ;;  %v7292_v33 = vrot.slane %v7285_v30, %v10120_v29  ;;  %vm1977_vm7 = vmand %vm1975_vm4, %vm1976_vm5  ;;  %vm2495_vm9 = vcmp.lt.s32.totalorder %v7240_v6, 24  ;;  %vm2868_vm11 = vcmp.ge.s32.totalorder %v7240_v6, 24 }
   0x9   :  { %v5335_v10 = vsel %vm497_vm2, 1.0, %v10121_v8  ;;  %v521_v20 = vld [vmem:[#allocation2 + $0x18] sm:$0xff]  ;;  %vm2496_vm10 = vmand %vm2494_vm8, %vm2495_vm9  ;;  %vm2869_vm12 = vcmp.lt.s32.totalorder %v7240_v6, 32  ;;  %p7179_p3 = por %p7178_p2, %p7177_p1 }
   0xa   :  { %503 = vst.msk [vmem:[#allocation2 + $0x8] sm:$0xff] %vm22_vm0, %v5335_v10  ;;  %v520_v19 = vld [vmem:[#allocation2 + $0x10] sm:$0xff]  ;;  %vm2870_vm13 = vmand %vm2868_vm11, %vm2869_vm12 }
   0xb   :  { %p7180_p4 = pnand %p7179_p3, %p7173_p0 }
   0xf   :  { %v518_v17 = vld [vmem:[#allocation2] sm:$0xff] }
  0x11   :  { %v519_v18 = vld [vmem:[#allocation2 + $0x8] sm:$0xff] }
  0xc6   :  { %v6020_v2 = vpop.f32.mrf.mxu0 }
  0xc7   :  { %507 = vst.msk [vmem:[#allocation2 + $0x28] sm:$0xff] %vm22_vm0, %v6020_v2  ;;  %6028 = vmatprep.subr.mxu0 %v6020_v2 }
  0xc8   :  { %v95_v3 = vpop.f32.mrf.mxu0  ;;  %6029 = vmatpush3.msra.mxu0 %v6020_v2 }
  0xc9   :  { %506 = vst.msk [vmem:[#allocation2 + $0x20] sm:$0xff] %vm22_vm0, %v95_v3  ;;  %6025 = vmatprep.mubr.msk.f32.mxu1 %vm22_vm0, %v95_v3  ;;  %6030 = vmatprep.subr.mxu0 %v95_v3 }
  0xca   :  { %6032 = vmatprep.mubr.msk.f32.mxu0 %vm22_vm0, %v95_v3  ;;  %6026 = vmatmul.mubr.msk.f32.vlgmr.msra.gmra.mxu1 %vm22_vm0, %v6020_v2 }
  0xcb   :  { %6031 = vmatpush3.msra.mxu0 %v95_v3  ;;  %6036 = vmatpush3.msra.mxu1 %v21_v0 }
  0xcc   :  { %6033 = vmatmul.mubr.msk.f32.vlgmr.msra.gmra.mxu0 %vm22_vm0, %v6020_v2  ;;  %6042 = vmatprep.subr.mxu0 %v6020_v2 }
  0xcd   :  { %6043 = vmatpush3.msra.mxu0 %v6020_v2  ;;  %6037 = vmatprep.subr.mxu1 %v20_v1 }
  0xce   :  { %6044 = vmatprep.subr.mxu0 %v95_v3  ;;  %6038 = vmatpush3.msra.mxu1 %v20_v1  ;;  %v523_v22 = vld [vmem:[#allocation2 + $0x28] sm:$0xff] }
  0xcf   :  { %6045 = vmatpush3.msra.mxu0 %v95_v3 }
  0xd0   :  { %6056 = vmatprep.subr.mxu0 %v535_v11  ;;  %v522_v21 = vld [vmem:[#allocation2 + $0x20] sm:$0xff] }
 0x18a   :  { %v6027_v12 = vpop.f32.mrf.mxu1 }
 0x18b   :  { %509 = vst.msk [vmem:[#allocation2 + $0x38] sm:$0xff] %vm22_vm0, %v6027_v12  ;;  %6049 = vmatprep.subr.mxu1 %v6027_v12 }
 0x18c   :  { %v6034_v13 = vpop.f32.mrf.mxu0  ;;  %v176_v14 = vpop.f32.mrf.mxu1 }
 0x18d   :  { %511 = vst.msk [vmem:[#allocation2 + $0x48] sm:$0xff] %vm22_vm0, %v6034_v13  ;;  %508 = vst.msk [vmem:[#allocation2 + $0x30] sm:$0xff] %vm22_vm0, %v176_v14 }
 0x18e   :  { %v251_v15 = vpop.f32.mrf.mxu0 }
 0x18f   :  { %510 = vst.msk [vmem:[#allocation2 + $0x40] sm:$0xff] %vm22_vm0, %v251_v15  ;;  %6039 = vmatprep.mubr.msk.f32.mxu1 %vm22_vm0, %v251_v15  ;;  %6046 = vmatprep.mubr.msk.f32.mxu0 %vm22_vm0, %v251_v15 }
 0x190   :  { %6040 = vmatmul.mubr.msk.f32.vlgmr.msra.gmra.mxu1 %vm22_vm0, %v6034_v13  ;;  %6047 = vmatmul.mubr.msk.f32.vlgmr.msra.gmra.mxu0 %vm22_vm0, %v6034_v13 }
 0x191   :  { %6050 = vmatpush3.msra.mxu1 %v6027_v12  ;;  %6053 = vmatprep.mubr.msk.f32.mxu1 %vm22_vm0, %v251_v15 }
 0x192   :  { %6051 = vmatprep.subr.mxu1 %v176_v14  ;;  %6057 = vmatpush3.msra.mxu0 %v535_v11  ;;  %v525_v24 = vld [vmem:[#allocation2 + $0x38] sm:$0xff] }
 0x193   :  { %6052 = vmatpush3.msra.mxu1 %v176_v14  ;;  %6058 = vmatprep.subr.mxu0 %v534_v16 }
 0x194   :  { %6059 = vmatpush3.msra.mxu0 %v534_v16  ;;  %6060 = vmatprep.mubr.msk.f32.mxu0 %vm22_vm0, %v518_v17  ;;  %v524_v23 = vld [vmem:[#allocation2 + $0x30] sm:$0xff]  ;;  %v527_v26 = vld [vmem:[#allocation2 + $0x48] sm:$0xff] }
 0x195   :  { %6054 = vmatmul.mubr.msk.f32.vlgmr.msra.gmra.mxu1 %vm22_vm0, %v6034_v13  ;;  %6061 = vmatmul.mubr.msk.f32.vlgmr.msra.gmra.mxu0 %vm22_vm0, %v519_v18 }
 0x196   :  { %6063 = vmatprep.mubr.msk.f32.mxu0 %vm22_vm0, %v520_v19  ;;  %6746 = vmatprep.subr.mxu1 %v535_v11  ;;  %v526_v25 = vld [vmem:[#allocation2 + $0x40] sm:$0xff] }
 0x197   :  { %6748 = vmatpush3.msra.mxu1 %v535_v11 }
 0x198   :  { %6747 = vmatprep.subr.mxu1 %v534_v16 }
 0x199   :  { %6064 = vmatmul.mubr.msk.f32.gmra.mxu0 %vm22_vm0, %v521_v20  ;;  %6749 = vmatpush3.msra.mxu1 %v534_v16 }
 0x19a   :  { %6066 = vmatprep.mubr.msk.f32.mxu0 %vm22_vm0, %v522_v21 }
 0x19d   :  { %6067 = vmatmul.mubr.msk.f32.gmra.mxu0 %vm22_vm0, %v523_v22 }
 0x19e   :  { %6069 = vmatprep.mubr.msk.f32.mxu0 %vm22_vm0, %v524_v23 }
 0x1a1   :  { %6070 = vmatmul.mubr.msk.f32.gmra.mxu0 %vm22_vm0, %v525_v24 }
 0x1a2   :  { %6072 = vmatprep.mubr.msk.f32.mxu0 %vm22_vm0, %v526_v25 }
 0x1a5   :  { %6073 = vmatmul.mubr.msk.f32.gmra.mxu0 %vm22_vm0, %v527_v26 }
 0x250   :  { %v6041_v27 = vpop.f32.mrf.mxu1  ;;  %v6048_v28 = vpop.f32.mrf.mxu0 }
 0x251   :  { %513 = vst.msk [vmem:[#allocation2 + $0x58] sm:$0xff] %vm22_vm0, %v6041_v27  ;;  %515 = vst.msk [vmem:[#allocation2 + $0x68] sm:$0xff] %vm22_vm0, %v6048_v28 }
 0x252   :  { %v332_v31 = vpop.f32.mrf.mxu1  ;;  %v407_v32 = vpop.f32.mrf.mxu0 }
 0x253   :  { %512 = vst.msk [vmem:[#allocation2 + $0x50] sm:$0xff] %vm22_vm0, %v332_v31  ;;  %514 = vst.msk [vmem:[#allocation2 + $0x60] sm:$0xff] %vm22_vm0, %v407_v32 }
 0x255   :  { %v6055_v34 = vpop.f32.mrf.mxu1  ;;  %v6062_v35 = vpop.f32.mrf.mxu0 }
 0x256   :  { %517 = vst.msk [vmem:[#allocation2 + $0x78] sm:$0xff] %vm22_vm0, %v6055_v34  ;;  %v7296_v38 = vadd.f32 %v6062_v35, %v7292_v33 }
 0x257   :  { %v482_v36 = vpop.f32.mrf.mxu1  ;;  %v654_v37 = vpop.f32.mrf.mxu0 }
 0x258   :  { %10222 = vst [vmem:[#allocation7_spill] sm:$0xff] %v7296_v38  ;;  %516 = vst.msk [vmem:[#allocation2 + $0x70] sm:$0xff] %vm22_vm0, %v482_v36  ;;  %v7300_v39 = vadd.f32 %v654_v37, %v7292_v33  ;;  %v529_v45 = vld [vmem:[#allocation2 + $0x58] sm:$0xff]  ;;  %v531_v48 = vld [vmem:[#allocation2 + $0x68] sm:$0xff]  ;;  %v737_v49 = vsel %vm733_vm3, %v7296_v38, 0.0 }
 0x259   :  { %v6065_v40 = vpop.f32.mrf.mxu0 }
 0x25a   :  { %10223 = vst [vmem:[#allocation8_spill] sm:$0xff] %v7300_v39  ;;  %v734_v41 = vsel %vm733_vm3, %v7300_v39, 0.0  ;;  %v528_v42 = vld [vmem:[#allocation2 + $0x50] sm:$0xff]  ;;  %v530_v43 = vld [vmem:[#allocation2 + $0x60] sm:$0xff]  ;;  %v7306_v46 = vadd.f32 %v6065_v40, %v7292_v33 }
 0x25b   :  { %v664_v44 = vpop.f32.mrf.mxu0  ;;  %735 = vadd.xlane.f32.xlu0 %v734_v41  ;;  %6075 = vmatprep.mubr.msk.f32.mxu0 %vm22_vm0, %v528_v42 }
 0x25c   :  { %10224 = vst [vmem:[#allocation9_spill] sm:$0xff] %v7306_v46  ;;  %v7309_v47 = vadd.f32 %v664_v44, %v7292_v33  ;;  %6078 = vmatprep.mubr.msk.f32.mxu1 %vm22_vm0, %v530_v43  ;;  %6076 = vmatmul.mubr.msk.f32.gmra.mxu0 %vm22_vm0, %v529_v45  ;;  %v743_v56 = vsel %vm733_vm3, %v7306_v46, 0.0 }
 0x25d   :  { %v6068_v50 = vpop.f32.mrf.mxu0  ;;  %6079 = vmatmul.mubr.msk.f32.vlgmr.msra.gmra.mxu1 %vm22_vm0, %v531_v48  ;;  %v533_v55 = vld [vmem:[#allocation2 + $0x78] sm:$0xff] }
 0x25e   :  { %10225 = vst [vmem:[#allocation10_spill] sm:$0xff] %v7309_v47  ;;  %v740_v51 = vsel %vm733_vm3, %v7309_v47, 0.0  ;;  %v7326_v58 = vadd.f32 %v6068_v50, %v7292_v33 }
 0x25f   :  { %v674_v52 = vpop.f32.mrf.mxu0  ;;  %741 = vadd.xlane.f32.xlu1 %v740_v51  ;;  %738 = vadd.xlane.f32.xlu0 %v737_v49  ;;  %v532_v53 = vld [vmem:[#allocation2 + $0x70] sm:$0xff] }
 0x260   :  { %v7319_v54 = vadd.f32 %v674_v52, %v7292_v33  ;;  %6081 = vmatprep.mubr.msk.f32.mxu1 %vm22_vm0, %v532_v53  ;;  %10227 = vst [vmem:[#allocation12_spill] sm:$0xff] %v7326_v58  ;;  %v749_v0 = vsel %vm733_vm3, %v7326_v58, 0.0 }
 0x261   :  { %v6071_v57 = vpop.f32.mrf.mxu0  ;;  %6082 = vmatmul.mubr.msk.f32.gmra.mxu1 %vm22_vm0, %v533_v55 }
 0x262   :  { %10226 = vst [vmem:[#allocation11_spill] sm:$0xff] %v7319_v54  ;;  %v746_v59 = vsel %vm733_vm3, %v7319_v54, 0.0  ;;  %v7334_v63 = vadd.f32 %v6071_v57, %v7292_v33 }
 0x263   :  { %v684_v60 = vpop.f32.mrf.mxu0  ;;  %744 = vadd.xlane.f32.xlu1 %v743_v56  ;;  %747 = vadd.xlane.f32.xlu0 %v746_v59 }
 0x264   :  { %v7331_v61 = vadd.f32 %v684_v60, %v7292_v33  ;;  %10229 = vst [vmem:[#allocation14_spill] sm:$0xff] %v7334_v63  ;;  %v755_v9 = vsel %vm733_vm3, %v7334_v63, 0.0 }
 0x265   :  { %v6074_v62 = vpop.f32.mrf.mxu0 }
 0x266   :  { %10228 = vst [vmem:[#allocation13_spill] sm:$0xff] %v7331_v61  ;;  %v752_v1 = vsel %vm733_vm3, %v7331_v61, 0.0  ;;  %v7344_v4 = vadd.f32 %v6074_v62, %v7292_v33 }
 0x267   :  { %v694_v2 = vpop.f32.mrf.mxu0  ;;  %750 = vadd.xlane.f32.xlu1 %v749_v0  ;;  %753 = vadd.xlane.f32.xlu0 %v752_v1 }
 0x268   :  { %v7341_v3 = vadd.f32 %v694_v2, %v7292_v33  ;;  %10231 = vst [vmem:[#allocation16_spill] sm:$0xff] %v7344_v4  ;;  %v761_v11 = vsel %vm733_vm3, %v7344_v4, 0.0 }
 0x26a   :  { %10230 = vst [vmem:[#allocation15_spill] sm:$0xff] %v7341_v3  ;;  %v758_v10 = vsel %vm733_vm3, %v7341_v3, 0.0 }
 0x26b   :  { %756 = vadd.xlane.f32.xlu1 %v755_v9  ;;  %759 = vadd.xlane.f32.xlu0 %v758_v10 }
 0x26f   :  { %762 = vadd.xlane.f32.xlu1 %v761_v11 }
 0x2e4   :  { %v736_v13 = vpop.xlane.xlu0 %735 }
 0x2e5   :  { %v783_v26 = vmul.f32 0.03125, %v736_v13 }
 0x2e7   :  { %v7377_v41 = vsub.f32 %v7300_v39, %v783_v26 }
 0x2e8   :  { %v742_v12 = vpop.xlane.xlu1 %741  ;;  %v739_v15 = vpop.xlane.xlu0 %738 }
 0x2e9   :  { %v784_v20 = vmul.f32 0.03125, %v739_v15  ;;  %v785_v42 = vmul.f32 0.03125, %v742_v12  ;;  %v815_v56 = vmul.f32 %v7377_v41, %v7377_v41 }
 0x2eb   :  { %v7369_v34 = vsub.f32 %v7296_v38, %v784_v20  ;;  %v831_v9 = vsel %vm733_vm3, %v815_v56, 0.0  ;;  %v1184_v56 = vld [vmem:[%s10113_s2 + $0x20] sm:$0xff]  ;;  %v7195_v38 = vmov -1e+30  }
 0x2ec   :  { %v745_v14 = vpop.xlane.xlu1 %744  ;;  %v748_v32 = vpop.xlane.xlu0 %747 }
 0x2ed   :  { %v786_v35 = vmul.f32 0.03125, %v745_v14  ;;  %v816_v51 = vmul.f32 %v7369_v34, %v7369_v34  ;;  %v787_v53 = vmul.f32 0.03125, %v748_v32 }
 0x2ef   :  { %v7385_v48 = vsub.f32 %v7306_v46, %v786_v35  ;;  %v834_v60 = vsel %vm733_vm3, %v816_v51, 0.0  ;;  %v7405_v1 = vsub.f32 %v7319_v54, %v787_v53  ;;  %v1186_v51 = vld [vmem:[%s10113_s2 + $0x30] sm:$0xff]  ;;  %v1185_v53 = vld [vmem:[%s10113_s2 + $0x28] sm:$0xff] }
 0x2f0   :  { %v751_v25 = vpop.xlane.xlu1 %750  ;;  %v754_v52 = vpop.xlane.xlu0 %753 }
 0x2f1   :  { %v788_v49 = vmul.f32 0.03125, %v751_v25  ;;  %v818_v62 = vmul.f32 %v7385_v48, %v7385_v48  ;;  %v789_v2 = vmul.f32 0.03125, %v754_v52  ;;  %v819_v20 = vmul.f32 %v7405_v1, %v7405_v1  ;;  %v984_v52 = vld [vmem:[%s10113_s2 + $0x8] sm:$0xff] }
 0x2f3   :  { %v7399_v57 = vsub.f32 %v7326_v58, %v788_v49  ;;  %v840_v14 = vsel %vm733_vm3, %v818_v62, 0.0  ;;  %v1187_v49 = vld [vmem:[%s10113_s2 + $0x38] sm:$0xff] }
 0x2f4   :  { %v757_v45 = vpop.xlane.xlu1 %756  ;;  %v760_v11 = vpop.xlane.xlu0 %759  ;;  %6116 = vmatprep.subr.mxu0 %v1187_v49 }
 0x2f5   :  { %v790_v59 = vmul.f32 0.03125, %v757_v45  ;;  %v820_v15 = vmul.f32 %v7399_v57, %v7399_v57  ;;  %v986_v45 = vld [vmem:[%s10113_s2 + $0x18] sm:$0xff]  ;;  %6117 = vmatpush3.msra.mxu0 %v1187_v49 }
 0x2f6   :  { %6084 = vmatprep.subr.mxu1 %v986_v45  ;;  %6118 = vmatprep.subr.mxu0 %v1186_v51 }
 0x2f7   :  { %v7411_v12 = vsub.f32 %v7334_v63, %v790_v59  ;;  %6085 = vmatpush3.msra.mxu1 %v986_v45  ;;  %6119 = vmatpush3.msra.mxu0 %v1186_v51 }
 0x2f8   :  { %v763_v0 = vpop.xlane.xlu1 %762  ;;  %6120 = vmatprep.subr.mxu0 %v1185_v53 }
 0x2f9   :  { %v792_v13 = vmul.f32 0.03125, %v763_v0  ;;  %v822_v25 = vmul.f32 %v7411_v12, %v7411_v12  ;;  %6121 = vmatpush3.msra.mxu0 %v1185_v53 }
 0x2fa   :  { %6122 = vmatprep.subr.mxu0 %v1184_v56 }
 0x2fb   :  { %v852_v32 = vsel %vm733_vm3, %v822_v25, 0.0  ;;  %6123 = vmatpush3.msra.mxu0 %v1184_v56 }
 0x31c   :  { %v6077_v16 = vpop.f32.mrf.mxu0 }
 0x31d   :  { %v7353_v17 = vadd.f32 %v6077_v16, %v7292_v33  ;;  %v6080_v18 = vpop.f32.mrf.mxu1  ;;  %v7417_v16 = vsub.f32 %v7331_v61, %v789_v2  ;;  %v10238_v61 = vsub.s32 5, %v7238_v5 }
 0x31e   :  { %v704_v19 = vpop.f32.mrf.mxu0  ;;  %v7356_v21 = vadd.f32 %v6080_v18, %v7292_v33  ;;  %v791_v18 = vmul.f32 0.03125, %v760_v11 }
 0x31f   :  { %10232 = vst [vmem:[#allocation17_spill] sm:$0xff] %v7353_v17  ;;  %v7359_v22 = vadd.f32 %v704_v19, %v7292_v33  ;;  %v714_v23 = vpop.f32.mrf.mxu1  ;;  %v767_v24 = vsel %vm733_vm3, %v7353_v17, 0.0 }
 0x320   :  { %10233 = vst [vmem:[#allocation18_spill] sm:$0xff] %v7356_v21  ;;  %768 = vadd.xlane.f32.xlu1 %v767_v24  ;;  %v7364_v27 = vadd.f32 %v714_v23, %v7292_v33  ;;  %v773_v40 = vsel %vm733_vm3, %v7356_v21, 0.0  ;;  %v7423_v23 = vsub.f32 %v7344_v4, %v792_v13  ;;  %v846_v24 = vsel %vm733_vm3, %v820_v15, 0.0 }
 0x321   :  { %10234 = vst [vmem:[#allocation19_spill] sm:$0xff] %v7359_v22  ;;  %v6083_v28 = vpop.f32.mrf.mxu1  ;;  %v764_v31 = vsel %vm733_vm3, %v7359_v22, 0.0  ;;  %v7429_v26 = vsub.f32 %v7341_v3, %v791_v18 }
 0x322   :  { %10235 = vst [vmem:[#allocation20_spill] sm:$0xff] %v7364_v27  ;;  %765 = vadd.xlane.f32.xlu0 %v764_v31  ;;  %v7372_v36 = vadd.f32 %v6083_v28, %v7292_v33  ;;  %v770_v44 = vsel %vm733_vm3, %v7364_v27, 0.0  ;;  %v843_v28 = vsel %vm733_vm3, %v819_v20, 0.0  ;;  %v821_v31 = vmul.f32 %v7417_v16, %v7417_v16 }
 0x323   :  { %v724_v37 = vpop.f32.mrf.mxu1  ;;  %v824_v35 = vmul.f32 %v7423_v23, %v7423_v23 }
 0x324   :  { %10236 = vst [vmem:[#allocation21_spill] sm:$0xff] %v7372_v36  ;;  %774 = vadd.xlane.f32.xlu1 %v773_v40  ;;  %v7380_v43 = vadd.f32 %v724_v37, %v7292_v33  ;;  %v779_v50 = vsel %vm733_vm3, %v7372_v36, 0.0  ;;  %v7392_v33 = vsub.f32 %v7309_v47, %v785_v42  ;;  %v849_v37 = vsel %vm733_vm3, %v821_v31, 0.0 }
 0x325   :  { %v823_v40 = vmul.f32 %v7429_v26, %v7429_v26  ;;  %v858_v42 = vsel %vm733_vm3, %v824_v35, 0.0 }
 0x326   :  { %10237 = vst [vmem:[#allocation22_spill] sm:$0xff] %v7380_v43  ;;  %771 = vadd.xlane.f32.xlu0 %v770_v44  ;;  %v776_v55 = vsel %vm733_vm3, %v7380_v43, 0.0  ;;  %v817_v10 = vmul.f32 %v7392_v33, %v7392_v33 }
 0x327   :  { %v855_v44 = vsel %vm733_vm3, %v823_v40, 0.0 }
 0x328   :  { %780 = vadd.xlane.f32.xlu1 %v779_v50  ;;  %v837_v19 = vsel %vm733_vm3, %v817_v10, 0.0  ;;  %v985_v50 = vld [vmem:[%s10113_s2 + $0x10] sm:$0xff] }
 0x329   :  { %6086 = vmatprep.subr.mxu1 %v985_v50 }
 0x32a   :  { %777 = vadd.xlane.f32.xlu0 %v776_v55  ;;  %6087 = vmatpush3.msra.mxu1 %v985_v50  ;;  %v983_v55 = vld [vmem:[%s10113_s2] sm:$0xff] }
 0x32b   :  { %6088 = vmatprep.subr.mxu1 %v984_v52 }
 0x32c   :  { %835 = vadd.xlane.f32.xlu1 %v834_v60  ;;  %6089 = vmatpush3.msra.mxu1 %v984_v52 }
 0x32d   :  { %6090 = vmatprep.subr.mxu1 %v983_v55 }
 0x32e   :  { %832 = vadd.xlane.f32.xlu0 %v831_v9  ;;  %6091 = vmatpush3.msra.mxu1 %v983_v55 }
 0x330   :  { %841 = vadd.xlane.f32.xlu1 %v840_v14 }
 0x332   :  { %838 = vadd.xlane.f32.xlu0 %v837_v19 }
 0x334   :  { %847 = vadd.xlane.f32.xlu1 %v846_v24 }
 0x336   :  { %844 = vadd.xlane.f32.xlu0 %v843_v28 }
 0x338   :  { %853 = vadd.xlane.f32.xlu1 %v852_v32 }
 0x33a   :  { %850 = vadd.xlane.f32.xlu0 %v849_v37 }
 0x33c   :  { %859 = vadd.xlane.f32.xlu1 %v858_v42 }
 0x33e   :  { %856 = vadd.xlane.f32.xlu0 %v855_v44 }
 0x3a9   :  { %v769_v59 = vpop.xlane.xlu1 %768 }
 0x3aa   :  { %v794_v60 = vmul.f32 0.03125, %v769_v59 }
 0x3ab   :  { %v766_v62 = vpop.xlane.xlu0 %765 }
 0x3ac   :  { %v7467_v0 = vsub.f32 %v7353_v17, %v794_v60  ;;  %v793_v2 = vmul.f32 0.03125, %v766_v62 }
 0x3ad   :  { %v775_v9 = vpop.xlane.xlu1 %774 }
 0x3ae   :  { %v7470_v10 = vsub.f32 %v7359_v22, %v793_v2  ;;  %v796_v11 = vmul.f32 0.03125, %v775_v9  ;;  %v826_v13 = vmul.f32 %v7467_v0, %v7467_v0 }
 0x3af   :  { %v772_v14 = vpop.xlane.xlu0 %771 }
 0x3b0   :  { %v7475_v15 = vsub.f32 %v7356_v21, %v796_v11  ;;  %v795_v18 = vmul.f32 0.03125, %v772_v14  ;;  %v864_v19 = vsel %vm733_vm3, %v826_v13, 0.0  ;;  %v825_v20 = vmul.f32 %v7470_v10, %v7470_v10 }
 0x3b1   :  { %v781_v24 = vpop.xlane.xlu1 %780  ;;  %865 = vadd.xlane.f32.xlu1 %v864_v19 }
 0x3b2   :  { %v7481_v25 = vsub.f32 %v7364_v27, %v795_v18  ;;  %v798_v28 = vmul.f32 0.03125, %v781_v24  ;;  %v861_v31 = vsel %vm733_vm3, %v825_v20, 0.0  ;;  %v828_v32 = vmul.f32 %v7475_v15, %v7475_v15 }
 0x3b3   :  { %862 = vadd.xlane.f32.xlu0 %v861_v31  ;;  %v778_v35 = vpop.xlane.xlu0 %777 }
 0x3b4   :  { %v7487_v37 = vsub.f32 %v7372_v36, %v798_v28  ;;  %v797_v40 = vmul.f32 0.03125, %v778_v35  ;;  %v870_v42 = vsel %vm733_vm3, %v828_v32, 0.0  ;;  %v827_v44 = vmul.f32 %v7481_v25, %v7481_v25 }
 0x3b5   :  { %871 = vadd.xlane.f32.xlu1 %v870_v42  ;;  %v836_v45 = vpop.xlane.xlu1 %835 }
 0x3b6   :  { %v7493_v49 = vsub.f32 %v7380_v43, %v797_v40  ;;  %v880_v50 = vmul.f32 0.03125, %v836_v45  ;;  %v867_v51 = vsel %vm733_vm3, %v827_v44, 0.0  ;;  %v830_v52 = vmul.f32 %v7487_v37, %v7487_v37 }
 0x3b7   :  { %868 = vadd.xlane.f32.xlu0 %v867_v51  ;;  %v833_v53 = vpop.xlane.xlu0 %832  ;;  %v10119_v44 = vsub.s32 1, %v7238_v5 }
 0x3b8   :  { %v896_v55 = vadd.f32 1e-05, %v880_v50  ;;  %v879_v56 = vmul.f32 0.03125, %v833_v53  ;;  %v876_v59 = vsel %vm733_vm3, %v830_v52, 0.0  ;;  %v829_v60 = vmul.f32 %v7493_v49, %v7493_v49 }
 0x3b9   :  { %877 = vadd.xlane.f32.xlu1 %v876_v59  ;;  %v842_v62 = vpop.xlane.xlu1 %841  ;;  %v7506_v59 = vrot.slane %v7285_v30, %v10119_v44 }
 0x3ba   :  { %6753 = vrsqrt.f32 %v896_v55  ;;  %v895_v2 = vadd.f32 1e-05, %v879_v56  ;;  %v882_v9 = vmul.f32 0.03125, %v842_v62  ;;  %v873_v11 = vsel %vm733_vm3, %v829_v60, 0.0 }
 0x3bb   :  { %874 = vadd.xlane.f32.xlu0 %v873_v11  ;;  %v839_v13 = vpop.xlane.xlu0 %838  ;;  %v10118_v62 = vsub.s32 2, %v7238_v5 }
 0x3bc   :  { %6755 = vrsqrt.f32 %v895_v2  ;;  %v898_v14 = vadd.f32 1e-05, %v882_v9  ;;  %v881_v18 = vmul.f32 0.03125, %v839_v13 }
 0x3bd   :  { %v848_v19 = vpop.xlane.xlu1 %847 }
 0x3be   :  { %6757 = vrsqrt.f32 %v898_v14  ;;  %v897_v20 = vadd.f32 1e-05, %v881_v18  ;;  %v884_v24 = vmul.f32 0.03125, %v848_v19 }
 0x3bf   :  { %v845_v28 = vpop.xlane.xlu0 %844 }
 0x3c0   :  { %6759 = vrsqrt.f32 %v897_v20  ;;  %v900_v31 = vadd.f32 1e-05, %v884_v24  ;;  %v883_v32 = vmul.f32 0.03125, %v845_v28  ;;  %v7515_v24 = vrot.slane %v7285_v30, %v10118_v62 }
 0x3c1   :  { %v854_v35 = vpop.xlane.xlu1 %853 }
 0x3c2   :  { %6761 = vrsqrt.f32 %v900_v31  ;;  %v899_v40 = vadd.f32 1e-05, %v883_v32  ;;  %v886_v42 = vmul.f32 0.03125, %v854_v35 }
 0x3c3   :  { %v851_v45 = vpop.xlane.xlu0 %850 }
 0x3c4   :  { %6763 = vrsqrt.f32 %v899_v40  ;;  %v902_v50 = vadd.f32 1e-05, %v886_v42  ;;  %v885_v51 = vmul.f32 0.03125, %v851_v45 }
 0x3c5   :  { %v860_v52 = vpop.xlane.xlu1 %859 }
 0x3c6   :  { %6765 = vrsqrt.f32 %v902_v50  ;;  %v901_v53 = vadd.f32 1e-05, %v885_v51  ;;  %v888_v55 = vmul.f32 0.03125, %v860_v52 }
 0x3c7   :  { %v6754_v56 = vpop.eup %6753  ;;  %v857_v60 = vpop.xlane.xlu0 %856 }
 0x3c8   :  { %v928_v2 = vmul.f32 %v6754_v56, %v7369_v34  ;;  %6767 = vrsqrt.f32 %v901_v53  ;;  %v904_v9 = vadd.f32 1e-05, %v888_v55  ;;  %v887_v11 = vmul.f32 0.03125, %v857_v60 }
 0x3c9   :  { %v6756_v13 = vpop.eup %6755 }
 0x3ca   :  { %6769 = vrsqrt.f32 %v904_v9  ;;  %v903_v14 = vadd.f32 1e-05, %v887_v11  ;;  %v927_v18 = vmul.f32 %v6756_v13, %v7377_v41  ;;  %v948_v20 = vmul.f32 %v7506_v59, %v928_v2 }
 0x3cb   :  { %v6758_v19 = vpop.eup %6757 }
 0x3cc   :  { %6771 = vrsqrt.f32 %v903_v14  ;;  %v947_v28 = vmul.f32 %v7506_v59, %v927_v18  ;;  %v930_v34 = vmul.f32 %v6758_v19, %v7385_v48  ;;  %v7524_v40 = vadd.f32 %v7515_v24, %v948_v20  ;;  %v1340_v20 = vld [vmem:[%s10113_s2 + $0x58] sm:$0xff] }
 0x3cd   :  { %v6760_v31 = vpop.eup %6759  ;;  %6148 = vmatprep.subr.mxu1 %v1340_v20 }
 0x3ce   :  { %v7520_v32 = vadd.f32 %v7515_v24, %v947_v28  ;;  %v929_v35 = vmul.f32 %v6760_v31, %v7392_v33  ;;  %v950_v42 = vmul.f32 %v7506_v59, %v930_v34 }
 0x3cf   :  { %v6762_v41 = vpop.eup %6761 }
 0x3d0   :  { %6092 = vmatprep.mubr.msk.f32.mxu1 %vm733_vm3, %v7520_v32  ;;  %6124 = vmatprep.mubr.msk.f32.mxu0 %vm733_vm3, %v7520_v32  ;;  %v949_v48 = vmul.f32 %v7506_v59, %v929_v35  ;;  %v932_v45 = vmul.f32 %v6762_v41, %v7399_v57  ;;  %v7542_v53 = vadd.f32 %v7515_v24, %v950_v42  ;;  %v1338_v41 = vld [vmem:[%s10113_s2 + $0x48] sm:$0xff]  ;;  %v1337_v42 = vld [vmem:[%s10113_s2 + $0x40] sm:$0xff] }
 0x3d1   :  { %v6764_v50 = vpop.eup %6763  ;;  %6093 = vmatmul.mubr.msk.f32.vlgmr.msra.gmra.mxu1 %vm733_vm3, %v7524_v40  ;;  %6125 = vmatmul.mubr.msk.f32.vlgmr.msra.gmra.mxu0 %vm733_vm3, %v7524_v40 }
 0x3d2   :  { %v7538_v33 = vadd.f32 %v7515_v24, %v949_v48  ;;  %v931_v51 = vmul.f32 %v6764_v50, %v7405_v1  ;;  %v952_v55 = vmul.f32 %v7506_v59, %v932_v45  ;;  %6149 = vmatpush3.msra.mxu1 %v1340_v20 }
 0x3d3   :  { %v6766_v52 = vpop.eup %6765 }
 0x3d4   :  { %6095 = vmatprep.mubr.msk.f32.mxu1 %vm733_vm3, %v7538_v33  ;;  %6127 = vmatprep.mubr.msk.f32.mxu0 %vm733_vm3, %v7538_v33  ;;  %v951_v57 = vmul.f32 %v7506_v59, %v931_v51  ;;  %v934_v56 = vmul.f32 %v6766_v52, %v7411_v12  ;;  %v7560_v11 = vadd.f32 %v7515_v24, %v952_v55 }
 0x3d5   :  { %v6768_v60 = vpop.eup %6767  ;;  %6096 = vmatmul.mubr.msk.f32.gmra.mxu1 %vm733_vm3, %v7542_v53  ;;  %6128 = vmatmul.mubr.msk.f32.gmra.mxu0 %vm733_vm3, %v7542_v53 }
 0x3d6   :  { %v7556_v1 = vadd.f32 %v7515_v24, %v951_v57  ;;  %v933_v2 = vmul.f32 %v6768_v60, %v7417_v16  ;;  %v954_v13 = vmul.f32 %v7506_v59, %v934_v56 }
 0x3d7   :  { %v6770_v9 = vpop.eup %6769 }
 0x3d8   :  { %6098 = vmatprep.mubr.msk.f32.mxu1 %vm733_vm3, %v7556_v1  ;;  %6130 = vmatprep.mubr.msk.f32.mxu0 %vm733_vm3, %v7556_v1  ;;  %v953_v12 = vmul.f32 %v7506_v59, %v933_v2  ;;  %v936_v14 = vmul.f32 %v6770_v9, %v7423_v23  ;;  %v7581_v28 = vadd.f32 %v7515_v24, %v954_v13 }
 0x3d9   :  { %v6772_v18 = vpop.eup %6771  ;;  %6099 = vmatmul.mubr.msk.f32.gmra.mxu1 %vm733_vm3, %v7560_v11  ;;  %6131 = vmatmul.mubr.msk.f32.gmra.mxu0 %vm733_vm3, %v7560_v11 }
 0x3da   :  { %v7574_v16 = vadd.f32 %v7515_v24, %v953_v12  ;;  %v935_v19 = vmul.f32 %v6772_v18, %v7429_v26  ;;  %v956_v23 = vmul.f32 %v7506_v59, %v936_v14  ;;  %v1339_v26 = vld [vmem:[%s10113_s2 + $0x50] sm:$0xff] }
 0x3db   :  { %6150 = vmatprep.subr.mxu1 %v1339_v26 }
 0x3dc   :  { %6101 = vmatprep.mubr.msk.f32.mxu1 %vm733_vm3, %v7574_v16  ;;  %6133 = vmatprep.mubr.msk.f32.mxu0 %vm733_vm3, %v7574_v16  ;;  %v955_v34 = vmul.f32 %v7506_v59, %v935_v19  ;;  %v7600_v35 = vadd.f32 %v7515_v24, %v956_v23 }
 0x3dd   :  { %6102 = vmatmul.mubr.msk.f32.gmra.mxu1 %vm733_vm3, %v7581_v28  ;;  %6134 = vmatmul.mubr.msk.f32.gmra.mxu0 %vm733_vm3, %v7581_v28 }
 0x3de   :  { %v7597_v31 = vadd.f32 %v7515_v24, %v955_v34  ;;  %6151 = vmatpush3.msra.mxu1 %v1339_v26 }
 0x3df   :  { %6152 = vmatprep.subr.mxu1 %v1338_v41 }
 0x3e0   :  { %6104 = vmatprep.mubr.msk.f32.mxu1 %vm733_vm3, %v7597_v31  ;;  %6136 = vmatprep.mubr.msk.f32.mxu0 %vm733_vm3, %v7597_v31 }
 0x3e1   :  { %6105 = vmatmul.mubr.msk.f32.gmra.mxu1 %vm733_vm3, %v7600_v35  ;;  %6137 = vmatmul.mubr.msk.f32.gmra.mxu0 %vm733_vm3, %v7600_v35 }
 0x3e2   :  { %6153 = vmatpush3.msra.mxu1 %v1338_v41 }
 0x3e3   :  { %6154 = vmatprep.subr.mxu1 %v1337_v42 }
 0x3e4   :  { %6155 = vmatpush3.msra.mxu1 %v1337_v42 }
 0x43a   :  { %v866_v48 = vpop.xlane.xlu1 %865 }
 0x43b   :  { %v890_v45 = vmul.f32 0.03125, %v866_v48 }
 0x43c   :  { %v863_v50 = vpop.xlane.xlu0 %862 }
 0x43d   :  { %v906_v51 = vadd.f32 1e-05, %v890_v45  ;;  %v889_v52 = vmul.f32 0.03125, %v863_v50 }
 0x43e   :  { %v872_v55 = vpop.xlane.xlu1 %871 }
 0x43f   :  { %6773 = vrsqrt.f32 %v906_v51  ;;  %v905_v57 = vadd.f32 1e-05, %v889_v52  ;;  %v892_v56 = vmul.f32 0.03125, %v872_v55 }
 0x440   :  { %v869_v60 = vpop.xlane.xlu0 %868 }
 0x441   :  { %6775 = vrsqrt.f32 %v905_v57  ;;  %v908_v2 = vadd.f32 1e-05, %v892_v56  ;;  %v891_v9 = vmul.f32 0.03125, %v869_v60 }
 0x442   :  { %v878_v13 = vpop.xlane.xlu1 %877 }
 0x443   :  { %6777 = vrsqrt.f32 %v908_v2  ;;  %v907_v12 = vadd.f32 1e-05, %v891_v9  ;;  %v894_v14 = vmul.f32 0.03125, %v878_v13 }
 0x444   :  { %v875_v18 = vpop.xlane.xlu0 %874 }
 0x445   :  { %6779 = vrsqrt.f32 %v907_v12  ;;  %v910_v19 = vadd.f32 1e-05, %v894_v14  ;;  %v893_v20 = vmul.f32 0.03125, %v875_v18 }
 0x447   :  { %6781 = vrsqrt.f32 %v910_v19  ;;  %v909_v23 = vadd.f32 1e-05, %v893_v20 }
 0x449   :  { %6783 = vrsqrt.f32 %v909_v23 }
 0x44c   :  { %v6774_v34 = vpop.eup %6773 }
 0x44d   :  { %v938_v26 = vmul.f32 %v6774_v34, %v7467_v0 }
 0x44e   :  { %v6776_v41 = vpop.eup %6775 }
 0x44f   :  { %v937_v42 = vmul.f32 %v6776_v41, %v7470_v10  ;;  %v958_v45 = vmul.f32 %v7506_v59, %v938_v26 }
 0x450   :  { %v6778_v48 = vpop.eup %6777 }
 0x451   :  { %v957_v50 = vmul.f32 %v7506_v59, %v937_v42  ;;  %v940_v51 = vmul.f32 %v6778_v48, %v7475_v15  ;;  %v978_v60 = vadd.f32 %v7515_v24, %v958_v45 }
 0x452   :  { %v6780_v52 = vpop.eup %6779 }
 0x453   :  { %v977_v55 = vadd.f32 %v7515_v24, %v957_v50  ;;  %v939_v57 = vmul.f32 %v6780_v52, %v7481_v25  ;;  %v960_v0 = vmul.f32 %v7506_v59, %v940_v51 }
 0x454   :  { %v6782_v56 = vpop.eup %6781 }
 0x455   :  { %6107 = vmatprep.mubr.msk.f32.mxu1 %vm733_vm3, %v977_v55  ;;  %6139 = vmatprep.mubr.msk.f32.mxu0 %vm733_vm3, %v977_v55  ;;  %v959_v10 = vmul.f32 %v7506_v59, %v939_v57  ;;  %v942_v2 = vmul.f32 %v6782_v56, %v7487_v37  ;;  %v980_v13 = vadd.f32 %v7515_v24, %v960_v0 }
 0x456   :  { %v6784_v9 = vpop.eup %6783  ;;  %6108 = vmatmul.mubr.msk.f32.gmra.mxu1 %vm733_vm3, %v978_v60  ;;  %6140 = vmatmul.mubr.msk.f32.gmra.mxu0 %vm733_vm3, %v978_v60 }
 0x457   :  { %v979_v15 = vadd.f32 %v7515_v24, %v959_v10  ;;  %v941_v25 = vmul.f32 %v6784_v9, %v7493_v49  ;;  %v962_v12 = vmul.f32 %v7506_v59, %v942_v2  ;;  %v10117_v49 = vsub.s32 3, %v7238_v5 }
 0x458   :  { %v10116_v2 = vsub.s32 4, %v7238_v5 }
 0x459   :  { %6110 = vmatprep.mubr.msk.f32.mxu1 %vm733_vm3, %v979_v15  ;;  %6142 = vmatprep.mubr.msk.f32.mxu0 %vm733_vm3, %v979_v15  ;;  %v961_v14 = vmul.f32 %v7506_v59, %v941_v25  ;;  %v982_v18 = vadd.f32 %v7515_v24, %v962_v12 }
 0x45a   :  { %6111 = vmatmul.mubr.msk.f32.gmra.mxu1 %vm733_vm3, %v980_v13  ;;  %6143 = vmatmul.mubr.msk.f32.gmra.mxu0 %vm733_vm3, %v980_v13  ;;  %v7742_v12 = vrot.slane %v7285_v30, %v10116_v2 }
 0x45b   :  { %v981_v37 = vadd.f32 %v7515_v24, %v961_v14  ;;  %v7681_v24 = vrot.slane %v7285_v30, %v10117_v49 }
 0x45d   :  { %6113 = vmatprep.mubr.msk.f32.mxu1 %vm733_vm3, %v981_v37  ;;  %6145 = vmatprep.mubr.msk.f32.mxu0 %vm733_vm3, %v981_v37 }
 0x45e   :  { %6114 = vmatmul.mubr.msk.f32.gmra.mxu1 %vm733_vm3, %v982_v18  ;;  %6146 = vmatmul.mubr.msk.f32.gmra.mxu0 %vm733_vm3, %v982_v18 }
 0x45f   :  { %6156 = vmatprep.mubr.msk.f32.mxu1 %vm733_vm3, %v7520_v32 }
 0x462   :  { %6157 = vmatmul.mubr.msk.f32.vlgmr.msra.gmra.mxu1 %vm733_vm3, %v7524_v40 }
 0x463   :  { %6159 = vmatprep.mubr.msk.f32.mxu1 %vm733_vm3, %v7538_v33  ;;  %v7687_v33 = vsel %vm1554_vm6, 1.0, %v10121_v8 }
 0x466   :  { %6160 = vmatmul.mubr.msk.f32.gmra.mxu1 %vm733_vm3, %v7542_v53  ;;  %v7690_v53 = vsel %vm1977_vm7, 1.0, %v10121_v8 }
 0x467   :  { %6162 = vmatprep.mubr.msk.f32.mxu1 %vm733_vm3, %v7556_v1 }
 0x46a   :  { %6163 = vmatmul.mubr.msk.f32.gmra.mxu1 %vm733_vm3, %v7560_v11 }
 0x46b   :  { %6165 = vmatprep.mubr.msk.f32.mxu1 %vm733_vm3, %v7574_v16 }
 0x46e   :  { %6166 = vmatmul.mubr.msk.f32.gmra.mxu1 %vm733_vm3, %v7581_v28 }
 0x46f   :  { %6168 = vmatprep.mubr.msk.f32.mxu1 %vm733_vm3, %v7597_v31 }
 0x472   :  { %6169 = vmatmul.mubr.msk.f32.gmra.mxu1 %vm733_vm3, %v7600_v35 }
 0x473   :  { %6171 = vmatprep.mubr.msk.f32.mxu1 %vm733_vm3, %v977_v55 }
 0x476   :  { %6172 = vmatmul.mubr.msk.f32.gmra.mxu1 %vm733_vm3, %v978_v60 }
 0x477   :  { %6174 = vmatprep.mubr.msk.f32.mxu1 %vm733_vm3, %v979_v15 }
 0x47a   :  { %6175 = vmatmul.mubr.msk.f32.gmra.mxu1 %vm733_vm3, %v980_v13 }
 0x47b   :  { %6177 = vmatprep.mubr.msk.f32.mxu1 %vm733_vm3, %v981_v37 }
 0x47e   :  { %6178 = vmatmul.mubr.msk.f32.gmra.mxu1 %vm733_vm3, %v982_v18 }
 0x491   :  { %v7675_v59 = vpop.f32.mrf.mxu1  ;;  %v7698_v16 = vpop.f32.mrf.mxu0 }
 0x492   :  { %v7931_v4 = vadd.f32 %v7698_v16, %v7742_v12 }
 0x493   :  { %v1105_v32 = vpop.f32.mrf.mxu1  ;;  %v7700_v28 = vpop.f32.mrf.mxu0 }
 0x494   :  { %v7684_v40 = vadd.f32 %v1105_v32, %v7681_v24  ;;  %v7950_v16 = vadd.f32 %v7700_v28, %v7742_v12 }
 0x495   :  { %v7702_v31 = vpop.f32.mrf.mxu1  ;;  %v7704_v35 = vpop.f32.mrf.mxu0 }
 0x496   :  { %v1558_v1 = vmul.f32 %v7687_v33, %v7684_v40  ;;  %v1980_v11 = vmul.f32 %v7690_v53, %v7684_v40  ;;  %v7906_v22 = vadd.f32 %v7704_v35, %v7742_v12  ;;  %v7169_v35 = vld [vmem:[%s10113_s2 + $0xe0] sm:$0xff] }
 0x497   :  { %v7706_v19 = vpop.f32.mrf.mxu1  ;;  %v7708_v20 = vpop.f32.mrf.mxu0  ;;  %v7942_v63 = vrot.slane %v7169_v35, %v10238_v61  ;;  %v7961_v61 = vadd.f32 %v7675_v59, %v7681_v24 }
 0x498   :  { %6212 = vmatprep.mubr.msk.f32.mxu0 %vm733_vm3, %v1558_v1  ;;  %6268 = vmatprep.mubr.msk.f32.mxu1 %vm733_vm3, %v1980_v11  ;;  %v7918_v17 = vadd.f32 %v7708_v20, %v7742_v12  ;;  %v7969_v28 = vadd.f32 %v7706_v19, %v7681_v24  ;;  %v7986_v19 = vadd.f32 %v7702_v31, %v7681_v24 }
 0x499   :  { %v7710_v23 = vpop.f32.mrf.mxu1  ;;  %v7712_v34 = vpop.f32.mrf.mxu0  ;;  %v1559_v59 = vmul.f32 %v7687_v33, %v7961_v61  ;;  %v1981_v58 = vmul.f32 %v7690_v53, %v7961_v61 }
 0x49a   :  { %v7878_v27 = vadd.f32 %v7712_v34, %v7742_v12  ;;  %v1560_v47 = vmul.f32 %v7687_v33, %v7969_v28  ;;  %v1982_v46 = vmul.f32 %v7690_v53, %v7969_v28 }
 0x49b   :  { %v7714_v26 = vpop.f32.mrf.mxu1  ;;  %v7716_v41 = vpop.f32.mrf.mxu0 }
 0x49c   :  { %v7892_v21 = vadd.f32 %v7716_v41, %v7742_v12  ;;  %v7999_v39 = vadd.f32 %v7714_v26, %v7681_v24  ;;  %v1983_v26 = vmul.f32 %v7690_v53, %v7986_v19 }
 0x49d   :  { %v7718_v42 = vpop.f32.mrf.mxu1  ;;  %v7720_v48 = vpop.f32.mrf.mxu0 }
 0x49e   :  { %10239 = vst [vmem:[#allocation23_spill] sm:$0xff] %v7999_v39 }
 0x49f   :  { %v7722_v45 = vpop.f32.mrf.mxu1  ;;  %v7724_v50 = vpop.f32.mrf.mxu0 }
 0x4a0   :  { %v7864_v36 = vadd.f32 %v7724_v50, %v7742_v12 }
 0x4a1   :  { %v7726_v51 = vpop.f32.mrf.mxu1  ;;  %v6138_v52 = vpop.f32.mrf.mxu0 }
 0x4a3   :  { %v7728_v55 = vpop.f32.mrf.mxu1  ;;  %v1298_v57 = vpop.f32.mrf.mxu0 }
 0x516   :  { %v7730_v56 = vpop.f32.mrf.mxu1  ;;  %v6141_v60 = vpop.f32.mrf.mxu0 }
 0x518   :  { %v7732_v0 = vpop.f32.mrf.mxu1  ;;  %v1308_v10 = vpop.f32.mrf.mxu0 }
 0x51a   :  { %v7735_v9 = vpop.f32.mrf.mxu1  ;;  %v6144_v15 = vpop.f32.mrf.mxu0 }
 0x51c   :  { %v7737_v25 = vpop.f32.mrf.mxu1  ;;  %v1318_v13 = vpop.f32.mrf.mxu0 }
 0x51d   :  { %v7784_v49 = vadd.f32 %v1318_v13, %v7742_v12  ;;  %v7810_v13 = vadd.f32 %v1308_v10, %v7742_v12  ;;  %v7836_v10 = vadd.f32 %v1298_v57, %v7742_v12 }
 0x51e   :  { %v7744_v14 = vpop.f32.mrf.mxu1  ;;  %v6147_v37 = vpop.f32.mrf.mxu0 }
 0x51f   :  { %v7747_v18 = vadd.f32 %v6147_v37, %v7742_v12 }
 0x520   :  { %v7749_v32 = vpop.f32.mrf.mxu1  ;;  %v1328_v1 = vpop.f32.mrf.mxu0 }
 0x521   :  { %v7752_v11 = vadd.f32 %v1328_v1, %v7742_v12  ;;  %6180 = vmatprep.subr.msk.mxu0 %vm733_vm3, %v7747_v18  ;;  %6236 = vmatprep.subr.msk.mxu1 %vm733_vm3, %v7747_v18  ;;  %v7771_v1 = vadd.f32 %v6144_v15, %v7742_v12  ;;  %v7797_v15 = vadd.f32 %v6141_v60, %v7742_v12 }
 0x522   :  { %v7758_v30 = vpop.f32.mrf.mxu1  ;;  %6181 = vmatpush3.xpose.msk.msra.mxu0 %vm733_vm3, %v7747_v18  ;;  %6237 = vmatpush3.xpose.msk.msra.mxu1 %vm733_vm3, %v7747_v18  ;;  %v7823_v60 = vadd.f32 %v6138_v52, %v7742_v12  ;;  %v7850_v52 = vadd.f32 %v7720_v48, %v7742_v12 }
 0x523   :  { %6182 = vmatprep.subr.msk.mxu0 %vm733_vm3, %v7752_v11  ;;  %6238 = vmatprep.subr.msk.mxu1 %vm733_vm3, %v7752_v11 }
 0x524   :  { %v7768_v37 = vpop.f32.mrf.mxu1 }
 0x526   :  { %v7773_v2 = vpop.f32.mrf.mxu1  ;;  %6183 = vmatpush3.xpose.msk.msra.mxu0 %vm733_vm3, %v7752_v11  ;;  %6239 = vmatpush3.xpose.msk.msra.mxu1 %vm733_vm3, %v7752_v11 }
 0x527   :  { %6184 = vmatprep.subr.msk.mxu0 %vm733_vm3, %v7771_v1  ;;  %6240 = vmatprep.subr.msk.mxu1 %vm733_vm3, %v7771_v1 }
 0x528   :  { %v7786_v62 = vpop.f32.mrf.mxu1 }
 0x52a   :  { %6185 = vmatpush3.xpose.msk.msra.mxu0 %vm733_vm3, %v7771_v1  ;;  %6241 = vmatpush3.xpose.msk.msra.mxu1 %vm733_vm3, %v7771_v1  ;;  %v7799_v44 = vpop.f32.mrf.mxu1 }
 0x52b   :  { %6186 = vmatprep.subr.msk.mxu0 %vm733_vm3, %v7784_v49  ;;  %6242 = vmatprep.subr.msk.mxu1 %vm733_vm3, %v7784_v49 }
 0x52c   :  { %v7812_v29 = vpop.f32.mrf.mxu1 }
 0x52e   :  { %6187 = vmatpush3.xpose.msk.msra.mxu0 %vm733_vm3, %v7784_v49  ;;  %6243 = vmatpush3.xpose.msk.msra.mxu1 %vm733_vm3, %v7784_v49  ;;  %v7825_v8 = vpop.f32.mrf.mxu1 }
 0x52f   :  { %6188 = vmatprep.subr.msk.mxu0 %vm733_vm3, %v7797_v15  ;;  %6244 = vmatprep.subr.msk.mxu1 %vm733_vm3, %v7797_v15 }
 0x530   :  { %v7838_v43 = vpop.f32.mrf.mxu1 }
 0x532   :  { %6189 = vmatpush3.xpose.msk.msra.mxu0 %vm733_vm3, %v7797_v15  ;;  %6245 = vmatpush3.xpose.msk.msra.mxu1 %vm733_vm3, %v7797_v15  ;;  %v7852_v57 = vpop.f32.mrf.mxu1 }
 0x533   :  { %6190 = vmatprep.subr.msk.mxu0 %vm733_vm3, %v7810_v13  ;;  %6246 = vmatprep.subr.msk.mxu1 %vm733_vm3, %v7810_v13 }
 0x534   :  { %v7866_v48 = vpop.f32.mrf.mxu1 }
 0x536   :  { %6191 = vmatpush3.xpose.msk.msra.mxu0 %vm733_vm3, %v7810_v13  ;;  %6247 = vmatpush3.xpose.msk.msra.mxu1 %vm733_vm3, %v7810_v13  ;;  %v7880_v50 = vpop.f32.mrf.mxu1 }
 0x537   :  { %6192 = vmatprep.subr.msk.mxu0 %vm733_vm3, %v7823_v60  ;;  %6248 = vmatprep.subr.msk.mxu1 %vm733_vm3, %v7823_v60 }
 0x538   :  { %v7894_v34 = vpop.f32.mrf.mxu1 }
 0x53a   :  { %6193 = vmatpush3.xpose.msk.msra.mxu0 %vm733_vm3, %v7823_v60  ;;  %6249 = vmatpush3.xpose.msk.msra.mxu1 %vm733_vm3, %v7823_v60  ;;  %v6176_v41 = vpop.f32.mrf.mxu1 }
 0x53b   :  { %6194 = vmatprep.subr.msk.mxu0 %vm733_vm3, %v7836_v10  ;;  %6250 = vmatprep.subr.msk.mxu1 %vm733_vm3, %v7836_v10 }
 0x53c   :  { %v1471_v3 = vpop.f32.mrf.mxu1 }
 0x53e   :  { %6195 = vmatpush3.xpose.msk.msra.mxu0 %vm733_vm3, %v7836_v10  ;;  %6251 = vmatpush3.xpose.msk.msra.mxu1 %vm733_vm3, %v7836_v10  ;;  %v6179_v20 = vpop.f32.mrf.mxu1 }
 0x53f   :  { %6196 = vmatprep.subr.msk.mxu0 %vm733_vm3, %v7850_v52  ;;  %6252 = vmatprep.subr.msk.mxu1 %vm733_vm3, %v7850_v52  ;;  %v7953_v54 = vadd.f32 %v6179_v20, %v7942_v63 }
 0x540   :  { %v1481_v35 = vpop.f32.mrf.mxu1 }
 0x541   :  { %v2348_v12 = vmul.f32 %v7690_v53, %v7953_v54  ;;  %v7974_v20 = vadd.f32 %v1481_v35, %v7942_v63  ;;  %v7991_v35 = vadd.f32 %v6176_v41, %v7942_v63  ;;  %v8008_v41 = vadd.f32 %v1471_v3, %v7942_v63 }
 0x542   :  { %6197 = vmatpush3.xpose.msk.msra.mxu0 %vm733_vm3, %v7850_v52  ;;  %6253 = vmatpush3.xpose.msk.msra.mxu1 %vm733_vm3, %v7850_v52  ;;  %v8026_v3 = vadd.f32 %v7880_v50, %v7942_v63 }
 0x543   :  { %6198 = vmatprep.subr.msk.mxu0 %vm733_vm3, %v7864_v36  ;;  %6254 = vmatprep.subr.msk.mxu1 %vm733_vm3, %v7864_v36  ;;  %v2347_v31 = vmul.f32 %v7690_v53, %v7974_v20  ;;  %10240 = vst [vmem:[#allocation24_spill] sm:$0xff] %v8008_v41  ;;  %v2345_v50 = vmul.f32 %v7690_v53, %v8008_v41 }
 0x544   :  { %10242 = vst [vmem:[#allocation26_spill] sm:$0xff] %v8026_v3 }
 0x546   :  { %6199 = vmatpush3.xpose.msk.msra.mxu0 %vm733_vm3, %v7864_v36  ;;  %6255 = vmatpush3.xpose.msk.msra.mxu1 %vm733_vm3, %v7864_v36 }
 0x547   :  { %6200 = vmatprep.subr.msk.mxu0 %vm733_vm3, %v7878_v27  ;;  %6256 = vmatprep.subr.msk.mxu1 %vm733_vm3, %v7878_v27 }
 0x54a   :  { %6201 = vmatpush3.xpose.msk.msra.mxu0 %vm733_vm3, %v7878_v27  ;;  %6257 = vmatpush3.xpose.msk.msra.mxu1 %vm733_vm3, %v7878_v27 }
 0x54b   :  { %6202 = vmatprep.subr.msk.mxu0 %vm733_vm3, %v7892_v21  ;;  %6258 = vmatprep.subr.msk.mxu1 %vm733_vm3, %v7892_v21 }
 0x54e   :  { %6203 = vmatpush3.xpose.msk.msra.mxu0 %vm733_vm3, %v7892_v21  ;;  %6259 = vmatpush3.xpose.msk.msra.mxu1 %vm733_vm3, %v7892_v21 }
 0x54f   :  { %6204 = vmatprep.subr.msk.mxu0 %vm733_vm3, %v7906_v22  ;;  %6260 = vmatprep.subr.msk.mxu1 %vm733_vm3, %v7906_v22 }
 0x552   :  { %6205 = vmatpush3.xpose.msk.msra.mxu0 %vm733_vm3, %v7906_v22  ;;  %6261 = vmatpush3.xpose.msk.msra.mxu1 %vm733_vm3, %v7906_v22 }
 0x553   :  { %6206 = vmatprep.subr.msk.mxu0 %vm733_vm3, %v7918_v17  ;;  %6262 = vmatprep.subr.msk.mxu1 %vm733_vm3, %v7918_v17 }
 0x556   :  { %6207 = vmatpush3.xpose.msk.msra.mxu0 %vm733_vm3, %v7918_v17  ;;  %6263 = vmatpush3.xpose.msk.msra.mxu1 %vm733_vm3, %v7918_v17 }
 0x557   :  { %6208 = vmatprep.subr.msk.mxu0 %vm733_vm3, %v7931_v4  ;;  %6264 = vmatprep.subr.msk.mxu1 %vm733_vm3, %v7931_v4 }
 0x55a   :  { %6209 = vmatpush3.xpose.msk.msra.mxu0 %vm733_vm3, %v7931_v4  ;;  %6265 = vmatpush3.xpose.msk.msra.mxu1 %vm733_vm3, %v7931_v4 }
 0x55b   :  { %6210 = vmatprep.subr.msk.mxu0 %vm733_vm3, %v7950_v16  ;;  %6266 = vmatprep.subr.msk.mxu1 %vm733_vm3, %v7950_v16 }
 0x55e   :  { %6211 = vmatpush3.xpose.msk.msra.mxu0 %vm733_vm3, %v7950_v16  ;;  %6267 = vmatpush3.xpose.msk.msra.mxu1 %vm733_vm3, %v7950_v16 }
 0x55f   :  { %6292 = vmatprep.subr.mxu0 %v2348_v12  ;;  %6348 = vmatprep.subr.msk.mxu1 %vm733_vm3, %v7747_v18 }
 0x561   :  { %6213 = vmatmul.mubr.msk.f32.vlgmr.msra.gmra.mxu0 %vm733_vm3, %v1559_v59  ;;  %6269 = vmatmul.mubr.msk.f32.vlgmr.msra.gmra.mxu1 %vm733_vm3, %v1981_v58  ;;  %v8016_v58 = vadd.f32 %v7710_v23, %v7681_v24  ;;  %v1562_v23 = vmul.f32 %v7687_v33, %v7999_v39  ;;  %v8035_v59 = vadd.f32 %v7722_v45, %v7681_v24 }
 0x562   :  { %6215 = vmatprep.mubr.msk.f32.mxu0 %vm733_vm3, %v1560_v47  ;;  %6271 = vmatprep.mubr.msk.f32.mxu1 %vm733_vm3, %v1982_v46  ;;  %v1561_v46 = vmul.f32 %v7687_v33, %v7986_v19  ;;  %v2346_v47 = vmul.f32 %v7690_v53, %v7991_v35 }
 0x563   :  { %6293 = vmatpush3.msra.mxu0 %v2348_v12  ;;  %6349 = vmatpush3.xpose.msk.msra.mxu1 %vm733_vm3, %v7747_v18  ;;  %10241 = vst [vmem:[#allocation25_spill] sm:$0xff] %v8016_v58  ;;  %v1984_v12 = vmul.f32 %v7690_v53, %v7999_v39  ;;  %10243 = vst [vmem:[#allocation27_spill] sm:$0xff] %v8035_v59  ;;  %v1985_v45 = vmul.f32 %v7690_v53, %v8016_v58 }
 0x564   :  { %6294 = vmatprep.subr.mxu0 %v2347_v31  ;;  %6350 = vmatprep.subr.msk.mxu1 %vm733_vm3, %v7752_v11 }
 0x565   :  { %6295 = vmatpush3.msra.mxu0 %v2347_v31  ;;  %6272 = vmatmul.mubr.msk.f32.gmra.mxu1 %vm733_vm3, %v1983_v26  ;;  %v8044_v31 = vadd.f32 %v7894_v34, %v7942_v63  ;;  %v8052_v26 = vadd.f32 %v7718_v42, %v7681_v24  ;;  %v2344_v34 = vmul.f32 %v7690_v53, %v8026_v3 }
 0x566   :  { %6216 = vmatmul.mubr.msk.f32.gmra.mxu0 %vm733_vm3, %v1561_v46  ;;  %6296 = vmatprep.subr.mxu0 %v2346_v47  ;;  %v1563_v46 = vmul.f32 %v7687_v33, %v8016_v58  ;;  %v1564_v42 = vmul.f32 %v7687_v33, %v8035_v59 }
 0x567   :  { %6218 = vmatprep.mubr.msk.f32.mxu0 %vm733_vm3, %v1562_v23  ;;  %6274 = vmatprep.mubr.msk.f32.mxu1 %vm733_vm3, %v1984_v12  ;;  %10244 = vst [vmem:[#allocation28_spill] sm:$0xff] %v8044_v31  ;;  %10245 = vst [vmem:[#allocation29_spill] sm:$0xff] %v8052_v26  ;;  %v1986_v23 = vmul.f32 %v7690_v53, %v8035_v59  ;;  %v8071_v12 = vadd.f32 %v7728_v55, %v7681_v24 }
 0x568   :  { %6297 = vmatpush3.msra.mxu0 %v2346_v47  ;;  %6351 = vmatpush3.xpose.msk.msra.mxu1 %vm733_vm3, %v7752_v11  ;;  %v8062_v47 = vadd.f32 %v7852_v57, %v7942_v63  ;;  %v2343_v57 = vmul.f32 %v7690_v53, %v8044_v31  ;;  %v1987_v55 = vmul.f32 %v7690_v53, %v8052_v26 }
 0x569   :  { %6298 = vmatprep.subr.mxu0 %v2345_v50  ;;  %6352 = vmatprep.subr.msk.mxu1 %vm733_vm3, %v7771_v1  ;;  %10247 = vst [vmem:[#allocation31_spill] sm:$0xff] %v8071_v12 }
 0x56a   :  { %10246 = vst [vmem:[#allocation30_spill] sm:$0xff] %v8062_v47  ;;  %6299 = vmatpush3.msra.mxu0 %v2345_v50  ;;  %6275 = vmatmul.mubr.msk.f32.gmra.mxu1 %vm733_vm3, %v1985_v45  ;;  %v8080_v50 = vadd.f32 %v7866_v48, %v7942_v63  ;;  %v8088_v45 = vadd.f32 %v7726_v51, %v7681_v24 }
 0x56b   :  { %6219 = vmatmul.mubr.msk.f32.gmra.mxu0 %vm733_vm3, %v1563_v46  ;;  %6300 = vmatprep.subr.mxu0 %v2344_v34  ;;  %v1565_v46 = vmul.f32 %v7687_v33, %v8052_v26  ;;  %v2342_v48 = vmul.f32 %v7690_v53, %v8062_v47  ;;  %v1566_v51 = vmul.f32 %v7687_v33, %v8071_v12 }
 0x56c   :  { %6221 = vmatprep.mubr.msk.f32.mxu0 %vm733_vm3, %v1564_v42  ;;  %6277 = vmatprep.mubr.msk.f32.mxu1 %vm733_vm3, %v1986_v23  ;;  %10248 = vst [vmem:[#allocation32_spill] sm:$0xff] %v8080_v50  ;;  %10249 = vst [vmem:[#allocation33_spill] sm:$0xff] %v8088_v45  ;;  %v1988_v42 = vmul.f32 %v7690_v53, %v8071_v12  ;;  %v8107_v23 = vadd.f32 %v7732_v0, %v7681_v24 }
 0x56d   :  { %6301 = vmatpush3.msra.mxu0 %v2344_v34  ;;  %6353 = vmatpush3.xpose.msk.msra.mxu1 %vm733_vm3, %v7771_v1  ;;  %v8098_v34 = vadd.f32 %v7825_v8, %v7942_v63  ;;  %v2341_v8 = vmul.f32 %v7690_v53, %v8080_v50  ;;  %v1989_v0 = vmul.f32 %v7690_v53, %v8088_v45 }
 0x56e   :  { %6302 = vmatprep.subr.mxu0 %v2343_v57  ;;  %6354 = vmatprep.subr.msk.mxu1 %vm733_vm3, %v7784_v49  ;;  %10251 = vst [vmem:[#allocation35_spill] sm:$0xff] %v8107_v23 }
 0x56f   :  { %10250 = vst [vmem:[#allocation34_spill] sm:$0xff] %v8098_v34  ;;  %6303 = vmatpush3.msra.mxu0 %v2343_v57  ;;  %6278 = vmatmul.mubr.msk.f32.gmra.mxu1 %vm733_vm3, %v1987_v55  ;;  %v8116_v57 = vadd.f32 %v7838_v43, %v7942_v63  ;;  %v8124_v55 = vadd.f32 %v7730_v56, %v7681_v24 }
 0x570   :  { %6222 = vmatmul.mubr.msk.f32.gmra.mxu0 %vm733_vm3, %v1565_v46  ;;  %6304 = vmatprep.subr.mxu0 %v2342_v48  ;;  %v1567_v46 = vmul.f32 %v7687_v33, %v8088_v45  ;;  %v2340_v43 = vmul.f32 %v7690_v53, %v8098_v34  ;;  %v1568_v56 = vmul.f32 %v7687_v33, %v8107_v23 }
 0x571   :  { %6224 = vmatprep.mubr.msk.f32.mxu0 %vm733_vm3, %v1566_v51  ;;  %6280 = vmatprep.mubr.msk.f32.mxu1 %vm733_vm3, %v1988_v42  ;;  %10252 = vst [vmem:[#allocation36_spill] sm:$0xff] %v8116_v57  ;;  %10253 = vst [vmem:[#allocation37_spill] sm:$0xff] %v8124_v55  ;;  %v1990_v51 = vmul.f32 %v7690_v53, %v8107_v23  ;;  %v8143_v42 = vadd.f32 %v7737_v25, %v7681_v24 }
 0x572   :  { %6305 = vmatpush3.msra.mxu0 %v2342_v48  ;;  %6355 = vmatpush3.xpose.msk.msra.mxu1 %vm733_vm3, %v7784_v49  ;;  %v8134_v48 = vadd.f32 %v7799_v44, %v7942_v63  ;;  %v2339_v44 = vmul.f32 %v7690_v53, %v8116_v57  ;;  %v1991_v25 = vmul.f32 %v7690_v53, %v8124_v55 }
 0x573   :  { %6306 = vmatprep.subr.mxu0 %v2341_v8  ;;  %6356 = vmatprep.subr.msk.mxu1 %vm733_vm3, %v7797_v15  ;;  %10255 = vst [vmem:[#allocation39_spill] sm:$0xff] %v8143_v42 }
 0x574   :  { %10254 = vst [vmem:[#allocation38_spill] sm:$0xff] %v8134_v48  ;;  %6307 = vmatpush3.msra.mxu0 %v2341_v8  ;;  %6281 = vmatmul.mubr.msk.f32.gmra.mxu1 %vm733_vm3, %v1989_v0  ;;  %v8152_v8 = vadd.f32 %v7812_v29, %v7942_v63  ;;  %v8160_v0 = vadd.f32 %v7735_v9, %v7681_v24 }
 0x575   :  { %6225 = vmatmul.mubr.msk.f32.gmra.mxu0 %vm733_vm3, %v1567_v46  ;;  %6308 = vmatprep.subr.mxu0 %v2340_v43  ;;  %v1569_v46 = vmul.f32 %v7687_v33, %v8124_v55  ;;  %v2338_v29 = vmul.f32 %v7690_v53, %v8134_v48  ;;  %v1570_v9 = vmul.f32 %v7687_v33, %v8143_v42 }
 0x576   :  { %6227 = vmatprep.mubr.msk.f32.mxu0 %vm733_vm3, %v1568_v56  ;;  %6283 = vmatprep.mubr.msk.f32.mxu1 %vm733_vm3, %v1990_v51  ;;  %10256 = vst [vmem:[#allocation40_spill] sm:$0xff] %v8152_v8  ;;  %10257 = vst [vmem:[#allocation41_spill] sm:$0xff] %v8160_v0  ;;  %v1992_v56 = vmul.f32 %v7690_v53, %v8143_v42  ;;  %v8179_v51 = vadd.f32 %v7749_v32, %v7681_v24 }
 0x577   :  { %6309 = vmatpush3.msra.mxu0 %v2340_v43  ;;  %6357 = vmatpush3.xpose.msk.msra.mxu1 %vm733_vm3, %v7797_v15  ;;  %v8170_v43 = vadd.f32 %v7773_v2, %v7942_v63  ;;  %v2337_v2 = vmul.f32 %v7690_v53, %v8152_v8  ;;  %v1993_v32 = vmul.f32 %v7690_v53, %v8160_v0 }
 0x578   :  { %6310 = vmatprep.subr.mxu0 %v2339_v44  ;;  %6358 = vmatprep.subr.msk.mxu1 %vm733_vm3, %v7810_v13  ;;  %10259 = vst [vmem:[#allocation43_spill] sm:$0xff] %v8179_v51 }
 0x579   :  { %10258 = vst [vmem:[#allocation42_spill] sm:$0xff] %v8170_v43  ;;  %6311 = vmatpush3.msra.mxu0 %v2339_v44  ;;  %6284 = vmatmul.mubr.msk.f32.gmra.mxu1 %vm733_vm3, %v1991_v25  ;;  %v8189_v44 = vadd.f32 %v7786_v62, %v7942_v63  ;;  %v8198_v25 = vadd.f32 %v7744_v14, %v7681_v24 }
 0x57a   :  { %6228 = vmatmul.mubr.msk.f32.gmra.mxu0 %vm733_vm3, %v1569_v46  ;;  %6312 = vmatprep.subr.mxu0 %v2338_v29  ;;  %v1571_v62 = vmul.f32 %v7687_v33, %v8160_v0  ;;  %v2336_v46 = vmul.f32 %v7690_v53, %v8170_v43  ;;  %v1572_v24 = vmul.f32 %v7687_v33, %v8179_v51 }
 0x57b   :  { %6230 = vmatprep.mubr.msk.f32.mxu0 %vm733_vm3, %v1570_v9  ;;  %6286 = vmatprep.mubr.msk.f32.mxu1 %vm733_vm3, %v1992_v56  ;;  %10260 = vst [vmem:[#allocation44_spill] sm:$0xff] %v8189_v44  ;;  %10261 = vst [vmem:[#allocation45_spill] sm:$0xff] %v8198_v25  ;;  %v1994_v14 = vmul.f32 %v7690_v53, %v8179_v51  ;;  %v8220_v9 = vadd.f32 %v7768_v37, %v7942_v63 }
 0x57c   :  { %6313 = vmatpush3.msra.mxu0 %v2338_v29  ;;  %6359 = vmatpush3.xpose.msk.msra.mxu1 %vm733_vm3, %v7810_v13  ;;  %v8208_v29 = vadd.f32 %v7758_v30, %v7942_v63  ;;  %v2335_v30 = vmul.f32 %v7690_v53, %v8189_v44  ;;  %v1995_v56 = vmul.f32 %v7690_v53, %v8198_v25 }
 0x57d   :  { %6314 = vmatprep.subr.mxu0 %v2337_v2  ;;  %6360 = vmatprep.subr.msk.mxu1 %vm733_vm3, %v7823_v60  ;;  %10263 = vst [vmem:[#allocation47_spill] sm:$0xff] %v8220_v9  ;;  %v1573_v63 = vmul.f32 %v7687_v33, %v8198_v25 }
 0x57e   :  { %10262 = vst [vmem:[#allocation46_spill] sm:$0xff] %v8208_v29  ;;  %6315 = vmatpush3.msra.mxu0 %v2337_v2  ;;  %6287 = vmatmul.mubr.msk.f32.gmra.mxu1 %vm733_vm3, %v1993_v32  ;;  %v2334_v37 = vmul.f32 %v7690_v53, %v8208_v29  ;;  %v10264_v2 = vmov 0.0  }
 0x57f   :  { %6231 = vmatmul.mubr.msk.f32.gmra.mxu0 %vm733_vm3, %v1571_v62  ;;  %6316 = vmatprep.subr.mxu0 %v2336_v46  ;;  %v8237_v32 = vsel %vm2496_vm10, 1.0, %v10264_v2 }
 0x580   :  { %6233 = vmatprep.mubr.msk.f32.mxu0 %vm733_vm3, %v1572_v24  ;;  %6289 = vmatprep.mubr.msk.f32.mxu1 %vm733_vm3, %v1994_v14  ;;  %10265 = vst [vmem:[#allocation48_spill] sm:$0xff] %v8237_v32  ;;  %v2499_v62 = vmul.f32 %v8237_v32, %v7684_v40  ;;  %v2500_v14 = vmul.f32 %v8237_v32, %v7961_v61 }
 0x581   :  { %6317 = vmatpush3.msra.mxu0 %v2336_v46  ;;  %6361 = vmatpush3.xpose.msk.msra.mxu1 %vm733_vm3, %v7823_v60  ;;  %v2333_v46 = vmul.f32 %v7690_v53, %v8220_v9  ;;  %v8283_v53 = vsel %vm2870_vm13, 1.0, %v10264_v2  ;;  %v2503_v2 = vmul.f32 %v8237_v32, %v7999_v39 }
 0x582   :  { %6318 = vmatprep.subr.mxu0 %v2335_v30  ;;  %6362 = vmatprep.subr.msk.mxu1 %vm733_vm3, %v7836_v10  ;;  %v3241_v24 = vmul.f32 %v8283_v53, %v7953_v54 }
 0x583   :  { %6319 = vmatpush3.msra.mxu0 %v2335_v30  ;;  %6290 = vmatmul.mubr.msk.f32.gmra.mxu1 %vm733_vm3, %v1995_v56  ;;  %v2501_v30 = vmul.f32 %v8237_v32, %v7969_v28  ;;  %v3240_v56 = vmul.f32 %v8283_v53, %v7974_v20 }
 0x584   :  { %6234 = vmatmul.mubr.msk.f32.gmra.mxu0 %vm733_vm3, %v1573_v63  ;;  %6320 = vmatprep.subr.mxu0 %v2334_v37  ;;  %v2502_v63 = vmul.f32 %v8237_v32, %v7986_v19 }
 0x585   :  { %6321 = vmatpush3.msra.mxu0 %v2334_v37  ;;  %6363 = vmatpush3.xpose.msk.msra.mxu1 %vm733_vm3, %v7836_v10  ;;  %v3239_v37 = vmul.f32 %v8283_v53, %v7991_v35 }
 0x586   :  { %6380 = vmatprep.mubr.msk.f32.mxu1 %vm733_vm3, %v2499_v62  ;;  %6322 = vmatprep.subr.mxu0 %v2333_v46  ;;  %v3238_v62 = vmul.f32 %v8283_v53, %v8008_v41 }
 0x587   :  { %6364 = vmatprep.subr.msk.mxu1 %vm733_vm3, %v7850_v52  ;;  %6323 = vmatpush3.msra.mxu0 %v2333_v46  ;;  %v2504_v46 = vmul.f32 %v8237_v32, %v8016_v58 }
 0x588   :  { %6404 = vmatprep.subr.msk.mxu0 %vm733_vm3, %v7747_v18 }
 0x589   :  { %6365 = vmatpush3.xpose.msk.msra.mxu1 %vm733_vm3, %v7850_v52 }
 0x58a   :  { %6366 = vmatprep.subr.msk.mxu1 %vm733_vm3, %v7864_v36 }
 0x58d   :  { %6367 = vmatpush3.xpose.msk.msra.mxu1 %vm733_vm3, %v7864_v36 }
 0x58e   :  { %6368 = vmatprep.subr.msk.mxu1 %vm733_vm3, %v7878_v27 }
 0x591   :  { %6369 = vmatpush3.xpose.msk.msra.mxu1 %vm733_vm3, %v7878_v27 }
 0x592   :  { %6370 = vmatprep.subr.msk.mxu1 %vm733_vm3, %v7892_v21 }
 0x595   :  { %6371 = vmatpush3.xpose.msk.msra.mxu1 %vm733_vm3, %v7892_v21 }
 0x596   :  { %6372 = vmatprep.subr.msk.mxu1 %vm733_vm3, %v7906_v22 }
 0x599   :  { %6373 = vmatpush3.xpose.msk.msra.mxu1 %vm733_vm3, %v7906_v22 }
 0x59a   :  { %6374 = vmatprep.subr.msk.mxu1 %vm733_vm3, %v7918_v17 }
 0x59d   :  { %6375 = vmatpush3.xpose.msk.msra.mxu1 %vm733_vm3, %v7918_v17 }
 0x59e   :  { %6376 = vmatprep.subr.msk.mxu1 %vm733_vm3, %v7931_v4 }
 0x5a1   :  { %6377 = vmatpush3.xpose.msk.msra.mxu1 %vm733_vm3, %v7931_v4 }
 0x5a2   :  { %6378 = vmatprep.subr.msk.mxu1 %vm733_vm3, %v7950_v16 }
 0x5a5   :  { %6379 = vmatpush3.xpose.msk.msra.mxu1 %vm733_vm3, %v7950_v16 }
 0x5a6   :  { %6460 = vmatprep.subr.mxu1 %v3241_v24 }
 0x5a8   :  { %6381 = vmatmul.mubr.msk.f32.vlgmr.msra.gmra.mxu1 %vm733_vm3, %v2500_v14  ;;  %v2505_v14 = vmul.f32 %v8237_v32, %v8035_v59 }
 0x5a9   :  { %6383 = vmatprep.mubr.msk.f32.mxu1 %vm733_vm3, %v2501_v30  ;;  %6461 = vmatpush3.msra.mxu1 %v3241_v24  ;;  %v3237_v24 = vmul.f32 %v8283_v53, %v8026_v3  ;;  %v3236_v30 = vmul.f32 %v8283_v53, %v8044_v31 }
 0x5aa   :  { %6462 = vmatprep.subr.mxu1 %v3240_v56 }
 0x5ab   :  { %6463 = vmatpush3.msra.mxu1 %v3240_v56  ;;  %v2506_v56 = vmul.f32 %v8237_v32, %v8052_v26 }
 0x5ac   :  { %6384 = vmatmul.mubr.msk.f32.gmra.mxu1 %vm733_vm3, %v2502_v63  ;;  %6464 = vmatprep.subr.mxu1 %v3239_v37  ;;  %v3235_v63 = vmul.f32 %v8283_v53, %v8062_v47 }
 0x5ad   :  { %6386 = vmatprep.mubr.msk.f32.mxu1 %vm733_vm3, %v2503_v2  ;;  %6465 = vmatpush3.msra.mxu1 %v3239_v37  ;;  %v2507_v37 = vmul.f32 %v8237_v32, %v8071_v12  ;;  %v3234_v2 = vmul.f32 %v8283_v53, %v8080_v50  ;;  %v1503_v12 = vadd.s32 120, %v7238_v5 }
 0x5ae   :  { %6466 = vmatprep.subr.mxu1 %v3238_v62 }
 0x5af   :  { %6467 = vmatpush3.msra.mxu1 %v3238_v62  ;;  %v2508_v62 = vmul.f32 %v8237_v32, %v8088_v45 }
 0x5b0   :  { %6387 = vmatmul.mubr.msk.f32.gmra.mxu1 %vm733_vm3, %v2504_v46  ;;  %6468 = vmatprep.subr.mxu1 %v3237_v24  ;;  %v3233_v46 = vmul.f32 %v8283_v53, %v8098_v34 }
 0x5b1   :  { %6389 = vmatprep.mubr.msk.f32.mxu1 %vm733_vm3, %v2505_v14  ;;  %6469 = vmatpush3.msra.mxu1 %v3237_v24  ;;  %v2509_v24 = vmul.f32 %v8237_v32, %v8107_v23  ;;  %v3232_v14 = vmul.f32 %v8283_v53, %v8116_v57  ;;  %v1501_v23 = vadd.s32 104, %v7238_v5 }
 0x5b2   :  { %6470 = vmatprep.subr.mxu1 %v3236_v30 }
 0x5b3   :  { %6471 = vmatpush3.msra.mxu1 %v3236_v30  ;;  %v2510_v30 = vmul.f32 %v8237_v32, %v8124_v55 }
 0x5b4   :  { %6390 = vmatmul.mubr.msk.f32.gmra.mxu1 %vm733_vm3, %v2506_v56  ;;  %6472 = vmatprep.subr.mxu1 %v3235_v63  ;;  %v3231_v56 = vmul.f32 %v8283_v53, %v8134_v48 }
 0x5b5   :  { %6392 = vmatprep.mubr.msk.f32.mxu1 %vm733_vm3, %v2507_v37  ;;  %6473 = vmatpush3.msra.mxu1 %v3235_v63  ;;  %v2511_v63 = vmul.f32 %v8237_v32, %v8143_v42  ;;  %v3230_v37 = vmul.f32 %v8283_v53, %v8152_v8  ;;  %v1499_v42 = vadd.s32 88, %v7238_v5 }
 0x5b6   :  { %6474 = vmatprep.subr.mxu1 %v3234_v2 }
 0x5b7   :  { %6475 = vmatpush3.msra.mxu1 %v3234_v2  ;;  %v2512_v2 = vmul.f32 %v8237_v32, %v8160_v0 }
 0x5b8   :  { %6393 = vmatmul.mubr.msk.f32.gmra.mxu1 %vm733_vm3, %v2508_v62  ;;  %6476 = vmatprep.subr.mxu1 %v3233_v46  ;;  %v3229_v62 = vmul.f32 %v8283_v53, %v8170_v43 }
 0x5b9   :  { %6395 = vmatprep.mubr.msk.f32.mxu1 %vm733_vm3, %v2509_v24  ;;  %6477 = vmatpush3.msra.mxu1 %v3233_v46  ;;  %v2513_v46 = vmul.f32 %v8237_v32, %v8179_v51  ;;  %v3228_v24 = vmul.f32 %v8283_v53, %v8189_v44 }
 0x5ba   :  { %6478 = vmatprep.subr.mxu1 %v3232_v14 }
 0x5bb   :  { %6479 = vmatpush3.msra.mxu1 %v3232_v14  ;;  %v2514_v14 = vmul.f32 %v8237_v32, %v8198_v25 }
 0x5bc   :  { %6396 = vmatmul.mubr.msk.f32.gmra.mxu1 %vm733_vm3, %v2510_v30  ;;  %6480 = vmatprep.subr.mxu1 %v3231_v56  ;;  %v3227_v30 = vmul.f32 %v8283_v53, %v8208_v29 }
 0x5bd   :  { %6398 = vmatprep.mubr.msk.f32.mxu1 %vm733_vm3, %v2511_v63  ;;  %6481 = vmatpush3.msra.mxu1 %v3231_v56  ;;  %v3226_v56 = vmul.f32 %v8283_v53, %v8220_v9  ;;  %v8366_v63 = vmul.f32 %v8237_v32, %v7953_v54 }
 0x5be   :  { %6482 = vmatprep.subr.mxu1 %v3230_v37 }
 0x5bf   :  { %6483 = vmatpush3.msra.mxu1 %v3230_v37  ;;  %10266 = vst [vmem:[#allocation49_spill] sm:$0xff] %v8366_v63  ;;  %v1505_v37 = vand.u32 15, %v7243_v7 }
 0x5c0   :  { %6399 = vmatmul.mubr.msk.f32.gmra.mxu1 %vm733_vm3, %v2512_v2  ;;  %6484 = vmatprep.subr.mxu1 %v3229_v62  ;;  %v8371_v2 = vand.u32 15, %v7240_v6  ;;  %v1492_v6 = vadd.s32 32, %v7238_v5 }
 0x5c1   :  { %6401 = vmatprep.mubr.msk.f32.mxu1 %vm733_vm3, %v2513_v46  ;;  %6485 = vmatpush3.msra.mxu1 %v3229_v62  ;;  %v1491_v62 = vadd.s32 24, %v7238_v5  ;;  %v1504_v46 = vand.u32 15, %v7238_v5 }
 0x5c2   :  { %6486 = vmatprep.subr.mxu1 %v3228_v24  ;;  %vm1522_vm14 = vcmp.eq.s32.totalorder %v1505_v37, %v8371_v2  ;;  %v1508_v29 = vand.u32 15, %v1492_v6 }
 0x5c3   :  { %6487 = vmatpush3.msra.mxu1 %v3228_v24  ;;  %v1490_v24 = vadd.s32 16, %v7238_v5  ;;  %vm1521_vm15 = vcmp.eq.s32.totalorder %v1504_v46, %v8371_v2  ;;  %v8380_v7 = vsel %vm1522_vm14, 0.0, %v7195_v38 }
 0x5c4   :  { %6402 = vmatmul.mubr.msk.f32.gmra.mxu1 %vm733_vm3, %v2514_v14  ;;  %6488 = vmatprep.subr.mxu1 %v3227_v30  ;;  %v1507_v14 = vand.u32 15, %v1491_v62  ;;  %v8385_v32 = vsel %vm1521_vm15, 0.0, %v7195_v38  ;;  %v1495_v62 = vadd.s32 56, %v7238_v5  ;;  %vm1525_vm4 = vcmp.eq.s32.totalorder %v1508_v29, %v8371_v2 }
 0x5c5   :  { %6489 = vmatpush3.msra.mxu1 %v3227_v30  ;;  %v1493_v30 = vadd.s32 40, %v7238_v5 }
 0x5c6   :  { %6490 = vmatprep.subr.mxu1 %v3226_v56  ;;  %vm1524_vm0 = vcmp.eq.s32.totalorder %v1507_v14, %v8371_v2  ;;  %v1494_v14 = vadd.s32 48, %v7238_v5  ;;  %v1511_v44 = vand.u32 15, %v1495_v62  ;;  %v8420_v62 = vsel %vm1525_vm4, 0.0, %v7195_v38 }
 0x5c7   :  { %6491 = vmatpush3.msra.mxu1 %v3226_v56  ;;  %v1506_v56 = vand.u32 15, %v1490_v24  ;;  %v1509_v9 = vand.u32 15, %v1493_v30  ;;  %v8393_v24 = vsel %vm1524_vm0, 0.0, %v7195_v38 }
 0x5c8   :  { %6572 = vmatprep.subr.mxu1 %v8366_v63  ;;  %vm1528_vm5 = vcmp.eq.s32.totalorder %v1511_v44, %v8371_v2  ;;  %v1498_v44 = vadd.s32 80, %v7238_v5 }
 0x5c9   :  { %vm1523_vm1 = vcmp.eq.s32.totalorder %v1506_v56, %v8371_v2  ;;  %vm1526_vm2 = vcmp.eq.s32.totalorder %v1509_v9, %v8371_v2  ;;  %v1510_v9 = vand.u32 15, %v1494_v14  ;;  %v8433_v48 = vsel %vm1528_vm5, 0.0, %v7195_v38 }
 0x5ca   :  { %v8415_v43 = vsel %vm1526_vm2, 0.0, %v7195_v38  ;;  %v1514_v45 = vand.u32 15, %v1498_v44 }
 0x5cb   :  { %vm1527_vm6 = vcmp.eq.s32.totalorder %v1510_v9, %v8371_v2 }
 0x5cc   :  { %vm1531_vm10 = vcmp.eq.s32.totalorder %v1514_v45, %v8371_v2 }
 0x621   :  { %v6270_v63 = vpop.f32.mrf.mxu1 }
 0x622   :  { %v8388_v37 = vadd.f32 %v6270_v63, %v8380_v7  ;;  %v8401_v63 = vsel %vm1523_vm1, 0.0, %v7195_v38 }
 0x623   :  { %v2110_v46 = vpop.f32.mrf.mxu1 }
 0x624   :  { %v8396_v25 = vadd.f32 %v2110_v46, %v8385_v32  ;;  %2191 = vmax.xlane.f32.xlu1 %v8388_v37  ;;  %v1497_v46 = vadd.s32 72, %v7238_v5 }
 0x625   :  { %v6273_v30 = vpop.f32.mrf.mxu1 }
 0x626   :  { %v8405_v56 = vadd.f32 %v6273_v30, %v8393_v24  ;;  %2189 = vmax.xlane.f32.xlu0 %v8396_v25  ;;  %v1496_v30 = vadd.s32 64, %v7238_v5 }
 0x627   :  { %v2120_v6 = vpop.f32.mrf.mxu1 }
 0x628   :  { %v8411_v51 = vadd.f32 %v2120_v6, %v8401_v63  ;;  %2195 = vmax.xlane.f32.xlu1 %v8405_v56  ;;  %v1513_v6 = vand.u32 15, %v1497_v46  ;;  %v1512_v55 = vand.u32 15, %v1496_v30 }
 0x62a   :  { %v6276_v0 = vpop.f32.mrf.mxu1  ;;  %2193 = vmax.xlane.f32.xlu0 %v8411_v51  ;;  %vm1530_vm7 = vcmp.eq.s32.totalorder %v1513_v6, %v8371_v2  ;;  %vm1529_vm8 = vcmp.eq.s32.totalorder %v1512_v55, %v8371_v2  ;;  %v1500_v6 = vadd.s32 96, %v7238_v5 }
 0x62b   :  { %v8424_v29 = vadd.f32 %v6276_v0, %v8415_v43  ;;  %v8438_v0 = vsel %vm1527_vm6, 0.0, %v7195_v38  ;;  %v8451_v34 = vsel %vm1530_vm7, 0.0, %v7195_v38 }
 0x62c   :  { %v2130_v8 = vpop.f32.mrf.mxu1  ;;  %10267 = vst [vmem:[#allocation50_spill] sm:$0xff] %v8451_v34  ;;  %v1516_v26 = vand.u32 15, %v1500_v6 }
 0x62d   :  { %v8429_v14 = vadd.f32 %v2130_v8, %v8420_v62  ;;  %2199 = vmax.xlane.f32.xlu1 %v8424_v29  ;;  %v1515_v8 = vand.u32 15, %v1499_v42  ;;  %v1517_v42 = vand.u32 15, %v1501_v23  ;;  %v1519_v23 = vand.u32 15, %v1503_v12 }
 0x62e   :  { %vm1533_vm12 = vcmp.eq.s32.totalorder %v1516_v26, %v8371_v2 }
 0x62f   :  { %v6279_v57 = vpop.f32.mrf.mxu1  ;;  %2197 = vmax.xlane.f32.xlu0 %v8429_v14  ;;  %vm1532_vm9 = vcmp.eq.s32.totalorder %v1515_v8, %v8371_v2  ;;  %v1502_v8 = vadd.s32 112, %v7238_v5  ;;  %vm1534_vm11 = vcmp.eq.s32.totalorder %v1517_v42, %v8371_v2  ;;  %v8490_v42 = vsel %vm1533_vm12, 0.0, %v7195_v38 }
 0x630   :  { %v8442_v46 = vadd.f32 %v6279_v57, %v8433_v48  ;;  %v8456_v57 = vsel %vm1529_vm8, 0.0, %v7195_v38  ;;  %v8469_v47 = vsel %vm1532_vm9, 0.0, %v7195_v38  ;;  %v8486_v6 = vsel %vm1534_vm11, 0.0, %v7195_v38  ;;  %10271 = vst [vmem:[#allocation54_spill] sm:$0xff] %v8490_v42 }
 0x631   :  { %v2140_v9 = vpop.f32.mrf.mxu1  ;;  %10268 = vst [vmem:[#allocation51_spill] sm:$0xff] %v8469_v47  ;;  %10270 = vst [vmem:[#allocation53_spill] sm:$0xff] %v8486_v6  ;;  %v1518_v5 = vand.u32 15, %v1502_v8  ;;  %vm1536_vm13 = vcmp.eq.s32.totalorder %v1519_v23, %v8371_v2 }
 0x632   :  { %v8447_v30 = vadd.f32 %v2140_v9, %v8438_v0  ;;  %2203 = vmax.xlane.f32.xlu1 %v8442_v46  ;;  %v8502_v8 = vsel %vm1536_vm13, 0.0, %v7195_v38 }
 0x633   :  { %vm1535_vm14 = vcmp.eq.s32.totalorder %v1518_v5, %v8371_v2  ;;  %10272 = vst [vmem:[#allocation55_spill] sm:$0xff] %v8502_v8 }
 0x634   :  { %v6282_v50 = vpop.f32.mrf.mxu1  ;;  %2201 = vmax.xlane.f32.xlu0 %v8447_v30 }
 0x635   :  { %v8460_v55 = vadd.f32 %v6282_v50, %v8451_v34  ;;  %v8474_v50 = vsel %vm1531_vm10, 0.0, %v7195_v38 }
 0x636   :  { %v2150_v9 = vpop.f32.mrf.mxu1  ;;  %10269 = vst [vmem:[#allocation52_spill] sm:$0xff] %v8474_v50 }
 0x637   :  { %v8465_v44 = vadd.f32 %v2150_v9, %v8456_v57  ;;  %2207 = vmax.xlane.f32.xlu1 %v8460_v55 }
 0x639   :  { %v6285_v31 = vpop.f32.mrf.mxu1  ;;  %2205 = vmax.xlane.f32.xlu0 %v8465_v44 }
 0x63a   :  { %v8478_v45 = vadd.f32 %v6285_v31, %v8469_v47 }
 0x63b   :  { %v2160_v9 = vpop.f32.mrf.mxu1 }
 0x63c   :  { %v8482_v34 = vadd.f32 %v2160_v9, %v8474_v50  ;;  %2211 = vmax.xlane.f32.xlu1 %v8478_v45  ;;  %v8506_v50 = vsel %vm1535_vm14, 0.0, %v7195_v38 }
 0x63d   :  { %10273 = vst [vmem:[#allocation56_spill] sm:$0xff] %v8506_v50 }
 0x63e   :  { %v6288_v59 = vpop.f32.mrf.mxu1  ;;  %2209 = vmax.xlane.f32.xlu0 %v8482_v34 }
 0x63f   :  { %v8494_v31 = vadd.f32 %v6288_v59, %v8486_v6 }
 0x640   :  { %v2170_v26 = vpop.f32.mrf.mxu1 }
 0x641   :  { %v8498_v12 = vadd.f32 %v2170_v26, %v8490_v42  ;;  %2215 = vmax.xlane.f32.xlu1 %v8494_v31 }
 0x643   :  { %v6291_v9 = vpop.f32.mrf.mxu1  ;;  %2213 = vmax.xlane.f32.xlu0 %v8498_v12 }
 0x644   :  { %v8509_v59 = vadd.f32 %v6291_v9, %v8502_v8 }
 0x645   :  { %v2180_v23 = vpop.f32.mrf.mxu1 }
 0x646   :  { %v8512_v5 = vadd.f32 %v2180_v23, %v8506_v50  ;;  %2219 = vmax.xlane.f32.xlu1 %v8509_v59 }
 0x648   :  { %2217 = vmax.xlane.f32.xlu0 %v8512_v5 }
 0x6ad   :  { %v2192_v2 = vpop.xlane.xlu1 %2191 }
 0x6ae   :  { %v2222_v26 = vsub.f32 %v8388_v37, %v2192_v2 }
 0x6af   :  { %v2190_v42 = vpop.xlane.xlu0 %2189 }
 0x6b0   :  { %v2239_v6 = vmul.f32 1.442695, %v2222_v26  ;;  %v2221_v47 = vsub.f32 %v8396_v25, %v2190_v42 }
 0x6b1   :  { %v2196_v38 = vpop.xlane.xlu1 %2195 }
 0x6b2   :  { %6785 = vpow2.f32 %v2239_v6  ;;  %v2237_v3 = vmul.f32 1.442695, %v2221_v47  ;;  %v2224_v9 = vsub.f32 %v8405_v56, %v2196_v38 }
 0x6b3   :  { %v2194_v8 = vpop.xlane.xlu0 %2193 }
 0x6b4   :  { %6787 = vpow2.f32 %v2237_v3  ;;  %v2243_v23 = vmul.f32 1.442695, %v2224_v9  ;;  %v2223_v50 = vsub.f32 %v8411_v51, %v2194_v8 }
 0x6b6   :  { %6789 = vpow2.f32 %v2243_v23  ;;  %v2241_v58 = vmul.f32 1.442695, %v2223_v50  ;;  %v2200_v41 = vpop.xlane.xlu1 %2199 }
 0x6b7   :  { %v2226_v39 = vsub.f32 %v8424_v29, %v2200_v41 }
 0x6b8   :  { %6791 = vpow2.f32 %v2241_v58  ;;  %v2198_v37 = vpop.xlane.xlu0 %2197 }
 0x6b9   :  { %v2247_v2 = vmul.f32 1.442695, %v2226_v39  ;;  %v2225_v25 = vsub.f32 %v8429_v14, %v2198_v37 }
 0x6bb   :  { %6793 = vpow2.f32 %v2247_v2  ;;  %v2245_v6 = vmul.f32 1.442695, %v2225_v25  ;;  %v2204_v47 = vpop.xlane.xlu1 %2203 }
 0x6bc   :  { %v2228_v56 = vsub.f32 %v8442_v46, %v2204_v47 }
 0x6bd   :  { %6795 = vpow2.f32 %v2245_v6  ;;  %v2202_v3 = vpop.xlane.xlu0 %2201 }
 0x6be   :  { %v2251_v42 = vmul.f32 1.442695, %v2228_v56  ;;  %v2227_v51 = vsub.f32 %v8447_v30, %v2202_v3 }
 0x6bf   :  { %v8524_v8 = vpop.eup %6785 }
 0x6c0   :  { %6797 = vpow2.f32 %v2251_v42  ;;  %v2249_v50 = vmul.f32 1.442695, %v2227_v51  ;;  %v2208_v41 = vpop.xlane.xlu1 %2207  ;;  %2271 = vadd.xlane.f32.xlu1 %v8524_v8 }
 0x6c1   :  { %v8527_v39 = vpop.eup %6787  ;;  %v2230_v58 = vsub.f32 %v8460_v55, %v2208_v41 }
 0x6c2   :  { %6799 = vpow2.f32 %v2249_v50  ;;  %v2206_v29 = vpop.xlane.xlu0 %2205  ;;  %2269 = vadd.xlane.f32.xlu0 %v8527_v39 }
 0x6c3   :  { %v8531_v14 = vpop.eup %6789  ;;  %v2255_v46 = vmul.f32 1.442695, %v2230_v58  ;;  %v2229_v30 = vsub.f32 %v8465_v44, %v2206_v29 }
 0x6c4   :  { %2275 = vadd.xlane.f32.xlu1 %v8531_v14 }
 0x6c5   :  { %v8535_v26 = vpop.eup %6791  ;;  %6801 = vpow2.f32 %v2255_v46  ;;  %v2253_v38 = vmul.f32 1.442695, %v2229_v30  ;;  %v2212_v9 = vpop.xlane.xlu1 %2211 }
 0x6c6   :  { %v2232_v23 = vsub.f32 %v8478_v45, %v2212_v9  ;;  %2273 = vadd.xlane.f32.xlu0 %v8535_v26 }
 0x6c7   :  { %6803 = vpow2.f32 %v2253_v38  ;;  %v2210_v55 = vpop.xlane.xlu0 %2209 }
 0x6c8   :  { %v8539_v37 = vpop.eup %6793  ;;  %v2259_v2 = vmul.f32 1.442695, %v2232_v23  ;;  %v2231_v25 = vsub.f32 %v8482_v34, %v2210_v55 }
 0x6c9   :  { %2279 = vadd.xlane.f32.xlu1 %v8539_v37 }
 0x6ca   :  { %v8543_v44 = vpop.eup %6795  ;;  %6805 = vpow2.f32 %v2259_v2  ;;  %v2257_v6 = vmul.f32 1.442695, %v2231_v25  ;;  %v2216_v47 = vpop.xlane.xlu1 %2215 }
 0x6cb   :  { %v2234_v56 = vsub.f32 %v8494_v31, %v2216_v47  ;;  %2277 = vadd.xlane.f32.xlu0 %v8543_v44  ;;  %v6214_v2 = vpop.f32.mrf.mxu0 }
 0x6cc   :  { %6807 = vpow2.f32 %v2257_v6  ;;  %v2214_v45 = vpop.xlane.xlu0 %2213 }
 0x6cd   :  { %v8547_v3 = vpop.eup %6797  ;;  %v2263_v42 = vmul.f32 1.442695, %v2234_v56  ;;  %v2233_v51 = vsub.f32 %v8498_v12, %v2214_v45  ;;  %v1736_v56 = vpop.f32.mrf.mxu0 }
 0x6ce   :  { %2283 = vadd.xlane.f32.xlu1 %v8547_v3 }
 0x6cf   :  { %v8551_v34 = vpop.eup %6799  ;;  %6809 = vpow2.f32 %v2263_v42  ;;  %v2261_v50 = vmul.f32 1.442695, %v2233_v51  ;;  %v2220_v41 = vpop.xlane.xlu1 %2219  ;;  %v8584_v51 = vadd.f32 %v1736_v56, %v8385_v32 }
 0x6d0   :  { %v2236_v58 = vsub.f32 %v8509_v59, %v2220_v41  ;;  %2281 = vadd.xlane.f32.xlu0 %v8551_v34 }
 0x6d1   :  { %6811 = vpow2.f32 %v2261_v50  ;;  %v2218_v31 = vpop.xlane.xlu0 %2217  ;;  %10275 = vst [vmem:[#allocation58_spill] sm:$0xff] %v8584_v51  ;;  %v6217_v50 = vpop.f32.mrf.mxu0 }
 0x6d2   :  { %v8555_v29 = vpop.eup %6801  ;;  %v2267_v46 = vmul.f32 1.442695, %v2236_v58  ;;  %v2235_v30 = vsub.f32 %v8512_v5, %v2218_v31  ;;  %v6382_v5 = vpop.f32.mrf.mxu1  ;;  %v8592_v31 = vadd.f32 %v6214_v2, %v8380_v7 }
 0x6d3   :  { %2287 = vadd.xlane.f32.xlu1 %v8555_v29  ;;  %v8588_v41 = vadd.f32 %v6382_v5, %v8380_v7 }
 0x6d4   :  { %v8559_v12 = vpop.eup %6803  ;;  %6813 = vpow2.f32 %v2267_v46  ;;  %v2265_v38 = vmul.f32 1.442695, %v2235_v30  ;;  %v2629_v6 = vpop.f32.mrf.mxu1  ;;  %10277 = vst [vmem:[#allocation60_spill] sm:$0xff] %v8592_v31 }
 0x6d5   :  { %2285 = vadd.xlane.f32.xlu0 %v8559_v12  ;;  %v8580_v45 = vadd.f32 %v2629_v6, %v8385_v32  ;;  %10276 = vst [vmem:[#allocation59_spill] sm:$0xff] %v8588_v41  ;;  %v1746_v46 = vpop.f32.mrf.mxu0 }
 0x6d6   :  { %6815 = vpow2.f32 %v2265_v38  ;;  %v6385_v42 = vpop.f32.mrf.mxu1  ;;  %v8600_v6 = vadd.f32 %v1746_v46, %v8401_v63 }
 0x6d7   :  { %v8562_v9 = vpop.eup %6805  ;;  %10274 = vst [vmem:[#allocation57_spill] sm:$0xff] %v8580_v45  ;;  %v6220_v5 = vpop.f32.mrf.mxu0  ;;  %v8604_v56 = vadd.f32 %v6385_v42, %v8393_v24 }
 0x6d8   :  { %2291 = vadd.xlane.f32.xlu1 %v8562_v9  ;;  %v2639_v58 = vpop.f32.mrf.mxu1  ;;  %10279 = vst [vmem:[#allocation62_spill] sm:$0xff] %v8600_v6 }
 0x6d9   :  { %v8565_v59 = vpop.eup %6807  ;;  %v8596_v30 = vadd.f32 %v2639_v58, %v8401_v63  ;;  %10280 = vst [vmem:[#allocation63_spill] sm:$0xff] %v8604_v56  ;;  %v1756_v58 = vpop.f32.mrf.mxu0 }
 0x6da   :  { %2289 = vadd.xlane.f32.xlu0 %v8565_v59  ;;  %v6388_v38 = vpop.f32.mrf.mxu1 }
 0x6db   :  { %10278 = vst [vmem:[#allocation61_spill] sm:$0xff] %v8596_v30  ;;  %v6223_v42 = vpop.f32.mrf.mxu0 }
 0x6dc   :  { %v8568_v23 = vpop.eup %6809  ;;  %v2649_v2 = vpop.f32.mrf.mxu1 }
 0x6dd   :  { %2295 = vadd.xlane.f32.xlu1 %v8568_v23 }
 0x6de   :  { %v8571_v55 = vpop.eup %6811  ;;  %v6391_v46 = vpop.f32.mrf.mxu1 }
 0x6df   :  { %2293 = vadd.xlane.f32.xlu0 %v8571_v55 }
 0x6e1   :  { %v8574_v25 = vpop.eup %6813 }
 0x6e2   :  { %2299 = vadd.xlane.f32.xlu1 %v8574_v25 }
 0x6e3   :  { %v8577_v47 = vpop.eup %6815 }
 0x6e4   :  { %2297 = vadd.xlane.f32.xlu0 %v8577_v47 }
 0x6e6   :  { %2708 = vmax.xlane.f32.xlu1 %v8580_v45 }
 0x6e8   :  { %1815 = vmax.xlane.f32.xlu0 %v8584_v51 }
 0x6ea   :  { %2710 = vmax.xlane.f32.xlu1 %v8588_v41  ;;  %v8608_v41 = vadd.f32 %v6217_v50, %v8393_v24  ;;  %v2659_v50 = vpop.f32.mrf.mxu1 }
 0x6ec   :  { %1817 = vmax.xlane.f32.xlu0 %v8592_v31  ;;  %10281 = vst [vmem:[#allocation64_spill] sm:$0xff] %v8608_v41  ;;  %v8612_v31 = vadd.f32 %v2649_v2, %v8420_v62  ;;  %v1766_v2 = vpop.f32.mrf.mxu0 }
 0x6ee   :  { %2712 = vmax.xlane.f32.xlu1 %v8596_v30  ;;  %10282 = vst [vmem:[#allocation65_spill] sm:$0xff] %v8612_v31  ;;  %v8616_v30 = vadd.f32 %v1756_v58, %v8420_v62  ;;  %v8631_v58 = vpop.f32.mrf.mxu1 }
 0x6f0   :  { %1819 = vmax.xlane.f32.xlu0 %v8600_v6  ;;  %10283 = vst [vmem:[#allocation66_spill] sm:$0xff] %v8616_v30  ;;  %v8620_v6 = vadd.f32 %v6388_v38, %v8415_v43  ;;  %v8637_v38 = vpop.f32.mrf.mxu0 }
 0x6f2   :  { %2714 = vmax.xlane.f32.xlu1 %v8604_v56  ;;  %10284 = vst [vmem:[#allocation67_spill] sm:$0xff] %v8620_v6  ;;  %v8624_v56 = vadd.f32 %v6220_v5, %v8415_v43  ;;  %v8640_v5 = vadd.f32 %v6391_v46, %v8433_v48 }
 0x6f4   :  { %1821 = vmax.xlane.f32.xlu0 %v8608_v41  ;;  %10285 = vst [vmem:[#allocation68_spill] sm:$0xff] %v8624_v56  ;;  %v8628_v41 = vadd.f32 %v2659_v50, %v8438_v0  ;;  %10288 = vst [vmem:[#allocation71_spill] sm:$0xff] %v8640_v5  ;;  %v8644_v50 = vadd.f32 %v6223_v42, %v8433_v48 }
 0x6f6   :  { %2716 = vmax.xlane.f32.xlu1 %v8612_v31  ;;  %10286 = vst [vmem:[#allocation69_spill] sm:$0xff] %v8628_v41  ;;  %v8634_v31 = vadd.f32 %v1766_v2, %v8438_v0  ;;  %10289 = vst [vmem:[#allocation72_spill] sm:$0xff] %v8644_v50 }
 0x6f8   :  { %1823 = vmax.xlane.f32.xlu0 %v8616_v30  ;;  %10287 = vst [vmem:[#allocation70_spill] sm:$0xff] %v8634_v31 }
 0x6fa   :  { %2718 = vmax.xlane.f32.xlu1 %v8620_v6  ;;  %v2669_v6 = vpop.f32.mrf.mxu1 }
 0x6fb   :  { %v8648_v30 = vadd.f32 %v2669_v6, %v8456_v57 }
 0x6fc   :  { %1825 = vmax.xlane.f32.xlu0 %v8624_v56  ;;  %v1776_v56 = vpop.f32.mrf.mxu0 }
 0x6fd   :  { %10290 = vst [vmem:[#allocation73_spill] sm:$0xff] %v8648_v30  ;;  %v8652_v2 = vadd.f32 %v1776_v56, %v8456_v57 }
 0x6fe   :  { %2720 = vmax.xlane.f32.xlu1 %v8628_v41 }
 0x6ff   :  { %10291 = vst [vmem:[#allocation74_spill] sm:$0xff] %v8652_v2 }
 0x700   :  { %1827 = vmax.xlane.f32.xlu0 %v8634_v31 }
 0x702   :  { %2722 = vmax.xlane.f32.xlu1 %v8640_v5 }
 0x704   :  { %1829 = vmax.xlane.f32.xlu0 %v8644_v50 }
 0x706   :  { %2724 = vmax.xlane.f32.xlu1 %v8648_v30 }
 0x708   :  { %1831 = vmax.xlane.f32.xlu0 %v8652_v2 }
 0x749   :  { %v2272_v46 = vpop.xlane.xlu1 %2271 }
 0x74a   :  { %6817 = vrcp.f32 %v2272_v46 }
 0x74b   :  { %v2270_v31 = vpop.xlane.xlu0 %2269 }
 0x74c   :  { %6819 = vrcp.f32 %v2270_v31 }
 0x74d   :  { %v2276_v42 = vpop.xlane.xlu1 %2275 }
 0x74e   :  { %6821 = vrcp.f32 %v2276_v42 }
 0x74f   :  { %v2274_v5 = vpop.xlane.xlu0 %2273 }
 0x750   :  { %6823 = vrcp.f32 %v2274_v5 }
 0x752   :  { %v2280_v41 = vpop.xlane.xlu1 %2279 }
 0x753   :  { %6825 = vrcp.f32 %v2280_v41 }
 0x754   :  { %v2278_v6 = vpop.xlane.xlu0 %2277 }
 0x755   :  { %6827 = vrcp.f32 %v2278_v6 }
 0x757   :  { %v2284_v50 = vpop.xlane.xlu1 %2283  ;;  %v6818_v51 = vpop.eup %6817 }
 0x758   :  { %6829 = vrcp.f32 %v2284_v50  ;;  %v2318_v46 = vmul.f32 %v6818_v51, %v8524_v8 }
 0x759   :  { %v6820_v56 = vpop.eup %6819  ;;  %v2282_v45 = vpop.xlane.xlu0 %2281 }
 0x75a   :  { %6831 = vrcp.f32 %v2282_v45  ;;  %v2317_v2 = vmul.f32 %v6820_v56, %v8527_v39 }
 0x75b   :  { %v6822_v30 = vpop.eup %6821 }
 0x75c   :  { %v2288_v31 = vpop.xlane.xlu1 %2287  ;;  %6324 = vmatprep.mubr.f32.mxu0 %v2317_v2  ;;  %v2320_v39 = vmul.f32 %v6822_v30, %v8531_v14 }
 0x75d   :  { %v6824_v42 = vpop.eup %6823  ;;  %6325 = vmatmul.mubr.f32.vlgmr.msra.gmra.mxu0 %v2318_v46  ;;  %6833 = vrcp.f32 %v2288_v31 }
 0x75e   :  { %v2286_v5 = vpop.xlane.xlu0 %2285  ;;  %6405 = vmatpush3.xpose.msk.msra.mxu0 %vm733_vm3, %v7747_v18  ;;  %v2319_v41 = vmul.f32 %v6824_v42, %v8535_v26 }
 0x75f   :  { %6835 = vrcp.f32 %v2286_v5  ;;  %6406 = vmatprep.subr.msk.mxu0 %vm733_vm3, %v7752_v11 }
 0x760   :  { %6327 = vmatprep.mubr.f32.mxu0 %v2319_v41  ;;  %v6826_v8 = vpop.eup %6825 }
 0x761   :  { %v2292_v45 = vpop.xlane.xlu1 %2291  ;;  %6328 = vmatmul.mubr.f32.gmra.mxu0 %v2320_v39  ;;  %v2322_v26 = vmul.f32 %v6826_v8, %v8539_v37  ;;  %v10298_v8 = vld [vmem:[#allocation29_spill] sm:$0xff] }
 0x762   :  { %v6828_v51 = vpop.eup %6827  ;;  %6407 = vmatpush3.xpose.msk.msra.mxu0 %vm733_vm3, %v7752_v11  ;;  %6837 = vrcp.f32 %v2292_v45  ;;  %v2880_v45 = vmul.f32 %v8283_v53, %v10298_v8 }
 0x763   :  { %v2290_v50 = vpop.xlane.xlu0 %2289  ;;  %6408 = vmatprep.subr.msk.mxu0 %vm733_vm3, %v7771_v1  ;;  %v2321_v18 = vmul.f32 %v6828_v51, %v8543_v44  ;;  %v10299_v51 = vld [vmem:[#allocation30_spill] sm:$0xff] }
 0x764   :  { %6839 = vrcp.f32 %v2290_v50  ;;  %v1968_v50 = vmul.f32 %v7687_v33, %v10299_v51 }
 0x765   :  { %6330 = vmatprep.mubr.f32.mxu0 %v2321_v18  ;;  %v6830_v14 = vpop.eup %6829  ;;  %v10300_v18 = vld [vmem:[#allocation31_spill] sm:$0xff] }
 0x766   :  { %v2296_v30 = vpop.xlane.xlu1 %2295  ;;  %6331 = vmatmul.mubr.f32.gmra.mxu0 %v2322_v26  ;;  %v2324_v44 = vmul.f32 %v6830_v14, %v8547_v3  ;;  %v2881_v26 = vmul.f32 %v8283_v53, %v10300_v18  ;;  %v10301_v14 = vld [vmem:[#allocation32_spill] sm:$0xff] }
 0x767   :  { %v6832_v2 = vpop.eup %6831  ;;  %6409 = vmatpush3.xpose.msk.msra.mxu0 %vm733_vm3, %v7771_v1  ;;  %6841 = vrcp.f32 %v2296_v30  ;;  %v1967_v30 = vmul.f32 %v7687_v33, %v10301_v14 }
 0x768   :  { %v2294_v11 = vpop.xlane.xlu0 %2293  ;;  %6410 = vmatprep.subr.msk.mxu0 %vm733_vm3, %v7784_v49  ;;  %v2323_v6 = vmul.f32 %v6832_v2, %v8551_v34  ;;  %v10302_v2 = vld [vmem:[#allocation33_spill] sm:$0xff] }
 0x769   :  { %6843 = vrcp.f32 %v2294_v11  ;;  %v2882_v11 = vmul.f32 %v8283_v53, %v10302_v2 }
 0x76a   :  { %6333 = vmatprep.mubr.f32.mxu0 %v2323_v6  ;;  %v6834_v37 = vpop.eup %6833  ;;  %v10303_v6 = vld [vmem:[#allocation34_spill] sm:$0xff] }
 0x76b   :  { %v2300_v56 = vpop.xlane.xlu1 %2299  ;;  %6334 = vmatmul.mubr.f32.gmra.mxu0 %v2324_v44  ;;  %v2326_v34 = vmul.f32 %v6834_v37, %v8555_v29  ;;  %v1966_v44 = vmul.f32 %v7687_v33, %v10303_v6  ;;  %v10304_v37 = vld [vmem:[#allocation35_spill] sm:$0xff] }
 0x76c   :  { %v6836_v46 = vpop.eup %6835  ;;  %6411 = vmatpush3.xpose.msk.msra.mxu0 %vm733_vm3, %v7784_v49  ;;  %6845 = vrcp.f32 %v2300_v56  ;;  %v2883_v56 = vmul.f32 %v8283_v53, %v10304_v37 }
 0x76d   :  { %v2298_v1 = vpop.xlane.xlu0 %2297  ;;  %6412 = vmatprep.subr.msk.mxu0 %vm733_vm3, %v7797_v15  ;;  %v2325_v31 = vmul.f32 %v6836_v46, %v8559_v12  ;;  %v10305_v46 = vld [vmem:[#allocation36_spill] sm:$0xff] }
 0x76e   :  { %6847 = vrcp.f32 %v2298_v1  ;;  %v1965_v1 = vmul.f32 %v7687_v33, %v10305_v46 }
 0x76f   :  { %6336 = vmatprep.mubr.f32.mxu0 %v2325_v31  ;;  %v6838_v3 = vpop.eup %6837  ;;  %v10306_v31 = vld [vmem:[#allocation37_spill] sm:$0xff] }
 0x770   :  { %6337 = vmatmul.mubr.f32.gmra.mxu0 %v2326_v34  ;;  %v2328_v5 = vmul.f32 %v6838_v3, %v8562_v9  ;;  %v2884_v34 = vmul.f32 %v8283_v53, %v10306_v31  ;;  %v10307_v3 = vld [vmem:[#allocation38_spill] sm:$0xff] }
 0x771   :  { %v6840_v42 = vpop.eup %6839  ;;  %6413 = vmatpush3.xpose.msk.msra.mxu0 %vm733_vm3, %v7797_v15 }
 0x772   :  { %6414 = vmatprep.subr.msk.mxu0 %vm733_vm3, %v7810_v13  ;;  %v2327_v49 = vmul.f32 %v6840_v42, %v8565_v59  ;;  %v1964_v42 = vmul.f32 %v7687_v33, %v10307_v3 }
 0x774   :  { %6339 = vmatprep.mubr.f32.mxu0 %v2327_v49  ;;  %v6842_v41 = vpop.eup %6841  ;;  %v10308_v49 = vld [vmem:[#allocation39_spill] sm:$0xff] }
 0x775   :  { %6340 = vmatmul.mubr.f32.gmra.mxu0 %v2328_v5  ;;  %v2330_v15 = vmul.f32 %v6842_v41, %v8568_v23  ;;  %v2885_v5 = vmul.f32 %v8283_v53, %v10308_v49  ;;  %v10309_v41 = vld [vmem:[#allocation40_spill] sm:$0xff] }
 0x776   :  { %v6844_v12 = vpop.eup %6843  ;;  %6415 = vmatpush3.xpose.msk.msra.mxu0 %vm733_vm3, %v7810_v13 }
 0x777   :  { %6416 = vmatprep.subr.msk.mxu0 %vm733_vm3, %v7823_v60  ;;  %v2329_v29 = vmul.f32 %v6844_v12, %v8571_v55  ;;  %v2873_v55 = vmul.f32 %v8283_v53, %v7684_v40  ;;  %v1963_v12 = vmul.f32 %v7687_v33, %v10309_v41 }
 0x779   :  { %6342 = vmatprep.mubr.f32.mxu0 %v2329_v29  ;;  %v6846_v39 = vpop.eup %6845  ;;  %v10310_v29 = vld [vmem:[#allocation41_spill] sm:$0xff] }
 0x77a   :  { %6343 = vmatmul.mubr.f32.gmra.mxu0 %v2330_v15  ;;  %v2332_v13 = vmul.f32 %v6846_v39, %v8574_v25  ;;  %v10297_v25 = vld [vmem:[#allocation28_spill] sm:$0xff]  ;;  %v2886_v15 = vmul.f32 %v8283_v53, %v10310_v29  ;;  %v10311_v39 = vld [vmem:[#allocation42_spill] sm:$0xff] }
 0x77b   :  { %v6848_v59 = vpop.eup %6847  ;;  %6417 = vmatpush3.xpose.msk.msra.mxu0 %vm733_vm3, %v7823_v60  ;;  %v10293_v60 = vld [vmem:[#allocation24_spill] sm:$0xff] }
 0x77c   :  { %6418 = vmatprep.subr.msk.mxu0 %vm733_vm3, %v7836_v10  ;;  %v2331_v9 = vmul.f32 %v6848_v59, %v8577_v47  ;;  %v1969_v47 = vmul.f32 %v7687_v33, %v10297_v25  ;;  %v1962_v59 = vmul.f32 %v7687_v33, %v10311_v39 }
 0x77e   :  { %6345 = vmatprep.mubr.f32.mxu0 %v2331_v9  ;;  %v10312_v9 = vld [vmem:[#allocation43_spill] sm:$0xff] }
 0x77f   :  { %6346 = vmatmul.mubr.f32.gmra.mxu0 %v2332_v13  ;;  %v2887_v13 = vmul.f32 %v8283_v53, %v10312_v9 }
 0x780   :  { %6419 = vmatpush3.xpose.msk.msra.mxu0 %vm733_vm3, %v7836_v10  ;;  %6436 = vmatprep.mubr.msk.f32.mxu0 %vm733_vm3, %v2873_v55  ;;  %v1971_v10 = vmul.f32 %v7687_v33, %v10293_v60  ;;  %v10313_v55 = vld [vmem:[#allocation44_spill] sm:$0xff] }
 0x781   :  { %6420 = vmatprep.subr.msk.mxu0 %vm733_vm3, %v7850_v52 }
 0x784   :  { %6421 = vmatpush3.xpose.msk.msra.mxu0 %vm733_vm3, %v7850_v52  ;;  %v10294_v52 = vld [vmem:[#allocation25_spill] sm:$0xff] }
 0x785   :  { %6422 = vmatprep.subr.msk.mxu0 %vm733_vm3, %v7864_v36 }
 0x788   :  { %6423 = vmatpush3.xpose.msk.msra.mxu0 %vm733_vm3, %v7864_v36  ;;  %v10292_v36 = vld [vmem:[#allocation23_spill] sm:$0xff] }
 0x789   :  { %6424 = vmatprep.subr.msk.mxu0 %vm733_vm3, %v7878_v27  ;;  %v2877_v40 = vmul.f32 %v8283_v53, %v10292_v36 }
 0x78c   :  { %6425 = vmatpush3.xpose.msk.msra.mxu0 %vm733_vm3, %v7878_v27  ;;  %v1972_v27 = vmul.f32 %v7687_v33, %v7991_v35 }
 0x78d   :  { %6426 = vmatprep.subr.msk.mxu0 %vm733_vm3, %v7892_v21 }
 0x790   :  { %6427 = vmatpush3.xpose.msk.msra.mxu0 %vm733_vm3, %v7892_v21  ;;  %v1974_v21 = vmul.f32 %v7687_v33, %v7953_v54  ;;  %v2876_v54 = vmul.f32 %v8283_v53, %v7986_v19  ;;  %v10296_v19 = vld [vmem:[#allocation27_spill] sm:$0xff] }
 0x791   :  { %6428 = vmatprep.subr.msk.mxu0 %vm733_vm3, %v7906_v22  ;;  %v2879_v23 = vmul.f32 %v8283_v53, %v10296_v19 }
 0x794   :  { %6429 = vmatpush3.xpose.msk.msra.mxu0 %vm733_vm3, %v7906_v22  ;;  %v2874_v22 = vmul.f32 %v8283_v53, %v7961_v61  ;;  %v10295_v61 = vld [vmem:[#allocation26_spill] sm:$0xff] }
 0x795   :  { %6430 = vmatprep.subr.msk.mxu0 %vm733_vm3, %v7918_v17 }
 0x798   :  { %6431 = vmatpush3.xpose.msk.msra.mxu0 %vm733_vm3, %v7918_v17  ;;  %v2875_v17 = vmul.f32 %v8283_v53, %v7969_v28  ;;  %v1970_v28 = vmul.f32 %v7687_v33, %v10295_v61 }
 0x799   :  { %6432 = vmatprep.subr.msk.mxu0 %vm733_vm3, %v7931_v4 }
 0x79c   :  { %6433 = vmatpush3.xpose.msk.msra.mxu0 %vm733_vm3, %v7931_v4  ;;  %v1973_v4 = vmul.f32 %v7687_v33, %v7974_v20 }
 0x79d   :  { %6434 = vmatprep.subr.msk.mxu0 %vm733_vm3, %v7950_v16 }
 0x7a0   :  { %6435 = vmatpush3.xpose.msk.msra.mxu0 %vm733_vm3, %v7950_v16  ;;  %v2878_v16 = vmul.f32 %v8283_v53, %v10294_v52 }
 0x7a1   :  { %6516 = vmatprep.subr.mxu0 %v1974_v21 }
 0x7a3   :  { %6437 = vmatmul.mubr.msk.f32.vlgmr.msra.gmra.mxu0 %vm733_vm3, %v2874_v22  ;;  %v10314_v22 = vld [vmem:[#allocation45_spill] sm:$0xff] }
 0x7a4   :  { %6439 = vmatprep.mubr.msk.f32.mxu0 %vm733_vm3, %v2875_v17  ;;  %6517 = vmatpush3.msra.mxu0 %v1974_v21  ;;  %v1961_v21 = vmul.f32 %v7687_v33, %v10313_v55  ;;  %v2888_v17 = vmul.f32 %v8283_v53, %v10314_v22  ;;  %v10333_v22 = vld [vmem:[#allocation50_spill] sm:$0xff] }
 0x7a5   :  { %6518 = vmatprep.subr.mxu0 %v1973_v4 }
 0x7a6   :  { %6519 = vmatpush3.msra.mxu0 %v1973_v4  ;;  %v10315_v4 = vld [vmem:[#allocation46_spill] sm:$0xff] }
 0x7a7   :  { %6440 = vmatmul.mubr.msk.f32.gmra.mxu0 %vm733_vm3, %v2876_v54  ;;  %6520 = vmatprep.subr.mxu0 %v1972_v27  ;;  %v1960_v54 = vmul.f32 %v7687_v33, %v10315_v4 }
 0x7a8   :  { %6442 = vmatprep.mubr.msk.f32.mxu0 %vm733_vm3, %v2877_v40  ;;  %6521 = vmatpush3.msra.mxu0 %v1972_v27  ;;  %v10316_v27 = vld [vmem:[#allocation47_spill] sm:$0xff]  ;;  %v8814_v40 = vpop.f32.mrf.mxu0 }
 0x7a9   :  { %6522 = vmatprep.subr.mxu0 %v1971_v10  ;;  %v1959_v36 = vmul.f32 %v7687_v33, %v10316_v27 }
 0x7aa   :  { %6523 = vmatpush3.msra.mxu0 %v1971_v10  ;;  %v8816_v10 = vpop.f32.mrf.mxu0 }
 0x7ab   :  { %6443 = vmatmul.mubr.msk.f32.gmra.mxu0 %vm733_vm3, %v2878_v16  ;;  %6524 = vmatprep.subr.mxu0 %v1970_v28 }
 0x7ac   :  { %6445 = vmatprep.mubr.msk.f32.mxu0 %vm733_vm3, %v2879_v23  ;;  %6525 = vmatpush3.msra.mxu0 %v1970_v28  ;;  %v8818_v52 = vpop.f32.mrf.mxu0 }
 0x7ad   :  { %6526 = vmatprep.subr.mxu0 %v1969_v47 }
 0x7ae   :  { %6527 = vmatpush3.msra.mxu0 %v1969_v47  ;;  %v8820_v53 = vpop.f32.mrf.mxu0 }
 0x7af   :  { %6446 = vmatmul.mubr.msk.f32.gmra.mxu0 %vm733_vm3, %v2880_v45  ;;  %6528 = vmatprep.subr.mxu0 %v1968_v50 }
 0x7b0   :  { %6448 = vmatprep.mubr.msk.f32.mxu0 %vm733_vm3, %v2881_v26  ;;  %6529 = vmatpush3.msra.mxu0 %v1968_v50  ;;  %v8822_v16 = vpop.f32.mrf.mxu0 }
 0x7b1   :  { %6530 = vmatprep.subr.mxu0 %v1967_v30 }
 0x7b2   :  { %6531 = vmatpush3.msra.mxu0 %v1967_v30  ;;  %v8824_v28 = vpop.f32.mrf.mxu0 }
 0x7b3   :  { %6449 = vmatmul.mubr.msk.f32.gmra.mxu0 %vm733_vm3, %v2882_v11  ;;  %6532 = vmatprep.subr.mxu0 %v1966_v44 }
 0x7b4   :  { %6451 = vmatprep.mubr.msk.f32.mxu0 %vm733_vm3, %v2883_v56  ;;  %6533 = vmatpush3.msra.mxu0 %v1966_v44 }
 0x7b5   :  { %6534 = vmatprep.subr.mxu0 %v1965_v1 }
 0x7b6   :  { %6535 = vmatpush3.msra.mxu0 %v1965_v1 }
 0x7b7   :  { %6452 = vmatmul.mubr.msk.f32.gmra.mxu0 %vm733_vm3, %v2884_v34  ;;  %6536 = vmatprep.subr.mxu0 %v1964_v42 }
 0x7b8   :  { %6454 = vmatprep.mubr.msk.f32.mxu0 %vm733_vm3, %v2885_v5  ;;  %6537 = vmatpush3.msra.mxu0 %v1964_v42 }
 0x7b9   :  { %6538 = vmatprep.subr.mxu0 %v1963_v12 }
 0x7ba   :  { %6539 = vmatpush3.msra.mxu0 %v1963_v12 }
 0x7bb   :  { %6455 = vmatmul.mubr.msk.f32.gmra.mxu0 %vm733_vm3, %v2886_v15  ;;  %6540 = vmatprep.subr.mxu0 %v1962_v59 }
 0x7bc   :  { %6457 = vmatprep.mubr.msk.f32.mxu0 %vm733_vm3, %v2887_v13  ;;  %6541 = vmatpush3.msra.mxu0 %v1962_v59 }
 0x7bd   :  { %6542 = vmatprep.subr.mxu0 %v1961_v21 }
 0x7be   :  { %6543 = vmatpush3.msra.mxu0 %v1961_v21 }
 0x7bf   :  { %6458 = vmatmul.mubr.msk.f32.gmra.mxu0 %vm733_vm3, %v2888_v17  ;;  %6544 = vmatprep.subr.mxu0 %v1960_v54 }
 0x7c0   :  { %6545 = vmatpush3.msra.mxu0 %v1960_v54 }
 0x7c1   :  { %6546 = vmatprep.subr.mxu0 %v1959_v36 }
 0x7c2   :  { %6547 = vmatpush3.msra.mxu0 %v1959_v36  ;;  %v10334_v36 = vld [vmem:[#allocation51_spill] sm:$0xff] }
 0x81d   :  { %v8826_v19 = vpop.f32.mrf.mxu0 }
 0x81e   :  { %10317 = vst [vmem:[#allocation23_spill] sm:$0xff] %v8826_v19 }
 0x81f   :  { %v8828_v23 = vpop.f32.mrf.mxu0 }
 0x820   :  { %10318 = vst [vmem:[#allocation24_spill] sm:$0xff] %v8828_v23 }
 0x821   :  { %v8830_v33 = vpop.f32.mrf.mxu0 }
 0x822   :  { %10319 = vst [vmem:[#allocation25_spill] sm:$0xff] %v8830_v33  ;;  %v10341_v33 = vld [vmem:[#allocation58_spill] sm:$0xff] }
 0x823   :  { %v8832_v47 = vpop.f32.mrf.mxu0 }
 0x824   :  { %10320 = vst [vmem:[#allocation26_spill] sm:$0xff] %v8832_v47 }
 0x826   :  { %v8834_v8 = vpop.f32.mrf.mxu0 }
 0x827   :  { %10321 = vst [vmem:[#allocation27_spill] sm:$0xff] %v8834_v8 }
 0x828   :  { %v8836_v45 = vpop.f32.mrf.mxu0 }
 0x829   :  { %10322 = vst [vmem:[#allocation28_spill] sm:$0xff] %v8836_v45  ;;  %v8947_v45 = vadd.f32 %v8814_v40, %v10334_v36 }
 0x82b   :  { %v8838_v50 = vpop.f32.mrf.mxu0 }
 0x82c   :  { %10323 = vst [vmem:[#allocation29_spill] sm:$0xff] %v8838_v50 }
 0x82d   :  { %v8840_v18 = vpop.f32.mrf.mxu0 }
 0x82e   :  { %10324 = vst [vmem:[#allocation30_spill] sm:$0xff] %v8840_v18 }
 0x830   :  { %v8842_v26 = vpop.f32.mrf.mxu0 }
 0x831   :  { %10325 = vst [vmem:[#allocation31_spill] sm:$0xff] %v8842_v26 }
 0x832   :  { %v8844_v30 = vpop.f32.mrf.mxu0 }
 0x833   :  { %10326 = vst [vmem:[#allocation32_spill] sm:$0xff] %v8844_v30 }
 0x835   :  { %v8846_v2 = vpop.f32.mrf.mxu0 }
 0x836   :  { %10327 = vst [vmem:[#allocation33_spill] sm:$0xff] %v8846_v2 }
 0x837   :  { %v8848_v11 = vpop.f32.mrf.mxu0 }
 0x838   :  { %10328 = vst [vmem:[#allocation34_spill] sm:$0xff] %v8848_v11 }
 0x83a   :  { %v8850_v44 = vpop.f32.mrf.mxu0 }
 0x83b   :  { %10329 = vst [vmem:[#allocation35_spill] sm:$0xff] %v8850_v44 }
 0x83c   :  { %v8852_v37 = vpop.f32.mrf.mxu0 }
 0x83d   :  { %10330 = vst [vmem:[#allocation36_spill] sm:$0xff] %v8852_v37 }
 0x83f   :  { %v8854_v56 = vpop.f32.mrf.mxu0 }
 0x840   :  { %10331 = vst [vmem:[#allocation37_spill] sm:$0xff] %v8854_v56  ;;  %v6397_v56 = vpop.f32.mrf.mxu1 }
 0x841   :  { %v8856_v1 = vpop.f32.mrf.mxu0  ;;  %v8941_v8 = vadd.f32 %v6397_v56, %v10334_v36  ;;  %v10342_v56 = vld [vmem:[#allocation59_spill] sm:$0xff] }
 0x842   :  { %10332 = vst [vmem:[#allocation39_spill] sm:$0xff] %v8856_v1  ;;  %v10338_v1 = vld [vmem:[#allocation55_spill] sm:$0xff]  ;;  %v2679_v11 = vpop.f32.mrf.mxu1 }
 0x844   :  { %v6400_v30 = vpop.f32.mrf.mxu1 }
 0x863   :  { %v6438_v31 = vpop.f32.mrf.mxu0 }
 0x864   :  { %v8859_v34 = vadd.f32 %v6438_v31, %v8380_v7 }
 0x865   :  { %v3003_v42 = vpop.f32.mrf.mxu0 }
 0x866   :  { %v8862_v49 = vadd.f32 %v3003_v42, %v8385_v32  ;;  %3084 = vmax.xlane.f32.xlu1 %v8859_v34  ;;  %v10335_v42 = vld [vmem:[#allocation52_spill] sm:$0xff] }
 0x867   :  { %v6441_v5 = vpop.f32.mrf.mxu0 }
 0x868   :  { %v8866_v12 = vadd.f32 %v6441_v5, %v8393_v24  ;;  %3082 = vmax.xlane.f32.xlu0 %v8862_v49 }
 0x869   :  { %v3013_v29 = vpop.f32.mrf.mxu0 }
 0x86a   :  { %v8870_v15 = vadd.f32 %v3013_v29, %v8401_v63  ;;  %3088 = vmax.xlane.f32.xlu1 %v8866_v12 }
 0x86b   :  { %v6444_v7 = vpop.f32.mrf.mxu0 }
 0x86c   :  { %v8874_v59 = vadd.f32 %v6444_v7, %v8415_v43  ;;  %3086 = vmax.xlane.f32.xlu0 %v8870_v15  ;;  %v10336_v7 = vld [vmem:[#allocation53_spill] sm:$0xff] }
 0x86d   :  { %v3023_v32 = vpop.f32.mrf.mxu0 }
 0x86e   :  { %v8878_v9 = vadd.f32 %v3023_v32, %v8420_v62  ;;  %3092 = vmax.xlane.f32.xlu1 %v8874_v59 }
 0x86f   :  { %v6447_v24 = vpop.f32.mrf.mxu0 }
 0x870   :  { %v8882_v13 = vadd.f32 %v6447_v24, %v8433_v48  ;;  %3090 = vmax.xlane.f32.xlu0 %v8878_v9 }
 0x871   :  { %v3033_v63 = vpop.f32.mrf.mxu0 }
 0x872   :  { %v8886_v21 = vadd.f32 %v3033_v63, %v8438_v0  ;;  %3096 = vmax.xlane.f32.xlu1 %v8882_v13  ;;  %v10337_v63 = vld [vmem:[#allocation54_spill] sm:$0xff] }
 0x873   :  { %v6450_v43 = vpop.f32.mrf.mxu0  ;;  %v8958_v27 = vadd.f32 %v8820_v53, %v10337_v63  ;;  %v8969_v53 = vadd.f32 %v8818_v52, %v10336_v7 }
 0x874   :  { %v8890_v17 = vadd.f32 %v6450_v43, %v10333_v22  ;;  %3094 = vmax.xlane.f32.xlu0 %v8886_v21 }
 0x875   :  { %v3043_v62 = vpop.f32.mrf.mxu0 }
 0x876   :  { %v8894_v54 = vadd.f32 %v3043_v62, %v8456_v57  ;;  %3100 = vmax.xlane.f32.xlu1 %v8890_v17  ;;  %v2709_v57 = vpop.xlane.xlu1 %2708  ;;  %v1816_v62 = vpop.xlane.xlu0 %1815 }
 0x877   :  { %v6453_v48 = vpop.f32.mrf.mxu0  ;;  %v1847_v47 = vsub.f32 %v10341_v33, %v1816_v62  ;;  %v8963_v62 = vadd.f32 %v6400_v30, %v10336_v7 }
 0x878   :  { %v8898_v31 = vadd.f32 %v6453_v48, %v10334_v36  ;;  %3098 = vmax.xlane.f32.xlu0 %v8894_v54  ;;  %v10343_v36 = vld [vmem:[#allocation60_spill] sm:$0xff] }
 0x879   :  { %v3053_v0 = vpop.f32.mrf.mxu0  ;;  %v1863_v40 = vmul.f32 1.442695, %v1847_v47 }
 0x87a   :  { %v8902_v5 = vadd.f32 %v3053_v0, %v10335_v42  ;;  %3104 = vmax.xlane.f32.xlu1 %v8898_v31  ;;  %v2711_v2 = vpop.xlane.xlu1 %2710  ;;  %v1818_v26 = vpop.xlane.xlu0 %1817 }
 0x87b   :  { %v6456_v29 = vpop.f32.mrf.mxu0  ;;  %v2741_v23 = vsub.f32 %v10342_v56, %v2711_v2  ;;  %v1848_v33 = vsub.f32 %v10343_v36, %v1818_v26  ;;  %v10345_v26 = vld [vmem:[#allocation62_spill] sm:$0xff] }
 0x87c   :  { %v8906_v32 = vadd.f32 %v6456_v29, %v10336_v7  ;;  %3102 = vmax.xlane.f32.xlu0 %v8902_v5  ;;  %v10339_v29 = vld [vmem:[#allocation56_spill] sm:$0xff] }
 0x87d   :  { %v3063_v24 = vpop.f32.mrf.mxu0  ;;  %v1865_v47 = vmul.f32 1.442695, %v1848_v33  ;;  %v8980_v52 = vadd.f32 %v8824_v28, %v10339_v29  ;;  %v8991_v28 = vadd.f32 %v8822_v16, %v10338_v1 }
 0x87e   :  { %v8910_v43 = vadd.f32 %v3063_v24, %v10337_v63  ;;  %3108 = vmax.xlane.f32.xlu1 %v8906_v32  ;;  %v8923_v24 = vadd.f32 %v8631_v58, %v10333_v22  ;;  %v2713_v50 = vpop.xlane.xlu1 %2712  ;;  %v8937_v58 = vadd.f32 %v8816_v10, %v10335_v42  ;;  %v1820_v18 = vpop.xlane.xlu0 %1819 }
 0x87f   :  { %v6459_v48 = vpop.f32.mrf.mxu0 }
 0x880   :  { %v8914_v0 = vadd.f32 %v6459_v48, %v10338_v1  ;;  %3106 = vmax.xlane.f32.xlu0 %v8910_v43  ;;  %v8928_v48 = vadd.f32 %v8637_v38, %v10333_v22  ;;  %v10340_v38 = vld [vmem:[#allocation57_spill] sm:$0xff] }
 0x881   :  { %v3073_v37 = vpop.f32.mrf.mxu0  ;;  %v2740_v22 = vsub.f32 %v10340_v38, %v2709_v57 }
 0x882   :  { %v8918_v44 = vadd.f32 %v3073_v37, %v10339_v29  ;;  %3112 = vmax.xlane.f32.xlu1 %v8914_v0  ;;  %v8932_v37 = vadd.f32 %v2679_v11, %v10335_v42  ;;  %v2689_v11 = vpop.f32.mrf.mxu1  ;;  %v2715_v10 = vpop.xlane.xlu1 %2714 }
 0x883   :  { %v8952_v42 = vadd.f32 %v2689_v11, %v10337_v63  ;;  %v2756_v19 = vmul.f32 1.442695, %v2740_v22  ;;  %v1822_v38 = vpop.xlane.xlu0 %1821  ;;  %v2758_v22 = vmul.f32 1.442695, %v2741_v23  ;;  %v10344_v11 = vld [vmem:[#allocation61_spill] sm:$0xff]  ;;  %v1849_v63 = vsub.f32 %v10345_v26, %v1820_v18  ;;  %v10350_v26 = vld [vmem:[#allocation67_spill] sm:$0xff] }
 0x884   :  { %3110 = vmax.xlane.f32.xlu0 %v8918_v44  ;;  %v6403_v57 = vpop.f32.mrf.mxu1  ;;  %v2742_v2 = vsub.f32 %v10344_v11, %v2713_v50  ;;  %v10346_v50 = vld [vmem:[#allocation63_spill] sm:$0xff] }
 0x885   :  { %6849 = vpow2.f32 %v2756_v19  ;;  %v2743_v36 = vsub.f32 %v10346_v50, %v2715_v10  ;;  %v1867_v7 = vmul.f32 1.442695, %v1849_v63  ;;  %v8985_v11 = vadd.f32 %v6403_v57, %v10338_v1 }
 0x886   :  { %2726 = vmax.xlane.f32.xlu1 %v8923_v24  ;;  %v2699_v56 = vpop.f32.mrf.mxu1  ;;  %v2717_v4 = vpop.xlane.xlu1 %2716  ;;  %6851 = vpow2.f32 %v1863_v40  ;;  %v2760_v23 = vmul.f32 1.442695, %v2742_v2  ;;  %v10347_v40 = vld [vmem:[#allocation64_spill] sm:$0xff]  ;;  %v10348_v2 = vld [vmem:[#allocation65_spill] sm:$0xff] }
 0x887   :  { %v1824_v30 = vpop.xlane.xlu0 %1823  ;;  %v8974_v19 = vadd.f32 %v2699_v56, %v10339_v29  ;;  %6853 = vpow2.f32 %v2758_v22  ;;  %v1850_v18 = vsub.f32 %v10347_v40, %v1822_v38  ;;  %v2762_v22 = vmul.f32 1.442695, %v2743_v36  ;;  %v10349_v38 = vld [vmem:[#allocation66_spill] sm:$0xff]  ;;  %v10352_v36 = vld [vmem:[#allocation68_spill] sm:$0xff]  ;;  %v10353_v40 = vld [vmem:[#allocation69_spill] sm:$0xff] }
 0x888   :  { %1833 = vmax.xlane.f32.xlu0 %v8928_v48  ;;  %6855 = vpow2.f32 %v1865_v47  ;;  %v2744_v10 = vsub.f32 %v10348_v2, %v2717_v4  ;;  %v1851_v47 = vsub.f32 %v10349_v38, %v1824_v30  ;;  %v10355_v2 = vld [vmem:[#allocation70_spill] sm:$0xff] }
 0x889   :  { %6857 = vpow2.f32 %v2760_v23  ;;  %v1869_v29 = vmul.f32 1.442695, %v1850_v18 }
 0x88a   :  { %2728 = vmax.xlane.f32.xlu1 %v8932_v37  ;;  %v2719_v33 = vpop.xlane.xlu1 %2718  ;;  %6859 = vpow2.f32 %v1867_v7  ;;  %v2764_v57 = vmul.f32 1.442695, %v2744_v10  ;;  %v1871_v50 = vmul.f32 1.442695, %v1851_v47 }
 0x88b   :  { %v1826_v56 = vpop.xlane.xlu0 %1825  ;;  %6861 = vpow2.f32 %v2762_v22  ;;  %v2745_v63 = vsub.f32 %v10350_v26, %v2719_v33 }
 0x88c   :  { %1835 = vmax.xlane.f32.xlu0 %v8937_v58  ;;  %6863 = vpow2.f32 %v1869_v29  ;;  %v1852_v16 = vsub.f32 %v10352_v36, %v1826_v56 }
 0x88d   :  { %6865 = vpow2.f32 %v2764_v57  ;;  %v2766_v7 = vmul.f32 1.442695, %v2745_v63 }
 0x88e   :  { %2730 = vmax.xlane.f32.xlu1 %v8941_v8  ;;  %v2721_v23 = vpop.xlane.xlu1 %2720  ;;  %6867 = vpow2.f32 %v1871_v50  ;;  %v1873_v22 = vmul.f32 1.442695, %v1852_v16 }
 0x88f   :  { %v1828_v30 = vpop.xlane.xlu0 %1827  ;;  %v2746_v18 = vsub.f32 %v10353_v40, %v2721_v23  ;;  %6869 = vpow2.f32 %v2766_v7 }
 0x890   :  { %1837 = vmax.xlane.f32.xlu0 %v8947_v45  ;;  %v1853_v10 = vsub.f32 %v10355_v2, %v1828_v30  ;;  %6871 = vpow2.f32 %v1873_v22 }
 0x891   :  { %v2768_v29 = vmul.f32 1.442695, %v2746_v18 }
 0x892   :  { %2732 = vmax.xlane.f32.xlu1 %v8952_v42  ;;  %v8997_v4 = vpop.eup %6849  ;;  %v1875_v47 = vmul.f32 1.442695, %v1853_v10  ;;  %v9042_v40 = vpop.xlane.xlu1 %2722 }
 0x893   :  { %10351 = vst [vmem:[#allocation41_spill] sm:$0xff] %v8997_v4  ;;  %v9001_v1 = vpop.eup %6851  ;;  %6873 = vpow2.f32 %v2768_v29  ;;  %v9044_v18 = vpop.xlane.xlu0 %1829 }
 0x894   :  { %1839 = vmax.xlane.f32.xlu0 %v8958_v27  ;;  %v9005_v33 = vpop.eup %6853  ;;  %6875 = vpow2.f32 %v1875_v47 }
 0x895   :  { %10354 = vst [vmem:[#allocation43_spill] sm:$0xff] %v9005_v33  ;;  %v9009_v56 = vpop.eup %6855 }
 0x896   :  { %2734 = vmax.xlane.f32.xlu1 %v8963_v62  ;;  %v9012_v38 = vpop.eup %6857  ;;  %v9046_v22 = vpop.xlane.xlu1 %2724 }
 0x897   :  { %10356 = vst [vmem:[#allocation45_spill] sm:$0xff] %v9012_v38  ;;  %v9015_v57 = vpop.eup %6859  ;;  %v9048_v2 = vpop.xlane.xlu0 %1831 }
 0x898   :  { %1841 = vmax.xlane.f32.xlu0 %v8969_v53  ;;  %v9018_v26 = vpop.eup %6861 }
 0x899   :  { %10357 = vst [vmem:[#allocation50_spill] sm:$0xff] %v9018_v26  ;;  %v9021_v63 = vpop.eup %6863 }
 0x89a   :  { %2736 = vmax.xlane.f32.xlu1 %v8974_v19  ;;  %v9024_v23 = vpop.eup %6865 }
 0x89b   :  { %10358 = vst [vmem:[#allocation51_spill] sm:$0xff] %v9024_v23  ;;  %v9027_v50 = vpop.eup %6867 }
 0x89c   :  { %1843 = vmax.xlane.f32.xlu0 %v8980_v52  ;;  %v9030_v36 = vpop.eup %6869 }
 0x89d   :  { %10359 = vst [vmem:[#allocation52_spill] sm:$0xff] %v9030_v36  ;;  %v9033_v16 = vpop.eup %6871 }
 0x89e   :  { %2738 = vmax.xlane.f32.xlu1 %v8985_v11 }
 0x8a0   :  { %1845 = vmax.xlane.f32.xlu0 %v8991_v28  ;;  %v9036_v30 = vpop.eup %6873 }
 0x8a1   :  { %10360 = vst [vmem:[#allocation53_spill] sm:$0xff] %v9036_v30  ;;  %v9039_v7 = vpop.eup %6875 }
 0x8a2   :  { %2788 = vadd.xlane.f32.xlu1 %v8997_v4 }
 0x8a4   :  { %1895 = vadd.xlane.f32.xlu0 %v9001_v1 }
 0x8a6   :  { %2790 = vadd.xlane.f32.xlu1 %v9005_v33 }
 0x8a8   :  { %1897 = vadd.xlane.f32.xlu0 %v9009_v56 }
 0x8aa   :  { %2792 = vadd.xlane.f32.xlu1 %v9012_v38 }
 0x8ac   :  { %1899 = vadd.xlane.f32.xlu0 %v9015_v57 }
 0x8ae   :  { %2794 = vadd.xlane.f32.xlu1 %v9018_v26 }
 0x8b0   :  { %1901 = vadd.xlane.f32.xlu0 %v9021_v63 }
 0x8b2   :  { %2796 = vadd.xlane.f32.xlu1 %v9024_v23 }
 0x8b4   :  { %1903 = vadd.xlane.f32.xlu0 %v9027_v50 }
 0x8b6   :  { %2798 = vadd.xlane.f32.xlu1 %v9030_v36 }
 0x8b8   :  { %1905 = vadd.xlane.f32.xlu0 %v9033_v16 }
 0x8ba   :  { %2800 = vadd.xlane.f32.xlu1 %v9036_v30 }
 0x8bc   :  { %1907 = vadd.xlane.f32.xlu0 %v9039_v7 }
 0x8ef   :  { %v3085_v10 = vpop.xlane.xlu1 %3084 }
 0x8f0   :  { %v3115_v29 = vsub.f32 %v8859_v34, %v3085_v10 }
 0x8f1   :  { %v3083_v47 = vpop.xlane.xlu0 %3082 }
 0x8f2   :  { %v3132_v36 = vmul.f32 1.442695, %v3115_v29  ;;  %v3114_v23 = vsub.f32 %v8862_v49, %v3083_v47 }
 0x8f3   :  { %v3089_v30 = vpop.xlane.xlu1 %3088 }
 0x8f4   :  { %6877 = vpow2.f32 %v3132_v36  ;;  %v3130_v26 = vmul.f32 1.442695, %v3114_v23  ;;  %v3117_v38 = vsub.f32 %v8866_v12, %v3089_v30 }
 0x8f5   :  { %v3087_v33 = vpop.xlane.xlu0 %3086 }
 0x8f6   :  { %6879 = vpow2.f32 %v3130_v26  ;;  %v3136_v4 = vmul.f32 1.442695, %v3117_v38  ;;  %v3116_v55 = vsub.f32 %v8870_v15, %v3087_v33 }
 0x8f7   :  { %v3093_v39 = vpop.xlane.xlu1 %3092 }
 0x8f8   :  { %6881 = vpow2.f32 %v3136_v4  ;;  %v3134_v41 = vmul.f32 1.442695, %v3116_v55  ;;  %v3119_v3 = vsub.f32 %v8874_v59, %v3093_v39 }
 0x8f9   :  { %v3091_v34 = vpop.xlane.xlu0 %3090 }
 0x8fa   :  { %6883 = vpow2.f32 %v3134_v41  ;;  %v3140_v10 = vmul.f32 1.442695, %v3119_v3  ;;  %v3118_v49 = vsub.f32 %v8878_v9, %v3091_v34 }
 0x8fb   :  { %v3097_v29 = vpop.xlane.xlu1 %3096 }
 0x8fc   :  { %6885 = vpow2.f32 %v3140_v10  ;;  %v3138_v23 = vmul.f32 1.442695, %v3118_v49  ;;  %v3121_v12 = vsub.f32 %v8882_v13, %v3097_v29 }
 0x8fd   :  { %v3095_v36 = vpop.xlane.xlu0 %3094 }
 0x8fe   :  { %6887 = vpow2.f32 %v3138_v23  ;;  %v3144_v38 = vmul.f32 1.442695, %v3121_v12  ;;  %v3120_v15 = vsub.f32 %v8886_v21, %v3095_v36 }
 0x8ff   :  { %v3101_v33 = vpop.xlane.xlu1 %3100 }
 0x900   :  { %6889 = vpow2.f32 %v3144_v38  ;;  %v3142_v55 = vmul.f32 1.442695, %v3120_v15  ;;  %v3123_v39 = vsub.f32 %v8890_v17, %v3101_v33  ;;  %v10361_v15 = vld [vmem:[#allocation71_spill] sm:$0xff] }
 0x901   :  { %v9059_v59 = vpop.eup %6877  ;;  %v3099_v3 = vpop.xlane.xlu0 %3098  ;;  %v2747_v33 = vsub.f32 %v10361_v15, %v9042_v40 }
 0x902   :  { %6891 = vpow2.f32 %v3142_v55  ;;  %v3148_v41 = vmul.f32 1.442695, %v3123_v39  ;;  %v3122_v9 = vsub.f32 %v8894_v54, %v3099_v3  ;;  %3164 = vadd.xlane.f32.xlu1 %v9059_v59 }
 0x903   :  { %v9063_v13 = vpop.eup %6879  ;;  %v3105_v4 = vpop.xlane.xlu1 %3104 }
 0x904   :  { %6893 = vpow2.f32 %v3148_v41  ;;  %v3146_v26 = vmul.f32 1.442695, %v3122_v9  ;;  %v3125_v21 = vsub.f32 %v8898_v31, %v3105_v4  ;;  %3162 = vadd.xlane.f32.xlu0 %v9063_v13  ;;  %v10362_v41 = vld [vmem:[#allocation72_spill] sm:$0xff] }
 0x905   :  { %v9067_v30 = vpop.eup %6881  ;;  %v3103_v17 = vpop.xlane.xlu0 %3102 }
 0x906   :  { %6895 = vpow2.f32 %v3146_v26  ;;  %v3152_v47 = vmul.f32 1.442695, %v3125_v21  ;;  %v3124_v34 = vsub.f32 %v8902_v5, %v3103_v17  ;;  %3168 = vadd.xlane.f32.xlu1 %v9067_v30  ;;  %v2770_v21 = vmul.f32 1.442695, %v2747_v33 }
 0x907   :  { %v9071_v54 = vpop.eup %6883  ;;  %v3109_v10 = vpop.xlane.xlu1 %3108 }
 0x908   :  { %6897 = vpow2.f32 %v3152_v47  ;;  %v3150_v49 = vmul.f32 1.442695, %v3124_v34  ;;  %v3127_v29 = vsub.f32 %v8906_v32, %v3109_v10  ;;  %3166 = vadd.xlane.f32.xlu0 %v9071_v54 }
 0x909   :  { %v9075_v31 = vpop.eup %6885  ;;  %v3107_v23 = vpop.xlane.xlu0 %3106 }
 0x90a   :  { %6899 = vpow2.f32 %v3150_v49  ;;  %v3156_v12 = vmul.f32 1.442695, %v3127_v29  ;;  %v3126_v36 = vsub.f32 %v8910_v43, %v3107_v23  ;;  %3172 = vadd.xlane.f32.xlu1 %v9075_v31  ;;  %v1854_v43 = vsub.f32 %v10362_v41, %v9044_v18  ;;  %v10364_v49 = vld [vmem:[#allocation74_spill] sm:$0xff] }
 0x90b   :  { %v9079_v5 = vpop.eup %6887  ;;  %v3113_v38 = vpop.xlane.xlu1 %3112 }
 0x90c   :  { %6901 = vpow2.f32 %v3156_v12  ;;  %v3154_v55 = vmul.f32 1.442695, %v3126_v36  ;;  %v3129_v32 = vsub.f32 %v8914_v0, %v3113_v38  ;;  %3170 = vadd.xlane.f32.xlu0 %v9079_v5  ;;  %v10363_v0 = vld [vmem:[#allocation73_spill] sm:$0xff]  ;;  %v1877_v10 = vmul.f32 1.442695, %v1854_v43 }
 0x90d   :  { %v9085_v39 = vpop.eup %6889  ;;  %v3111_v3 = vpop.xlane.xlu0 %3110  ;;  %v2748_v17 = vsub.f32 %v10363_v0, %v9046_v22 }
 0x90e   :  { %6903 = vpow2.f32 %v3154_v55  ;;  %v3160_v9 = vmul.f32 1.442695, %v3129_v32  ;;  %v3128_v4 = vsub.f32 %v8918_v44, %v3111_v3  ;;  %3176 = vadd.xlane.f32.xlu1 %v9085_v39  ;;  %v1855_v44 = vsub.f32 %v10364_v49, %v9048_v2 }
 0x90f   :  { %v9091_v26 = vpop.eup %6891  ;;  %v2727_v40 = vpop.xlane.xlu1 %2726  ;;  %v2772_v12 = vmul.f32 1.442695, %v2748_v17 }
 0x910   :  { %6905 = vpow2.f32 %v3160_v9  ;;  %v3158_v47 = vmul.f32 1.442695, %v3128_v4  ;;  %3174 = vadd.xlane.f32.xlu0 %v9091_v26  ;;  %v2749_v22 = vsub.f32 %v8923_v24, %v2727_v40  ;;  %v1879_v15 = vmul.f32 1.442695, %v1855_v44 }
 0x911   :  { %v9096_v34 = vpop.eup %6893  ;;  %v1834_v18 = vpop.xlane.xlu0 %1833 }
 0x912   :  { %6907 = vpow2.f32 %v3158_v47  ;;  %3180 = vadd.xlane.f32.xlu1 %v9096_v34  ;;  %v1856_v33 = vsub.f32 %v8928_v48, %v1834_v18  ;;  %v2774_v32 = vmul.f32 1.442695, %v2749_v22 }
 0x913   :  { %v9101_v29 = vpop.eup %6895  ;;  %v2729_v23 = vpop.xlane.xlu1 %2728  ;;  %6909 = vpow2.f32 %v2770_v21 }
 0x914   :  { %3178 = vadd.xlane.f32.xlu0 %v9101_v29  ;;  %6911 = vpow2.f32 %v1877_v10  ;;  %v2750_v3 = vsub.f32 %v8932_v37, %v2729_v23  ;;  %v1881_v43 = vmul.f32 1.442695, %v1856_v33 }
 0x915   :  { %v9105_v36 = vpop.eup %6897  ;;  %v1836_v38 = vpop.xlane.xlu0 %1835  ;;  %6913 = vpow2.f32 %v2772_v12 }
 0x916   :  { %3184 = vadd.xlane.f32.xlu1 %v9105_v36  ;;  %6915 = vpow2.f32 %v1879_v15  ;;  %v1857_v9 = vsub.f32 %v8937_v58, %v1836_v38  ;;  %v2776_v40 = vmul.f32 1.442695, %v2750_v3 }
 0x917   :  { %v9109_v2 = vpop.eup %6899  ;;  %v2731_v55 = vpop.xlane.xlu1 %2730  ;;  %6917 = vpow2.f32 %v2774_v32 }
 0x918   :  { %3182 = vadd.xlane.f32.xlu0 %v9109_v2  ;;  %v2751_v21 = vsub.f32 %v8941_v8, %v2731_v55  ;;  %6919 = vpow2.f32 %v1881_v43  ;;  %v1883_v17 = vmul.f32 1.442695, %v1857_v9 }
 0x919   :  { %v9113_v24 = vpop.eup %6901  ;;  %v1838_v41 = vpop.xlane.xlu0 %1837  ;;  %6921 = vpow2.f32 %v2776_v40 }
 0x91a   :  { %3188 = vadd.xlane.f32.xlu1 %v9113_v24  ;;  %v1858_v47 = vsub.f32 %v8947_v45, %v1838_v41  ;;  %v2778_v10 = vmul.f32 1.442695, %v2751_v21  ;;  %6923 = vpow2.f32 %v1883_v17 }
 0x91b   :  { %v9117_v48 = vpop.eup %6903  ;;  %v2733_v4 = vpop.xlane.xlu1 %2732 }
 0x91c   :  { %3186 = vadd.xlane.f32.xlu0 %v9117_v48  ;;  %v2752_v49 = vsub.f32 %v8952_v42, %v2733_v4  ;;  %v1885_v23 = vmul.f32 1.442695, %v1858_v47  ;;  %6925 = vpow2.f32 %v2778_v10 }
 0x91d   :  { %v9121_v37 = vpop.eup %6905  ;;  %v1840_v0 = vpop.xlane.xlu0 %1839 }
 0x91e   :  { %3192 = vadd.xlane.f32.xlu1 %v9121_v37  ;;  %v1859_v12 = vsub.f32 %v8958_v27, %v1840_v0  ;;  %v2780_v38 = vmul.f32 1.442695, %v2752_v49  ;;  %6927 = vpow2.f32 %v1885_v23 }
 0x91f   :  { %v9125_v58 = vpop.eup %6907  ;;  %v2735_v18 = vpop.xlane.xlu1 %2734 }
 0x920   :  { %3190 = vadd.xlane.f32.xlu0 %v9125_v58  ;;  %v9129_v8 = vpop.eup %6909  ;;  %v2753_v15 = vsub.f32 %v8963_v62, %v2735_v18  ;;  %v1887_v55 = vmul.f32 1.442695, %v1859_v12  ;;  %6929 = vpow2.f32 %v2780_v38 }
 0x921   :  { %v1842_v44 = vpop.xlane.xlu0 %1841  ;;  %v9133_v45 = vpop.eup %6911 }
 0x922   :  { %2802 = vadd.xlane.f32.xlu1 %v9129_v8  ;;  %v9137_v42 = vpop.eup %6913  ;;  %v1860_v32 = vsub.f32 %v8969_v53, %v1842_v44  ;;  %v2782_v3 = vmul.f32 1.442695, %v2753_v15  ;;  %6931 = vpow2.f32 %v1887_v55 }
 0x923   :  { %v2737_v22 = vpop.xlane.xlu1 %2736  ;;  %v9141_v27 = vpop.eup %6915 }
 0x924   :  { %1909 = vadd.xlane.f32.xlu0 %v9133_v45  ;;  %v2754_v41 = vsub.f32 %v8974_v19, %v2737_v22  ;;  %v9145_v62 = vpop.eup %6917  ;;  %v1889_v40 = vmul.f32 1.442695, %v1860_v32  ;;  %6933 = vpow2.f32 %v2782_v3 }
 0x925   :  { %v1844_v33 = vpop.xlane.xlu0 %1843  ;;  %v9149_v53 = vpop.eup %6919 }
 0x926   :  { %2804 = vadd.xlane.f32.xlu1 %v9137_v42  ;;  %v1861_v43 = vsub.f32 %v8980_v52, %v1844_v33  ;;  %v2784_v21 = vmul.f32 1.442695, %v2754_v41  ;;  %v9153_v19 = vpop.eup %6921  ;;  %6935 = vpow2.f32 %v1889_v40 }
 0x927   :  { %v2739_v9 = vpop.xlane.xlu1 %2738  ;;  %v9157_v18 = vpop.eup %6923 }
 0x928   :  { %1911 = vadd.xlane.f32.xlu0 %v9141_v27  ;;  %v2755_v0 = vsub.f32 %v8985_v11, %v2739_v9  ;;  %v1891_v17 = vmul.f32 1.442695, %v1861_v43 }
 0x929   :  { %v1846_v4 = vpop.xlane.xlu0 %1845  ;;  %v9160_v49 = vpop.eup %6925 }
 0x92a   :  { %2806 = vadd.xlane.f32.xlu1 %v9145_v62  ;;  %v1862_v47 = vsub.f32 %v8991_v28, %v1846_v4  ;;  %v2786_v10 = vmul.f32 1.442695, %v2755_v0 }
 0x92b   :  { %v9163_v28 = vpop.eup %6927 }
 0x92c   :  { %1913 = vadd.xlane.f32.xlu0 %v9149_v53  ;;  %v1893_v11 = vmul.f32 1.442695, %v1862_v47 }
 0x92d   :  { %v1896_v52 = vpop.xlane.xlu0 %1895  ;;  %v9166_v23 = vpop.eup %6929 }
 0x92e   :  { %2808 = vadd.xlane.f32.xlu1 %v9153_v19  ;;  %6937 = vrcp.f32 %v1896_v52 }
 0x92f   :  { %6939 = vpow2.f32 %v2784_v21  ;;  %v9169_v22 = vpop.eup %6931 }
 0x930   :  { %1915 = vadd.xlane.f32.xlu0 %v9157_v18  ;;  %6941 = vpow2.f32 %v1891_v17 }
 0x931   :  { %v1898_v44 = vpop.xlane.xlu0 %1897  ;;  %v9172_v38 = vpop.eup %6933 }
 0x932   :  { %6943 = vrcp.f32 %v1898_v44  ;;  %2810 = vadd.xlane.f32.xlu1 %v9160_v49 }
 0x933   :  { %6945 = vpow2.f32 %v2786_v10  ;;  %v9175_v33 = vpop.eup %6935 }
 0x934   :  { %1917 = vadd.xlane.f32.xlu0 %v9163_v28  ;;  %6947 = vpow2.f32 %v1893_v11 }
 0x935   :  { %v1900_v12 = vpop.xlane.xlu0 %1899 }
 0x936   :  { %6949 = vrcp.f32 %v1900_v12  ;;  %2812 = vadd.xlane.f32.xlu1 %v9166_v23 }
 0x938   :  { %1919 = vadd.xlane.f32.xlu0 %v9169_v22 }
 0x939   :  { %v1902_v15 = vpop.xlane.xlu0 %1901 }
 0x93a   :  { %6951 = vrcp.f32 %v1902_v15  ;;  %2814 = vadd.xlane.f32.xlu1 %v9172_v38 }
 0x93b   :  { %v6938_v55 = vpop.eup %6937 }
 0x93c   :  { %1921 = vadd.xlane.f32.xlu0 %v9175_v33  ;;  %v9178_v32 = vpop.eup %6939  ;;  %v1943_v41 = vmul.f32 %v6938_v55, %v9001_v1 }
 0x93d   :  { %v1904_v3 = vpop.xlane.xlu0 %1903  ;;  %v9181_v43 = vpop.eup %6941 }
 0x93e   :  { %6953 = vrcp.f32 %v1904_v3  ;;  %2816 = vadd.xlane.f32.xlu1 %v9178_v32  ;;  %6548 = vmatprep.mubr.f32.mxu0 %v1943_v41 }
 0x93f   :  { %v6944_v9 = vpop.eup %6943 }
 0x940   :  { %1923 = vadd.xlane.f32.xlu0 %v9181_v43  ;;  %v1944_v4 = vmul.f32 %v6944_v9, %v9009_v56  ;;  %v9186_v40 = vpop.eup %6945 }
 0x941   :  { %v1906_v21 = vpop.xlane.xlu0 %1905  ;;  %v9188_v0 = vpop.eup %6947 }
 0x942   :  { %6955 = vrcp.f32 %v1906_v21  ;;  %2818 = vadd.xlane.f32.xlu1 %v9186_v40  ;;  %6549 = vmatmul.mubr.f32.vlgmr.msra.gmra.mxu0 %v1944_v4 }
 0x943   :  { %v6950_v1 = vpop.eup %6949 }
 0x944   :  { %1925 = vadd.xlane.f32.xlu0 %v9188_v0  ;;  %v1945_v17 = vmul.f32 %v6950_v1, %v9015_v57  ;;  %v9197_v57 = vpop.xlane.xlu1 %2788 }
 0x945   :  { %v1908_v47 = vpop.xlane.xlu0 %1907 }
 0x946   :  { %6957 = vrcp.f32 %v1908_v47  ;;  %6551 = vmatprep.mubr.f32.mxu0 %v1945_v17 }
 0x947   :  { %v6952_v52 = vpop.eup %6951 }
 0x948   :  { %v1946_v56 = vmul.f32 %v6952_v52, %v9021_v63  ;;  %v9199_v3 = vpop.xlane.xlu1 %2790 }
 0x94a   :  { %6552 = vmatmul.mubr.f32.gmra.mxu0 %v1946_v56 }
 0x94b   :  { %v6954_v10 = vpop.eup %6953 }
 0x94c   :  { %v1947_v11 = vmul.f32 %v6954_v10, %v9027_v50  ;;  %v9201_v41 = vpop.xlane.xlu1 %2792 }
 0x94e   :  { %6554 = vmatprep.mubr.f32.mxu0 %v1947_v11 }
 0x94f   :  { %v6956_v44 = vpop.eup %6955 }
 0x950   :  { %v1948_v12 = vmul.f32 %v6956_v44, %v9033_v16  ;;  %v9203_v63 = vpop.xlane.xlu1 %2794 }
 0x952   :  { %6555 = vmatmul.mubr.f32.gmra.mxu0 %v1948_v12 }
 0x953   :  { %v6958_v15 = vpop.eup %6957 }
 0x954   :  { %v1949_v55 = vmul.f32 %v6958_v15, %v9039_v7  ;;  %v9205_v9 = vpop.xlane.xlu1 %2796 }
 0x956   :  { %6557 = vmatprep.mubr.f32.mxu0 %v1949_v55 }
 0x958   :  { %v9207_v50 = vpop.xlane.xlu1 %2798 }
 0x95c   :  { %v9209_v4 = vpop.xlane.xlu1 %2800 }
 0x98b   :  { %v3165_v16 = vpop.xlane.xlu1 %3164 }
 0x98c   :  { %6959 = vrcp.f32 %v3165_v16 }
 0x98d   :  { %v3163_v21 = vpop.xlane.xlu0 %3162 }
 0x98e   :  { %6961 = vrcp.f32 %v3163_v21 }
 0x98f   :  { %v3169_v7 = vpop.xlane.xlu1 %3168 }
 0x990   :  { %6963 = vrcp.f32 %v3169_v7 }
 0x991   :  { %v3167_v1 = vpop.xlane.xlu0 %3166 }
 0x992   :  { %6965 = vrcp.f32 %v3167_v1  ;;  %v10365_v1 = vld [vmem:[#allocation48_spill] sm:$0xff] }
 0x993   :  { %v3173_v17 = vpop.xlane.xlu1 %3172 }
 0x994   :  { %6967 = vrcp.f32 %v3173_v17  ;;  %v2866_v17 = vmul.f32 %v10365_v1, %v7974_v20  ;;  %v2864_v20 = vmul.f32 %v10365_v1, %v10293_v60  ;;  %v2862_v60 = vmul.f32 %v10365_v1, %v10297_v25 }
 0x995   :  { %v3171_v47 = vpop.xlane.xlu0 %3170 }
 0x996   :  { %6969 = vrcp.f32 %v3171_v47  ;;  %v10366_v47 = vld [vmem:[#allocation49_spill] sm:$0xff] }
 0x997   :  { %v3177_v52 = vpop.xlane.xlu1 %3176 }
 0x998   :  { %6971 = vrcp.f32 %v3177_v52 }
 0x999   :  { %v3175_v56 = vpop.xlane.xlu0 %3174  ;;  %v6960_v10 = vpop.eup %6959 }
 0x99a   :  { %6973 = vrcp.f32 %v3175_v56  ;;  %v3211_v55 = vmul.f32 %v6960_v10, %v9059_v59  ;;  %v2865_v56 = vmul.f32 %v10365_v1, %v7991_v35  ;;  %v2863_v35 = vmul.f32 %v10365_v1, %v10295_v61 }
 0x99b   :  { %v6962_v11 = vpop.eup %6961  ;;  %v3181_v44 = vpop.xlane.xlu1 %3180 }
 0x99c   :  { %v3210_v12 = vmul.f32 %v6962_v11, %v9063_v13  ;;  %6975 = vrcp.f32 %v3181_v44 }
 0x99d   :  { %v3179_v15 = vpop.xlane.xlu0 %3178  ;;  %v6964_v16 = vpop.eup %6963 }
 0x99e   :  { %6977 = vrcp.f32 %v3179_v15  ;;  %6492 = vmatprep.mubr.f32.mxu1 %v3210_v12  ;;  %v3213_v59 = vmul.f32 %v6964_v16, %v9067_v30 }
 0x99f   :  { %v6966_v21 = vpop.eup %6965  ;;  %v3185_v7 = vpop.xlane.xlu1 %3184  ;;  %6493 = vmatmul.mubr.f32.vlgmr.msra.gmra.mxu1 %v3211_v55 }
 0x9a0   :  { %6573 = vmatpush3.msra.mxu1 %v10366_v47  ;;  %v3212_v52 = vmul.f32 %v6966_v21, %v9071_v54  ;;  %6979 = vrcp.f32 %v3185_v7 }
 0x9a1   :  { %6574 = vmatprep.subr.mxu1 %v2866_v17  ;;  %v3183_v13 = vpop.xlane.xlu0 %3182  ;;  %v6968_v10 = vpop.eup %6967 }
 0x9a2   :  { %6575 = vmatpush3.msra.mxu1 %v2866_v17  ;;  %6981 = vrcp.f32 %v3183_v13  ;;  %6495 = vmatprep.mubr.f32.mxu1 %v3212_v52  ;;  %v3215_v30 = vmul.f32 %v6968_v10, %v9075_v31  ;;  %v2861_v31 = vmul.f32 %v10365_v1, %v10299_v51 }
 0x9a3   :  { %v6970_v11 = vpop.eup %6969  ;;  %6576 = vmatprep.subr.mxu1 %v2865_v56  ;;  %v3189_v44 = vpop.xlane.xlu1 %3188  ;;  %6496 = vmatmul.mubr.f32.gmra.mxu1 %v3213_v59 }
 0x9a4   :  { %6577 = vmatpush3.msra.mxu1 %v2865_v56  ;;  %v3214_v54 = vmul.f32 %v6970_v11, %v9079_v5  ;;  %6983 = vrcp.f32 %v3189_v44  ;;  %v10369_v44 = vld [vmem:[#allocation42_spill] sm:$0xff] }
 0x9a5   :  { %6578 = vmatprep.subr.mxu1 %v2864_v20  ;;  %v3187_v12 = vpop.xlane.xlu0 %3186  ;;  %v6972_v15 = vpop.eup %6971 }
 0x9a6   :  { %6579 = vmatpush3.msra.mxu1 %v2864_v20  ;;  %6985 = vrcp.f32 %v3187_v12  ;;  %6498 = vmatprep.mubr.f32.mxu1 %v3214_v54  ;;  %v3217_v21 = vmul.f32 %v6972_v15, %v9085_v39  ;;  %v2859_v39 = vmul.f32 %v10365_v1, %v10303_v6  ;;  %v2855_v20 = vmul.f32 %v10365_v1, %v10369_v44 }
 0x9a7   :  { %v6974_v55 = vpop.eup %6973  ;;  %6580 = vmatprep.subr.mxu1 %v2863_v35  ;;  %v3193_v16 = vpop.xlane.xlu1 %3192  ;;  %6499 = vmatmul.mubr.f32.gmra.mxu1 %v3215_v30  ;;  %6987 = vrcp.f32 %v9197_v57  ;;  %v2860_v57 = vmul.f32 %v10365_v1, %v10301_v14  ;;  %v10370_v30 = vld [vmem:[#allocation44_spill] sm:$0xff] }
 0x9a8   :  { %6581 = vmatpush3.msra.mxu1 %v2863_v35  ;;  %v3216_v5 = vmul.f32 %v6974_v55, %v9091_v26  ;;  %6989 = vrcp.f32 %v3193_v16 }
 0x9a9   :  { %6582 = vmatprep.subr.mxu1 %v2862_v60  ;;  %v3191_v61 = vpop.xlane.xlu0 %3190  ;;  %v6976_v7 = vpop.eup %6975 }
 0x9aa   :  { %6583 = vmatpush3.msra.mxu1 %v2862_v60  ;;  %6991 = vrcp.f32 %v3191_v61  ;;  %6501 = vmatprep.mubr.f32.mxu1 %v3216_v5  ;;  %v3219_v47 = vmul.f32 %v6976_v7, %v9096_v34  ;;  %v10367_v34 = vld [vmem:[#allocation38_spill] sm:$0xff]  ;;  %v10372_v61 = vld [vmem:[#allocation41_spill] sm:$0xff] }
 0x9ab   :  { %v6978_v17 = vpop.eup %6977  ;;  %6584 = vmatprep.subr.mxu1 %v2861_v31  ;;  %v2803_v25 = vpop.xlane.xlu1 %2802  ;;  %6502 = vmatmul.mubr.f32.gmra.mxu1 %v3217_v21  ;;  %6993 = vrcp.f32 %v9199_v3 }
 0x9ac   :  { %6585 = vmatpush3.msra.mxu1 %v2861_v31  ;;  %v3218_v26 = vmul.f32 %v6978_v17, %v9101_v29  ;;  %6995 = vrcp.f32 %v9201_v41  ;;  %v2858_v29 = vmul.f32 %v10365_v1, %v10305_v46  ;;  %v2857_v41 = vmul.f32 %v10365_v1, %v10367_v34 }
 0x9ad   :  { %6586 = vmatprep.subr.mxu1 %v2860_v57  ;;  %v1910_v51 = vpop.xlane.xlu0 %1909  ;;  %v6980_v52 = vpop.eup %6979 }
 0x9ae   :  { %6587 = vmatpush3.msra.mxu1 %v2860_v57  ;;  %6997 = vrcp.f32 %v1910_v51  ;;  %6504 = vmatprep.mubr.f32.mxu1 %v3218_v26  ;;  %v3221_v56 = vmul.f32 %v6980_v52, %v9105_v36  ;;  %v10374_v26 = vld [vmem:[#allocation43_spill] sm:$0xff] }
 0x9af   :  { %v6982_v13 = vpop.eup %6981  ;;  %6588 = vmatprep.subr.mxu1 %v2859_v39  ;;  %v2805_v14 = vpop.xlane.xlu1 %2804  ;;  %6505 = vmatmul.mubr.f32.gmra.mxu1 %v3219_v47  ;;  %6999 = vrcp.f32 %v9203_v63  ;;  %v10368_v63 = vld [vmem:[#allocation40_spill] sm:$0xff]  ;;  %v10375_v47 = vld [vmem:[#allocation45_spill] sm:$0xff] }
 0x9b0   :  { %6589 = vmatpush3.msra.mxu1 %v2859_v39  ;;  %v3220_v3 = vmul.f32 %v6982_v13, %v9109_v2  ;;  %7001 = vrcp.f32 %v9205_v9  ;;  %v2856_v2 = vmul.f32 %v10365_v1, %v10368_v63 }
 0x9b1   :  { %6590 = vmatprep.subr.mxu1 %v2858_v29  ;;  %v1912_v6 = vpop.xlane.xlu0 %1911  ;;  %v6984_v59 = vpop.eup %6983 }
 0x9b2   :  { %6591 = vmatpush3.msra.mxu1 %v2858_v29  ;;  %7003 = vrcp.f32 %v1912_v6  ;;  %6507 = vmatprep.mubr.f32.mxu1 %v3220_v3  ;;  %v3223_v54 = vmul.f32 %v6984_v59, %v9113_v24  ;;  %v10371_v24 = vld [vmem:[#allocation46_spill] sm:$0xff] }
 0x9b3   :  { %v6986_v10 = vpop.eup %6985  ;;  %6592 = vmatprep.subr.mxu1 %v2857_v41  ;;  %v2807_v46 = vpop.xlane.xlu1 %2806  ;;  %6508 = vmatmul.mubr.f32.gmra.mxu1 %v3221_v56  ;;  %7005 = vrcp.f32 %v9207_v50  ;;  %v2853_v16 = vmul.f32 %v10365_v1, %v10371_v24  ;;  %v10376_v3 = vld [vmem:[#allocation50_spill] sm:$0xff] }
 0x9b4   :  { %6593 = vmatpush3.msra.mxu1 %v2857_v41  ;;  %v3222_v9 = vmul.f32 %v6986_v10, %v9117_v48  ;;  %v6988_v11 = vpop.eup %6987  ;;  %7007 = vrcp.f32 %v9209_v4  ;;  %v2854_v48 = vmul.f32 %v10365_v1, %v10370_v30  ;;  %v10377_v41 = vld [vmem:[#allocation51_spill] sm:$0xff] }
 0x9b5   :  { %6594 = vmatprep.subr.mxu1 %v2856_v2  ;;  %v1914_v36 = vpop.xlane.xlu0 %1913  ;;  %v6990_v12 = vpop.eup %6989  ;;  %v2836_v31 = vmul.f32 %v6988_v11, %v10372_v61 }
 0x9b6   :  { %6595 = vmatpush3.msra.mxu1 %v2856_v2  ;;  %7009 = vrcp.f32 %v1914_v36  ;;  %6510 = vmatprep.mubr.f32.mxu1 %v3222_v9  ;;  %v3225_v60 = vmul.f32 %v6990_v12, %v9121_v37  ;;  %v10379_v36 = vld [vmem:[#allocation53_spill] sm:$0xff] }
 0x9b7   :  { %v6992_v35 = vpop.eup %6991  ;;  %6596 = vmatprep.subr.mxu1 %v2855_v20  ;;  %v2809_v50 = vpop.xlane.xlu1 %2808  ;;  %6511 = vmatmul.mubr.f32.gmra.mxu1 %v3223_v54  ;;  %7011 = vrcp.f32 %v2803_v25 }
 0x9b8   :  { %6597 = vmatpush3.msra.mxu1 %v2855_v20  ;;  %v3224_v4 = vmul.f32 %v6992_v35, %v9125_v58  ;;  %v6994_v15 = vpop.eup %6993  ;;  %7013 = vrcp.f32 %v2805_v14  ;;  %v10373_v58 = vld [vmem:[#allocation47_spill] sm:$0xff] }
 0x9b9   :  { %6598 = vmatprep.subr.mxu1 %v2854_v48  ;;  %v1916_v55 = vpop.xlane.xlu0 %1915  ;;  %v6996_v5 = vpop.eup %6995  ;;  %v2852_v17 = vmul.f32 %v10365_v1, %v10373_v58  ;;  %v2837_v51 = vmul.f32 %v6994_v15, %v10374_v26 }
 0x9ba   :  { %6599 = vmatpush3.msra.mxu1 %v2854_v48  ;;  %7015 = vrcp.f32 %v1916_v55  ;;  %6513 = vmatprep.mubr.f32.mxu1 %v3224_v4  ;;  %v2838_v52 = vmul.f32 %v6996_v5, %v10375_v47 }
 0x9bb   :  { %v6998_v21 = vpop.eup %6997  ;;  %6600 = vmatprep.subr.mxu1 %v2853_v16  ;;  %v2811_v7 = vpop.xlane.xlu1 %2810  ;;  %6514 = vmatmul.mubr.f32.gmra.mxu1 %v3225_v60  ;;  %7017 = vrcp.f32 %v2807_v46 }
 0x9bc   :  { %6601 = vmatpush3.msra.mxu1 %v2853_v16  ;;  %6604 = vmatprep.mubr.f32.mxu1 %v2836_v31  ;;  %v1950_v25 = vmul.f32 %v6998_v21, %v9133_v45  ;;  %v7000_v57 = vpop.eup %6999  ;;  %7019 = vrcp.f32 %v2809_v50 }
 0x9bd   :  { %6602 = vmatprep.subr.mxu1 %v2852_v17  ;;  %v1918_v37 = vpop.xlane.xlu0 %1917  ;;  %v7002_v39 = vpop.eup %7001  ;;  %v2839_v6 = vmul.f32 %v7000_v57, %v10376_v3 }
 0x9be   :  { %6603 = vmatpush3.msra.mxu1 %v2852_v17  ;;  %7021 = vrcp.f32 %v1918_v37  ;;  %6558 = vmatmul.mubr.f32.gmra.mxu0 %v1950_v25  ;;  %v2840_v56 = vmul.f32 %v7002_v39, %v10377_v41 }
 0x9bf   :  { %v7004_v13 = vpop.eup %7003  ;;  %v2813_v14 = vpop.xlane.xlu1 %2812  ;;  %6605 = vmatmul.mubr.f32.vlgmr.msra.gmra.mxu1 %v2837_v51  ;;  %7023 = vrcp.f32 %v2811_v7 }
 0x9c0   :  { %6607 = vmatprep.mubr.f32.mxu1 %v2838_v52  ;;  %v1951_v1 = vmul.f32 %v7004_v13, %v9141_v27  ;;  %v7006_v45 = vpop.eup %7005  ;;  %7025 = vrcp.f32 %v2813_v14  ;;  %v10378_v27 = vld [vmem:[#allocation52_spill] sm:$0xff] }
 0x9c1   :  { %v1920_v29 = vpop.xlane.xlu0 %1919  ;;  %v7008_v34 = vpop.eup %7007  ;;  %v2841_v9 = vmul.f32 %v7006_v45, %v10378_v27 }
 0x9c2   :  { %7027 = vrcp.f32 %v1920_v29  ;;  %6560 = vmatprep.mubr.f32.mxu0 %v1951_v1  ;;  %v2842_v44 = vmul.f32 %v7008_v34, %v10379_v36 }
 0x9c3   :  { %v7010_v59 = vpop.eup %7009  ;;  %v2815_v10 = vpop.xlane.xlu1 %2814  ;;  %6608 = vmatmul.mubr.f32.gmra.mxu1 %v2839_v6 }
 0x9c4   :  { %6610 = vmatprep.mubr.f32.mxu1 %v2840_v56  ;;  %v1952_v46 = vmul.f32 %v7010_v59, %v9149_v53  ;;  %v7012_v63 = vpop.eup %7011  ;;  %7029 = vrcp.f32 %v2815_v10 }
 0x9c5   :  { %v1922_v2 = vpop.xlane.xlu0 %1921  ;;  %v7014_v11 = vpop.eup %7013  ;;  %v2843_v53 = vmul.f32 %v7012_v63, %v9129_v8 }
 0x9c6   :  { %7031 = vrcp.f32 %v1922_v2  ;;  %6561 = vmatmul.mubr.f32.gmra.mxu0 %v1952_v46  ;;  %v2844_v48 = vmul.f32 %v7014_v11, %v9137_v42  ;;  %v10380_v11 = vld [vmem:[#allocation24_spill] sm:$0xff] }
 0x9c7   :  { %v7016_v20 = vpop.eup %7015  ;;  %v2817_v54 = vpop.xlane.xlu1 %2816  ;;  %6611 = vmatmul.mubr.f32.gmra.mxu1 %v2841_v9 }
 0x9c8   :  { %7033 = vrcp.f32 %v2817_v54  ;;  %6613 = vmatprep.mubr.f32.mxu1 %v2842_v44  ;;  %v1953_v12 = vmul.f32 %v7016_v20, %v9157_v18  ;;  %v7018_v35 = vpop.eup %7017  ;;  %v10381_v20 = vld [vmem:[#allocation23_spill] sm:$0xff] }
 0x9c9   :  { %v1924_v50 = vpop.xlane.xlu0 %1923  ;;  %v7020_v30 = vpop.eup %7019  ;;  %v2845_v18 = vmul.f32 %v7018_v35, %v9145_v62 }
 0x9ca   :  { %7035 = vrcp.f32 %v1924_v50  ;;  %6563 = vmatprep.mubr.f32.mxu0 %v1953_v12  ;;  %v2846_v8 = vmul.f32 %v7020_v30, %v9153_v19 }
 0x9cb   :  { %v7022_v4 = vpop.eup %7021  ;;  %v2819_v15 = vpop.xlane.xlu1 %2818  ;;  %6614 = vmatmul.mubr.f32.gmra.mxu1 %v2843_v53 }
 0x9cc   :  { %7037 = vrcp.f32 %v2819_v15  ;;  %6616 = vmatprep.mubr.f32.mxu1 %v2844_v48  ;;  %v1954_v55 = vmul.f32 %v7022_v4, %v9163_v28  ;;  %v7024_v24 = vpop.eup %7023  ;;  %v10382_v4 = vld [vmem:[#allocation26_spill] sm:$0xff] }
 0x9cd   :  { %v1926_v16 = vpop.xlane.xlu0 %1925  ;;  %v7026_v60 = vpop.eup %7025  ;;  %v2847_v61 = vmul.f32 %v7024_v24, %v9160_v49  ;;  %v10383_v24 = vld [vmem:[#allocation25_spill] sm:$0xff] }
 0x9ce   :  { %7039 = vrcp.f32 %v1926_v16  ;;  %6564 = vmatmul.mubr.f32.gmra.mxu0 %v1954_v55  ;;  %v2848_v28 = vmul.f32 %v7026_v60, %v9166_v23 }
 0x9cf   :  { %v7028_v5 = vpop.eup %7027  ;;  %6617 = vmatmul.mubr.f32.gmra.mxu1 %v2845_v18 }
 0x9d0   :  { %6619 = vmatprep.mubr.f32.mxu1 %v2846_v8  ;;  %v1955_v42 = vmul.f32 %v7028_v5, %v9169_v22 }
 0x9d1   :  { %v7030_v31 = vpop.eup %7029 }
 0x9d2   :  { %6566 = vmatprep.mubr.f32.mxu0 %v1955_v42  ;;  %v2849_v58 = vmul.f32 %v7030_v31, %v9172_v38  ;;  %v3696_v38 = vld [vmem:[%s10113_s2 + $0x78] sm:$0xff] }
 0x9d3   :  { %v7032_v21 = vpop.eup %7031  ;;  %6620 = vmatmul.mubr.f32.gmra.mxu1 %v2847_v61  ;;  %6628 = vmatprep.subr.mxu0 %v3696_v38 }
 0x9d4   :  { %6622 = vmatprep.mubr.f32.mxu1 %v2848_v28  ;;  %v1956_v62 = vmul.f32 %v7032_v21, %v9175_v33  ;;  %6629 = vmatpush3.msra.mxu0 %v3696_v38  ;;  %v3695_v33 = vld [vmem:[%s10113_s2 + $0x70] sm:$0xff] }
 0x9d5   :  { %v7034_v7 = vpop.eup %7033  ;;  %6630 = vmatprep.subr.mxu0 %v3695_v33  ;;  %v10384_v28 = vld [vmem:[#allocation28_spill] sm:$0xff] }
 0x9d6   :  { %6567 = vmatmul.mubr.f32.gmra.mxu0 %v1956_v62  ;;  %v2850_v19 = vmul.f32 %v7034_v7, %v9178_v32  ;;  %v3694_v32 = vld [vmem:[%s10113_s2 + $0x68] sm:$0xff] }
 0x9d7   :  { %v7036_v17 = vpop.eup %7035  ;;  %6623 = vmatmul.mubr.f32.gmra.mxu1 %v2849_v58  ;;  %6631 = vmatpush3.msra.mxu0 %v3695_v33  ;;  %v10385_v7 = vld [vmem:[#allocation27_spill] sm:$0xff] }
 0x9d8   :  { %6625 = vmatprep.mubr.f32.mxu1 %v2850_v19  ;;  %v1957_v49 = vmul.f32 %v7036_v17, %v9181_v43  ;;  %6632 = vmatprep.subr.mxu0 %v3694_v32  ;;  %v3693_v43 = vld [vmem:[%s10113_s2 + $0x60] sm:$0xff] }
 0x9d9   :  { %v7038_v22 = vpop.eup %7037  ;;  %6633 = vmatpush3.msra.mxu0 %v3694_v32  ;;  %v10387_v32 = vld [vmem:[#allocation29_spill] sm:$0xff] }
 0x9da   :  { %6569 = vmatprep.mubr.f32.mxu0 %v1957_v49  ;;  %v2851_v23 = vmul.f32 %v7038_v22, %v9186_v40  ;;  %6634 = vmatprep.subr.mxu0 %v3693_v43 }
 0x9db   :  { %v7040_v25 = vpop.eup %7039  ;;  %6635 = vmatpush3.msra.mxu0 %v3693_v43 }
 0x9dc   :  { %6626 = vmatmul.mubr.f32.gmra.mxu1 %v2851_v23  ;;  %v1958_v57 = vmul.f32 %v7040_v25, %v9188_v0 }
 0x9de   :  { %6570 = vmatmul.mubr.f32.gmra.mxu0 %v1958_v57  ;;  %v10386_v57 = vld [vmem:[#allocation30_spill] sm:$0xff] }
 0xa02   :  { %v6550_v14 = vpop.f32.mrf.mxu0 }
 0xa03   :  { %v3459_v54 = vadd.f32 %v6550_v14, %v10381_v20  ;;  %v10388_v14 = vld [vmem:[#allocation32_spill] sm:$0xff] }
 0xa04   :  { %v3453_v29 = vpop.f32.mrf.mxu0 }
 0xa05   :  { %v3454_v36 = vadd.f32 %v3453_v29, %v10380_v11  ;;  %v10390_v11 = vld [vmem:[#allocation34_spill] sm:$0xff] }
 0xa0a   :  { %v6553_v6 = vpop.f32.mrf.mxu0 }
 0xa0b   :  { %v3469_v16 = vadd.f32 %v6553_v6, %v10383_v24 }
 0xa0c   :  { %v3463_v56 = vpop.f32.mrf.mxu0 }
 0xa0d   :  { %v3464_v15 = vadd.f32 %v3463_v56, %v10382_v4 }
 0xa12   :  { %v6556_v10 = vpop.f32.mrf.mxu0 }
 0xa13   :  { %v3479_v58 = vadd.f32 %v6556_v10, %v10385_v7 }
 0xa14   :  { %v3473_v2 = vpop.f32.mrf.mxu0 }
 0xa15   :  { %v3474_v21 = vadd.f32 %v3473_v2, %v10384_v28 }
 0xa5f   :  { %v6494_v40 = vpop.f32.mrf.mxu1 }
 0xa61   :  { %v3308_v0 = vpop.f32.mrf.mxu1 }
 0xa63   :  { %v6497_v37 = vpop.f32.mrf.mxu1 }
 0xa65   :  { %v3318_v26 = vpop.f32.mrf.mxu1 }
 0xa67   :  { %v6500_v51 = vpop.f32.mrf.mxu1 }
 0xa69   :  { %v3328_v39 = vpop.f32.mrf.mxu1 }
 0xa6b   :  { %v6503_v47 = vpop.f32.mrf.mxu1 }
 0xa6d   :  { %v3338_v52 = vpop.f32.mrf.mxu1 }
 0xa6f   :  { %v6506_v13 = vpop.f32.mrf.mxu1 }
 0xa71   :  { %v3348_v1 = vpop.f32.mrf.mxu1 }
 0xa73   :  { %v9302_v45 = vpop.f32.mrf.mxu1 }
 0xa75   :  { %v9304_v3 = vpop.f32.mrf.mxu1 }
 0xa77   :  { %v9306_v34 = vpop.f32.mrf.mxu1 }
 0xa79   :  { %v9308_v41 = vpop.f32.mrf.mxu1 }
 0xa7b   :  { %v9310_v59 = vpop.f32.mrf.mxu1 }
 0xa7d   :  { %v9312_v46 = vpop.f32.mrf.mxu1 }
 0xa7e   :  { %v6559_v12 = vpop.f32.mrf.mxu0 }
 0xa7f   :  { %v6606_v63 = vpop.f32.mrf.mxu1  ;;  %v3489_v43 = vadd.f32 %v6559_v12, %v10387_v32 }
 0xa80   :  { %v3604_v27 = vadd.f32 %v6606_v63, %v6494_v40  ;;  %v3483_v18 = vpop.f32.mrf.mxu0 }
 0xa81   :  { %v3598_v9 = vpop.f32.mrf.mxu1  ;;  %v3484_v38 = vadd.f32 %v3483_v18, %v10386_v57 }
 0xa82   :  { %v3599_v44 = vadd.f32 %v3598_v9, %v3308_v0  ;;  %v3678_v53 = vadd.f32 %v3604_v27, %v3459_v54 }
 0xa83   :  { %v6609_v35 = vpop.f32.mrf.mxu1 }
 0xa84   :  { %v3677_v50 = vadd.f32 %v3599_v44, %v3454_v36  ;;  %v3614_v30 = vadd.f32 %v6609_v35, %v6497_v37 }
 0xa85   :  { %v3608_v48 = vpop.f32.mrf.mxu1 }
 0xa86   :  { %v3609_v55 = vadd.f32 %v3608_v48, %v3318_v26  ;;  %6636 = vmatprep.mubr.msk.f32.mxu0 %vm733_vm3, %v3677_v50  ;;  %v3680_v5 = vadd.f32 %v3614_v30, %v3469_v16  ;;  %v6562_v42 = vpop.f32.mrf.mxu0  ;;  %v10393_v48 = vld [vmem:[#allocation36_spill] sm:$0xff] }
 0xa87   :  { %v6612_v60 = vpop.f32.mrf.mxu1  ;;  %6637 = vmatmul.mubr.msk.f32.vlgmr.msra.gmra.mxu0 %vm733_vm3, %v3678_v53  ;;  %v10392_v53 = vld [vmem:[#allocation35_spill] sm:$0xff] }
 0xa88   :  { %v3679_v8 = vadd.f32 %v3609_v55, %v3464_v15  ;;  %v3624_v61 = vadd.f32 %v6612_v60, %v6500_v51  ;;  %v3493_v22 = vpop.f32.mrf.mxu0 }
 0xa89   :  { %v3618_v31 = vpop.f32.mrf.mxu1  ;;  %v3494_v29 = vadd.f32 %v3493_v22, %v10388_v14 }
 0xa8a   :  { %v3619_v62 = vadd.f32 %v3618_v31, %v3328_v39  ;;  %6639 = vmatprep.mubr.msk.f32.mxu0 %vm733_vm3, %v3679_v8  ;;  %v3682_v49 = vadd.f32 %v3624_v61, %v3479_v58  ;;  %v10394_v8 = vld [vmem:[#allocation37_spill] sm:$0xff]  ;;  %v10395_v61 = vld [vmem:[#allocation39_spill] sm:$0xff] }
 0xa8b   :  { %v6615_v19 = vpop.f32.mrf.mxu1  ;;  %6640 = vmatmul.mubr.msk.f32.gmra.mxu0 %vm733_vm3, %v3680_v5  ;;  %v9356_v58 = vld [vmem:[%s10113_s2 + $0xe0] sm:$0xff] }
 0xa8c   :  { %v3681_v17 = vadd.f32 %v3619_v62, %v3474_v21  ;;  %v3634_v23 = vadd.f32 %v6615_v19, %v6503_v47  ;;  %v10389_v47 = vld [vmem:[#allocation31_spill] sm:$0xff]  ;;  %v10396_v62 = vld [vmem:[#allocation6_spill] sm:$0xff] }
 0xa8d   :  { %v3628_v25 = vpop.f32.mrf.mxu1  ;;  %v3499_v56 = vadd.f32 %v6562_v42, %v10389_v47  ;;  %v3908_v7 = vsub.s32 6, %v10396_v62 }
 0xa8e   :  { %v3629_v33 = vadd.f32 %v3628_v25, %v3338_v52  ;;  %6642 = vmatprep.mubr.msk.f32.mxu0 %vm733_vm3, %v3681_v17  ;;  %v6565_v40 = vpop.f32.mrf.mxu0  ;;  %v3684_v26 = vadd.f32 %v3634_v23, %v3489_v43  ;;  %v10398_v23 = vld [vmem:[#allocation8_spill] sm:$0xff] }
 0xa8f   :  { %v6618_v0 = vpop.f32.mrf.mxu1  ;;  %6643 = vmatmul.mubr.msk.f32.gmra.mxu0 %vm733_vm3, %v3682_v49 }
 0xa90   :  { %v3683_v37 = vadd.f32 %v3629_v33, %v3484_v38  ;;  %v3644_v51 = vadd.f32 %v6618_v0, %v6506_v13  ;;  %v3503_v52 = vpop.f32.mrf.mxu0  ;;  %v10399_v33 = vld [vmem:[#allocation9_spill] sm:$0xff] }
 0xa91   :  { %v3638_v39 = vpop.f32.mrf.mxu1  ;;  %v3504_v36 = vadd.f32 %v3503_v52, %v10390_v11  ;;  %v10403_v11 = vld [vmem:[#allocation14_spill] sm:$0xff] }
 0xa92   :  { %v3639_v6 = vadd.f32 %v3638_v39, %v3348_v1  ;;  %6645 = vmatprep.mubr.msk.f32.mxu0 %vm733_vm3, %v3683_v37  ;;  %v3686_v2 = vadd.f32 %v3644_v51, %v3499_v56  ;;  %v10391_v1 = vld [vmem:[#allocation33_spill] sm:$0xff]  ;;  %v10400_v37 = vld [vmem:[#allocation10_spill] sm:$0xff] }
 0xa93   :  { %v6621_v10 = vpop.f32.mrf.mxu1  ;;  %6646 = vmatmul.mubr.msk.f32.gmra.mxu0 %vm733_vm3, %v3684_v26  ;;  %v3509_v20 = vadd.f32 %v6565_v40, %v10391_v1 }
 0xa94   :  { %v3685_v63 = vadd.f32 %v3639_v6, %v3494_v29  ;;  %v3654_v27 = vadd.f32 %v6621_v10, %v9302_v45  ;;  %v10401_v29 = vld [vmem:[#allocation12_spill] sm:$0xff]  ;;  %v10402_v10 = vld [vmem:[#allocation11_spill] sm:$0xff] }
 0xa95   :  { %v3648_v9 = vpop.f32.mrf.mxu1 }
 0xa96   :  { %v3649_v13 = vadd.f32 %v3648_v9, %v9304_v3  ;;  %v6568_v44 = vpop.f32.mrf.mxu0  ;;  %6648 = vmatprep.mubr.msk.f32.mxu0 %vm733_vm3, %v3685_v63  ;;  %v3688_v50 = vadd.f32 %v3654_v27, %v3509_v20  ;;  %v10404_v20 = vld [vmem:[#allocation13_spill] sm:$0xff] }
 0xa97   :  { %v6624_v54 = vpop.f32.mrf.mxu1  ;;  %6649 = vmatmul.mubr.msk.f32.gmra.mxu0 %vm733_vm3, %v3686_v2  ;;  %v3519_v30 = vadd.f32 %v6568_v44, %v10392_v53  ;;  %v10405_v53 = vld [vmem:[#allocation16_spill] sm:$0xff] }
 0xa98   :  { %v3687_v12 = vadd.f32 %v3649_v13, %v3504_v36  ;;  %v3513_v35 = vpop.f32.mrf.mxu0  ;;  %v3664_v45 = vadd.f32 %v6624_v54, %v9306_v34 }
 0xa99   :  { %v3514_v4 = vadd.f32 %v3513_v35, %v10393_v48  ;;  %v3658_v15 = vpop.f32.mrf.mxu1 }
 0xa9a   :  { %v3659_v3 = vadd.f32 %v3658_v15, %v9308_v41  ;;  %6651 = vmatprep.mubr.msk.f32.mxu0 %vm733_vm3, %v3687_v12  ;;  %v3690_v16 = vadd.f32 %v3664_v45, %v3519_v30  ;;  %v10406_v15 = vld [vmem:[#allocation15_spill] sm:$0xff] }
 0xa9b   :  { %6652 = vmatmul.mubr.msk.f32.gmra.mxu0 %vm733_vm3, %v3688_v50 }
 0xa9c   :  { %v3689_v55 = vadd.f32 %v3659_v3, %v3514_v4  ;;  %v6627_v24 = vpop.f32.mrf.mxu1 }
 0xa9d   :  { %v3674_v31 = vadd.f32 %v6627_v24, %v9310_v59  ;;  %v10397_v59 = vld [vmem:[#allocation7_spill] sm:$0xff] }
 0xa9e   :  { %v6571_v18 = vpop.f32.mrf.mxu0  ;;  %v3668_v60 = vpop.f32.mrf.mxu1  ;;  %6654 = vmatprep.mubr.msk.f32.mxu0 %vm733_vm3, %v3689_v55 }
 0xa9f   :  { %6655 = vmatmul.mubr.msk.f32.gmra.mxu0 %vm733_vm3, %v3690_v16  ;;  %v3529_v34 = vadd.f32 %v6571_v18, %v10394_v8  ;;  %v3669_v42 = vadd.f32 %v3668_v60, %v9312_v46  ;;  %v9361_v46 = vrot.slane %v9356_v58, %v3908_v7  ;;  %v10407_v18 = vld [vmem:[#allocation17_spill] sm:$0xff] }
 0xaa0   :  { %v3523_v5 = vpop.f32.mrf.mxu0 }
 0xaa1   :  { %v3524_v41 = vadd.f32 %v3523_v5, %v10395_v61  ;;  %v3692_v21 = vadd.f32 %v3674_v31, %v3529_v34 }
 0xaa3   :  { %v3691_v28 = vadd.f32 %v3669_v42, %v3524_v41  ;;  %v10408_v42 = vld [vmem:[#allocation19_spill] sm:$0xff] }
 0xaa5   :  { %6657 = vmatprep.mubr.msk.f32.mxu0 %vm733_vm3, %v3691_v28 }
 0xaa6   :  { %6658 = vmatmul.mubr.msk.f32.gmra.mxu0 %vm733_vm3, %v3692_v21  ;;  %v10409_v21 = vld [vmem:[#allocation18_spill] sm:$0xff] }
 0xb47   :  { %v6638_v19 = vpop.f32.mrf.mxu0 }
 0xb48   :  { %v3891_v17 = vadd.f32 %v6638_v19, %v10397_v59 }
 0xb49   :  { %v3811_v49 = vpop.f32.mrf.mxu0 }
 0xb4a   :  { %v9365_v22 = vadd.f32 %v9361_v46, %v3891_v17  ;;  %v3890_v25 = vadd.f32 %v3811_v49, %v10398_v23  ;;  %v10410_v23 = vld [vmem:[#allocation20_spill] sm:$0xff] }
 0xb4b   :  { %v6641_v57 = vpop.f32.mrf.mxu0 }
 0xb4c   :  { %v9369_v38 = vadd.f32 %v9361_v46, %v3890_v25  ;;  %v3893_v32 = vadd.f32 %v6641_v57, %v10399_v33  ;;  %v3929_v43 = vsel %vm733_vm3, %v9365_v22, 0.0 }
 0xb4d   :  { %3930 = vadd.xlane.f32.xlu1 %v3929_v43  ;;  %v3821_v40 = vpop.f32.mrf.mxu0 }
 0xb4e   :  { %v9375_v0 = vadd.f32 %v9361_v46, %v3893_v32  ;;  %v3892_v26 = vadd.f32 %v3821_v40, %v10400_v37  ;;  %v3926_v51 = vsel %vm733_vm3, %v9369_v38, 0.0  ;;  %v10411_v37 = vld [vmem:[#allocation21_spill] sm:$0xff] }
 0xb4f   :  { %3927 = vadd.xlane.f32.xlu0 %v3926_v51  ;;  %v6644_v39 = vpop.f32.mrf.mxu0 }
 0xb50   :  { %v9381_v14 = vadd.f32 %v9361_v46, %v3892_v26  ;;  %v3895_v6 = vadd.f32 %v6644_v39, %v10401_v29  ;;  %v3935_v47 = vsel %vm733_vm3, %v9375_v0, 0.0  ;;  %v10412_v29 = vld [vmem:[#allocation22_spill] sm:$0xff] }
 0xb51   :  { %3936 = vadd.xlane.f32.xlu1 %v3935_v47  ;;  %v3831_v56 = vpop.f32.mrf.mxu0 }
 0xb52   :  { %v9387_v52 = vadd.f32 %v9361_v46, %v3895_v6  ;;  %v3894_v63 = vadd.f32 %v3831_v56, %v10402_v10  ;;  %v3932_v2 = vsel %vm733_vm3, %v9381_v14, 0.0 }
 0xb53   :  { %3933 = vadd.xlane.f32.xlu0 %v3932_v2  ;;  %v6647_v27 = vpop.f32.mrf.mxu0 }
 0xb54   :  { %v9393_v9 = vadd.f32 %v9361_v46, %v3894_v63  ;;  %v3897_v36 = vadd.f32 %v6647_v27, %v10403_v11  ;;  %v3941_v13 = vsel %vm733_vm3, %v9387_v52, 0.0  ;;  %v4177_v63 = vld [vmem:[%s10113_s2 + $0x98] sm:$0xff] }
 0xb55   :  { %3942 = vadd.xlane.f32.xlu1 %v3941_v13  ;;  %v3841_v44 = vpop.f32.mrf.mxu0  ;;  %6660 = vmatprep.subr.mxu1 %v4177_v63 }
 0xb56   :  { %v9399_v1 = vadd.f32 %v9361_v46, %v3897_v36  ;;  %v3896_v54 = vadd.f32 %v3841_v44, %v10404_v20  ;;  %v3938_v12 = vsel %vm733_vm3, %v9393_v9, 0.0  ;;  %6661 = vmatpush3.msra.mxu1 %v4177_v63 }
 0xb57   :  { %3939 = vadd.xlane.f32.xlu0 %v3938_v12  ;;  %v6650_v35 = vpop.f32.mrf.mxu0 }
 0xb58   :  { %v9405_v50 = vadd.f32 %v9361_v46, %v3896_v54  ;;  %v3899_v30 = vadd.f32 %v6650_v35, %v10405_v53  ;;  %v3947_v45 = vsel %vm733_vm3, %v9399_v1, 0.0 }
 0xb59   :  { %3948 = vadd.xlane.f32.xlu1 %v3947_v45  ;;  %v3851_v48 = vpop.f32.mrf.mxu0 }
 0xb5a   :  { %v9411_v4 = vadd.f32 %v9361_v46, %v3899_v30  ;;  %v3898_v3 = vadd.f32 %v3851_v48, %v10406_v15  ;;  %v3944_v55 = vsel %vm733_vm3, %v9405_v50, 0.0 }
 0xb5b   :  { %3945 = vadd.xlane.f32.xlu0 %v3944_v55  ;;  %v6653_v24 = vpop.f32.mrf.mxu0 }
 0xb5c   :  { %v9417_v16 = vadd.f32 %v9361_v46, %v3898_v3  ;;  %v3901_v60 = vadd.f32 %v6653_v24, %v10407_v18  ;;  %v3953_v8 = vsel %vm733_vm3, %v9411_v4, 0.0 }
 0xb5d   :  { %3954 = vadd.xlane.f32.xlu1 %v3953_v8  ;;  %v3861_v34 = vpop.f32.mrf.mxu0 }
 0xb5e   :  { %v9423_v5 = vadd.f32 %v9361_v46, %v3901_v60  ;;  %v3900_v61 = vadd.f32 %v3861_v34, %v10408_v42  ;;  %v3950_v41 = vsel %vm733_vm3, %v9417_v16, 0.0 }
 0xb5f   :  { %3951 = vadd.xlane.f32.xlu0 %v3950_v41  ;;  %v6656_v31 = vpop.f32.mrf.mxu0 }
 0xb60   :  { %v9429_v28 = vadd.f32 %v9361_v46, %v3900_v61  ;;  %v3903_v19 = vadd.f32 %v6656_v31, %v10409_v21  ;;  %v3959_v59 = vsel %vm733_vm3, %v9423_v5, 0.0 }
 0xb61   :  { %3960 = vadd.xlane.f32.xlu1 %v3959_v59  ;;  %v3871_v17 = vpop.f32.mrf.mxu0 }
 0xb62   :  { %v9435_v49 = vadd.f32 %v9361_v46, %v3903_v19  ;;  %v3902_v25 = vadd.f32 %v3871_v17, %v10410_v23  ;;  %v3956_v57 = vsel %vm733_vm3, %v9429_v28, 0.0 }
 0xb63   :  { %3957 = vadd.xlane.f32.xlu0 %v3956_v57 }
 0xb64   :  { %v9441_v33 = vadd.f32 %v9361_v46, %v3902_v25  ;;  %v3965_v32 = vsel %vm733_vm3, %v9435_v49, 0.0 }
 0xb65   :  { %3966 = vadd.xlane.f32.xlu1 %v3965_v32 }
 0xb66   :  { %v6659_v43 = vpop.f32.mrf.mxu0  ;;  %v3962_v40 = vsel %vm733_vm3, %v9441_v33, 0.0 }
 0xb67   :  { %v3905_v26 = vadd.f32 %v6659_v43, %v10411_v37  ;;  %3963 = vadd.xlane.f32.xlu0 %v3962_v40 }
 0xb68   :  { %v3881_v51 = vpop.f32.mrf.mxu0 }
 0xb69   :  { %v9449_v39 = vadd.f32 %v9361_v46, %v3905_v26  ;;  %v3904_v6 = vadd.f32 %v3881_v51, %v10412_v29 }
 0xb6b   :  { %v9453_v47 = vadd.f32 %v9361_v46, %v3904_v6  ;;  %v3971_v56 = vsel %vm733_vm3, %v9449_v39, 0.0 }
 0xb6c   :  { %3972 = vadd.xlane.f32.xlu1 %v3971_v56 }
 0xb6d   :  { %v3968_v10 = vsel %vm733_vm3, %v9453_v47, 0.0 }
 0xb6e   :  { %3969 = vadd.xlane.f32.xlu0 %v3968_v10 }
 0xbd6   :  { %v3931_v2 = vpop.xlane.xlu1 %3930 }
 0xbd7   :  { %v3975_v27 = vmul.f32 0.03125, %v3931_v2 }
 0xbd8   :  { %v3928_v11 = vpop.xlane.xlu0 %3927 }
 0xbd9   :  { %v9463_v46 = vsub.f32 %v9365_v22, %v3975_v27  ;;  %v3974_v36 = vmul.f32 0.03125, %v3928_v11 }
 0xbda   :  { %v3937_v13 = vpop.xlane.xlu1 %3936 }
 0xbdb   :  { %v9466_v44 = vsub.f32 %v9369_v38, %v3974_v36  ;;  %v3977_v20 = vmul.f32 0.03125, %v3937_v13  ;;  %v4007_v54 = vmul.f32 %v9463_v46, %v9463_v46 }
 0xbdc   :  { %v3934_v12 = vpop.xlane.xlu0 %3933 }
 0xbdd   :  { %v9471_v35 = vsub.f32 %v9375_v0, %v3977_v20  ;;  %v3976_v53 = vmul.f32 0.03125, %v3934_v12  ;;  %v4025_v30 = vsel %vm733_vm3, %v4007_v54, 0.0  ;;  %v4006_v45 = vmul.f32 %v9466_v44, %v9466_v44 }
 0xbde   :  { %v3943_v48 = vpop.xlane.xlu1 %3942  ;;  %4026 = vadd.xlane.f32.xlu1 %v4025_v30 }
 0xbdf   :  { %v9477_v15 = vsub.f32 %v9381_v14, %v3976_v53  ;;  %v3979_v3 = vmul.f32 0.03125, %v3943_v48  ;;  %v4022_v55 = vsel %vm733_vm3, %v4006_v45, 0.0  ;;  %v4009_v24 = vmul.f32 %v9471_v35, %v9471_v35 }
 0xbe0   :  { %v3940_v18 = vpop.xlane.xlu0 %3939  ;;  %4023 = vadd.xlane.f32.xlu0 %v4022_v55 }
 0xbe1   :  { %v9483_v60 = vsub.f32 %v9387_v52, %v3979_v3  ;;  %v3978_v8 = vmul.f32 0.03125, %v3940_v18  ;;  %v4031_v34 = vsel %vm733_vm3, %v4009_v24, 0.0  ;;  %v4008_v42 = vmul.f32 %v9477_v15, %v9477_v15 }
 0xbe2   :  { %v3949_v61 = vpop.xlane.xlu1 %3948  ;;  %4032 = vadd.xlane.f32.xlu1 %v4031_v34 }
 0xbe3   :  { %v9489_v41 = vsub.f32 %v9393_v9, %v3978_v8  ;;  %v3981_v31 = vmul.f32 0.03125, %v3949_v61  ;;  %v4028_v21 = vsel %vm733_vm3, %v4008_v42, 0.0  ;;  %v4011_v19 = vmul.f32 %v9483_v60, %v9483_v60 }
 0xbe4   :  { %v3946_v59 = vpop.xlane.xlu0 %3945  ;;  %4029 = vadd.xlane.f32.xlu0 %v4028_v21 }
 0xbe5   :  { %v9495_v17 = vsub.f32 %v9399_v1, %v3981_v31  ;;  %v3980_v23 = vmul.f32 0.03125, %v3946_v59  ;;  %v4037_v25 = vsel %vm733_vm3, %v4011_v19, 0.0  ;;  %v4010_v57 = vmul.f32 %v9489_v41, %v9489_v41 }
 0xbe6   :  { %v3955_v32 = vpop.xlane.xlu1 %3954  ;;  %4038 = vadd.xlane.f32.xlu1 %v4037_v25 }
 0xbe7   :  { %v9501_v43 = vsub.f32 %v9405_v50, %v3980_v23  ;;  %v3983_v40 = vmul.f32 0.03125, %v3955_v32  ;;  %v4034_v37 = vsel %vm733_vm3, %v4010_v57, 0.0  ;;  %v4013_v26 = vmul.f32 %v9495_v17, %v9495_v17 }
 0xbe8   :  { %v3952_v51 = vpop.xlane.xlu0 %3951  ;;  %4035 = vadd.xlane.f32.xlu0 %v4034_v37 }
 0xbe9   :  { %v9507_v29 = vsub.f32 %v9411_v4, %v3983_v40  ;;  %v3982_v6 = vmul.f32 0.03125, %v3952_v51  ;;  %v4043_v56 = vsel %vm733_vm3, %v4013_v26, 0.0  ;;  %v4012_v10 = vmul.f32 %v9501_v43, %v9501_v43 }
 0xbea   :  { %v3961_v63 = vpop.xlane.xlu1 %3960  ;;  %4044 = vadd.xlane.f32.xlu1 %v4043_v56 }
 0xbeb   :  { %v9513_v2 = vsub.f32 %v9417_v16, %v3982_v6  ;;  %v3985_v27 = vmul.f32 0.03125, %v3961_v63  ;;  %v4040_v11 = vsel %vm733_vm3, %v4012_v10, 0.0  ;;  %v4015_v36 = vmul.f32 %v9507_v29, %v9507_v29  ;;  %v4176_v10 = vld [vmem:[%s10113_s2 + $0x90] sm:$0xff] }
 0xbec   :  { %v3958_v13 = vpop.xlane.xlu0 %3957  ;;  %4041 = vadd.xlane.f32.xlu0 %v4040_v11  ;;  %6662 = vmatprep.subr.mxu1 %v4176_v10  ;;  %v4174_v11 = vld [vmem:[%s10113_s2 + $0x80] sm:$0xff] }
 0xbed   :  { %v9519_v20 = vsub.f32 %v9423_v5, %v3985_v27  ;;  %v3984_v54 = vmul.f32 0.03125, %v3958_v13  ;;  %v4049_v12 = vsel %vm733_vm3, %v4015_v36, 0.0  ;;  %v4014_v53 = vmul.f32 %v9513_v2, %v9513_v2  ;;  %6663 = vmatpush3.msra.mxu1 %v4176_v10  ;;  %v4175_v27 = vld [vmem:[%s10113_s2 + $0x88] sm:$0xff]  ;;  %v4458_v36 = vld [vmem:[%s10113_s2 + $0xb8] sm:$0xff] }
 0xbee   :  { %v3967_v30 = vpop.xlane.xlu1 %3966  ;;  %4050 = vadd.xlane.f32.xlu1 %v4049_v12  ;;  %6664 = vmatprep.subr.mxu1 %v4175_v27 }
 0xbef   :  { %v9525_v45 = vsub.f32 %v9429_v28, %v3984_v54  ;;  %v3987_v48 = vmul.f32 0.03125, %v3967_v30  ;;  %v4046_v3 = vsel %vm733_vm3, %v4014_v53, 0.0  ;;  %v4017_v55 = vmul.f32 %v9519_v20, %v9519_v20  ;;  %6665 = vmatpush3.msra.mxu1 %v4175_v27  ;;  %6692 = vmatprep.subr.mxu0 %v4458_v36 }
 0xbf0   :  { %v3964_v24 = vpop.xlane.xlu0 %3963  ;;  %4047 = vadd.xlane.f32.xlu0 %v4046_v3  ;;  %6666 = vmatprep.subr.mxu1 %v4174_v11 }
 0xbf1   :  { %v9531_v18 = vsub.f32 %v9435_v49, %v3987_v48  ;;  %v3986_v8 = vmul.f32 0.03125, %v3964_v24  ;;  %v4055_v34 = vsel %vm733_vm3, %v4017_v55, 0.0  ;;  %v4016_v42 = vmul.f32 %v9525_v45, %v9525_v45  ;;  %6667 = vmatpush3.msra.mxu1 %v4174_v11  ;;  %6693 = vmatpush3.msra.mxu0 %v4458_v36 }
 0xbf2   :  { %4056 = vadd.xlane.f32.xlu1 %v4055_v34 }
 0xbf3   :  { %v9537_v61 = vsub.f32 %v9441_v33, %v3986_v8  ;;  %v4052_v31 = vsel %vm733_vm3, %v4016_v42, 0.0  ;;  %v4019_v21 = vmul.f32 %v9531_v18, %v9531_v18 }
 0xbf4   :  { %4053 = vadd.xlane.f32.xlu0 %v4052_v31 }
 0xbf5   :  { %v3973_v19 = vpop.xlane.xlu1 %3972  ;;  %v4061_v59 = vsel %vm733_vm3, %v4019_v21, 0.0  ;;  %v4018_v23 = vmul.f32 %v9537_v61, %v9537_v61 }
 0xbf6   :  { %v3989_v25 = vmul.f32 0.03125, %v3973_v19  ;;  %4062 = vadd.xlane.f32.xlu1 %v4061_v59 }
 0xbf7   :  { %v3970_v57 = vpop.xlane.xlu0 %3969  ;;  %v4058_v32 = vsel %vm733_vm3, %v4018_v23, 0.0 }
 0xbf8   :  { %v9547_v40 = vsub.f32 %v9449_v39, %v3989_v25  ;;  %v3988_v37 = vmul.f32 0.03125, %v3970_v57  ;;  %4059 = vadd.xlane.f32.xlu0 %v4058_v32 }
 0xbfa   :  { %v9550_v26 = vsub.f32 %v9453_v47, %v3988_v37  ;;  %v4021_v51 = vmul.f32 %v9547_v40, %v9547_v40  ;;  %v4136_v37 = vsub.s32 7, %v10396_v62 }
 0xbfc   :  { %v4067_v6 = vsel %vm733_vm3, %v4021_v51, 0.0  ;;  %v4020_v56 = vmul.f32 %v9550_v26, %v9550_v26  ;;  %v9572_v36 = vrot.slane %v9356_v58, %v4136_v37  ;;  %v10413_v58 = vsub.s32 0, %v10396_v62 }
 0xbfd   :  { %4068 = vadd.xlane.f32.xlu1 %v4067_v6 }
 0xbfe   :  { %v4064_v63 = vsel %vm733_vm3, %v4020_v56, 0.0 }
 0xbff   :  { %4065 = vadd.xlane.f32.xlu0 %v4064_v63 }
 0xc67   :  { %v4027_v13 = vpop.xlane.xlu1 %4026 }
 0xc68   :  { %v4071_v54 = vmul.f32 0.03125, %v4027_v13 }
 0xc69   :  { %v4024_v12 = vpop.xlane.xlu0 %4023 }
 0xc6a   :  { %v4087_v53 = vadd.f32 1e-05, %v4071_v54  ;;  %v4070_v30 = vmul.f32 0.03125, %v4024_v12  ;;  %v9577_v54 = vld [vmem:[%s10113_s2 + $0xe8] sm:$0xff] }
 0xc6b   :  { %v4033_v48 = vpop.xlane.xlu1 %4032 }
 0xc6c   :  { %7041 = vrsqrt.f32 %v4087_v53  ;;  %v4086_v3 = vadd.f32 1e-05, %v4070_v30  ;;  %v4073_v55 = vmul.f32 0.03125, %v4033_v48 }
 0xc6d   :  { %v4030_v24 = vpop.xlane.xlu0 %4029 }
 0xc6e   :  { %7043 = vrsqrt.f32 %v4086_v3  ;;  %v4089_v8 = vadd.f32 1e-05, %v4073_v55  ;;  %v4072_v34 = vmul.f32 0.03125, %v4030_v24 }
 0xc6f   :  { %v4039_v42 = vpop.xlane.xlu1 %4038 }
 0xc70   :  { %7045 = vrsqrt.f32 %v4089_v8  ;;  %v4088_v31 = vadd.f32 1e-05, %v4072_v34  ;;  %v4075_v21 = vmul.f32 0.03125, %v4039_v42  ;;  %v9583_v34 = vrot.slane %v9577_v54, %v10413_v58 }
 0xc71   :  { %v4036_v19 = vpop.xlane.xlu0 %4035 }
 0xc72   :  { %7047 = vrsqrt.f32 %v4088_v31  ;;  %v4091_v59 = vadd.f32 1e-05, %v4075_v21  ;;  %v4074_v23 = vmul.f32 0.03125, %v4036_v19 }
 0xc73   :  { %v4045_v25 = vpop.xlane.xlu1 %4044 }
 0xc74   :  { %7049 = vrsqrt.f32 %v4091_v59  ;;  %v4090_v57 = vadd.f32 1e-05, %v4074_v23  ;;  %v4077_v32 = vmul.f32 0.03125, %v4045_v25 }
 0xc75   :  { %v4042_v51 = vpop.xlane.xlu0 %4041 }
 0xc76   :  { %7051 = vrsqrt.f32 %v4090_v57  ;;  %v4093_v6 = vadd.f32 1e-05, %v4077_v32  ;;  %v4076_v56 = vmul.f32 0.03125, %v4042_v51 }
 0xc77   :  { %v4051_v10 = vpop.xlane.xlu1 %4050 }
 0xc78   :  { %7053 = vrsqrt.f32 %v4093_v6  ;;  %v4092_v63 = vadd.f32 1e-05, %v4076_v56  ;;  %v4079_v27 = vmul.f32 0.03125, %v4051_v10 }
 0xc79   :  { %v7042_v11 = vpop.eup %7041  ;;  %v4048_v13 = vpop.xlane.xlu0 %4047 }
 0xc7a   :  { %v4119_v12 = vmul.f32 %v7042_v11, %v9463_v46  ;;  %7055 = vrsqrt.f32 %v4092_v63  ;;  %v4095_v53 = vadd.f32 1e-05, %v4079_v27  ;;  %v4078_v30 = vmul.f32 0.03125, %v4048_v13 }
 0xc7b   :  { %v7044_v48 = vpop.eup %7043  ;;  %v4057_v3 = vpop.xlane.xlu1 %4056 }
 0xc7c   :  { %7057 = vrsqrt.f32 %v4095_v53  ;;  %v4094_v55 = vadd.f32 1e-05, %v4078_v30  ;;  %v4081_v24 = vmul.f32 0.03125, %v4057_v3  ;;  %v4139_v42 = vmul.f32 %v9572_v36, %v4119_v12 }
 0xc7d   :  { %v7046_v8 = vpop.eup %7045  ;;  %v4054_v31 = vpop.xlane.xlu0 %4053  ;;  %v4118_v21 = vmul.f32 %v7044_v48, %v9466_v44 }
 0xc7e   :  { %7059 = vrsqrt.f32 %v4094_v55  ;;  %v4097_v46 = vadd.f32 1e-05, %v4081_v24  ;;  %v4080_v19 = vmul.f32 0.03125, %v4054_v31  ;;  %v4121_v57 = vmul.f32 %v7046_v8, %v9471_v35 }
 0xc7f   :  { %v7048_v59 = vpop.eup %7047  ;;  %v4063_v23 = vpop.xlane.xlu1 %4062  ;;  %v4138_v25 = vmul.f32 %v9572_v36, %v4118_v21  ;;  %v4159_v44 = vadd.f32 %v9583_v34, %v4139_v42 }
 0xc80   :  { %7061 = vrsqrt.f32 %v4097_v46  ;;  %v4096_v32 = vadd.f32 1e-05, %v4080_v19  ;;  %v4083_v37 = vmul.f32 0.03125, %v4063_v23  ;;  %v4120_v51 = vmul.f32 %v7048_v59, %v9477_v15 }
 0xc81   :  { %v7050_v6 = vpop.eup %7049  ;;  %v4060_v56 = vpop.xlane.xlu0 %4059  ;;  %v4158_v10 = vadd.f32 %v9583_v34, %v4138_v25  ;;  %v4141_v63 = vmul.f32 %v9572_v36, %v4121_v57 }
 0xc82   :  { %7063 = vrsqrt.f32 %v4096_v32  ;;  %v4099_v27 = vadd.f32 1e-05, %v4083_v37  ;;  %v4082_v11 = vmul.f32 0.03125, %v4060_v56  ;;  %v4140_v13 = vmul.f32 %v9572_v36, %v4120_v51 }
 0xc83   :  { %v7052_v12 = vpop.eup %7051  ;;  %6668 = vmatprep.mubr.msk.f32.mxu1 %vm733_vm3, %v4158_v10  ;;  %v4123_v35 = vmul.f32 %v7050_v6, %v9483_v60  ;;  %v4161_v3 = vadd.f32 %v9583_v34, %v4141_v63 }
 0xc84   :  { %7065 = vrsqrt.f32 %v4099_v27  ;;  %v4098_v15 = vadd.f32 1e-05, %v4082_v11  ;;  %6669 = vmatmul.mubr.msk.f32.vlgmr.msra.gmra.mxu1 %vm733_vm3, %v4159_v44  ;;  %v4160_v53 = vadd.f32 %v9583_v34, %v4140_v13  ;;  %v4122_v30 = vmul.f32 %v7052_v12, %v9489_v41 }
 0xc85   :  { %v7054_v48 = vpop.eup %7053  ;;  %v4143_v60 = vmul.f32 %v9572_v36, %v4123_v35 }
 0xc86   :  { %v4125_v55 = vmul.f32 %v7054_v48, %v9495_v17  ;;  %7067 = vrsqrt.f32 %v4098_v15  ;;  %v4069_v24 = vpop.xlane.xlu1 %4068  ;;  %6671 = vmatprep.mubr.msk.f32.mxu1 %vm733_vm3, %v4160_v53  ;;  %v4142_v8 = vmul.f32 %v9572_v36, %v4122_v30 }
 0xc87   :  { %v7056_v58 = vpop.eup %7055  ;;  %v4085_v42 = vmul.f32 0.03125, %v4069_v24  ;;  %v4163_v23 = vadd.f32 %v9583_v34, %v4143_v60 }
 0xc88   :  { %6672 = vmatmul.mubr.msk.f32.gmra.mxu1 %vm733_vm3, %v4161_v3  ;;  %v4066_v31 = vpop.xlane.xlu0 %4065  ;;  %v4162_v41 = vadd.f32 %v9583_v34, %v4142_v8  ;;  %v4124_v21 = vmul.f32 %v7056_v58, %v9501_v43  ;;  %v4145_v57 = vmul.f32 %v9572_v36, %v4125_v55 }
 0xc89   :  { %v7058_v46 = vpop.eup %7057  ;;  %v4101_v19 = vadd.f32 1e-05, %v4085_v42  ;;  %v4084_v17 = vmul.f32 0.03125, %v4066_v31 }
 0xc8a   :  { %v4127_v59 = vmul.f32 %v7058_v46, %v9507_v29  ;;  %6674 = vmatprep.mubr.msk.f32.mxu1 %vm733_vm3, %v4162_v41  ;;  %v4144_v25 = vmul.f32 %v9572_v36, %v4124_v21  ;;  %v4165_v56 = vadd.f32 %v9583_v34, %v4145_v57 }
 0xc8b   :  { %v7060_v32 = vpop.eup %7059  ;;  %7069 = vrsqrt.f32 %v4101_v19  ;;  %v4100_v37 = vadd.f32 1e-05, %v4084_v17 }
 0xc8c   :  { %6675 = vmatmul.mubr.msk.f32.gmra.mxu1 %vm733_vm3, %v4163_v23  ;;  %v4164_v43 = vadd.f32 %v9583_v34, %v4144_v25  ;;  %v4126_v51 = vmul.f32 %v7060_v32, %v9513_v2  ;;  %v4147_v44 = vmul.f32 %v9572_v36, %v4127_v59 }
 0xc8d   :  { %v7062_v6 = vpop.eup %7061  ;;  %7071 = vrsqrt.f32 %v4100_v37 }
 0xc8e   :  { %v4129_v29 = vmul.f32 %v7062_v6, %v9519_v20  ;;  %6677 = vmatprep.mubr.msk.f32.mxu1 %vm733_vm3, %v4164_v43  ;;  %v4146_v10 = vmul.f32 %v9572_v36, %v4126_v51  ;;  %v4167_v20 = vadd.f32 %v9583_v34, %v4147_v44 }
 0xc8f   :  { %v7064_v63 = vpop.eup %7063 }
 0xc90   :  { %6678 = vmatmul.mubr.msk.f32.gmra.mxu1 %vm733_vm3, %v4165_v56  ;;  %v4166_v27 = vadd.f32 %v9583_v34, %v4146_v10  ;;  %v4128_v11 = vmul.f32 %v7064_v63, %v9525_v45  ;;  %v4149_v35 = vmul.f32 %v9572_v36, %v4129_v29 }
 0xc91   :  { %v7066_v2 = vpop.eup %7065 }
 0xc92   :  { %v4131_v13 = vmul.f32 %v7066_v2, %v9531_v18  ;;  %6680 = vmatprep.mubr.msk.f32.mxu1 %vm733_vm3, %v4166_v27  ;;  %v4148_v12 = vmul.f32 %v9572_v36, %v4128_v11  ;;  %v4169_v45 = vadd.f32 %v9583_v34, %v4149_v35 }
 0xc93   :  { %v7068_v15 = vpop.eup %7067 }
 0xc94   :  { %6681 = vmatmul.mubr.msk.f32.gmra.mxu1 %vm733_vm3, %v4167_v20  ;;  %v4168_v53 = vadd.f32 %v9583_v34, %v4148_v12  ;;  %v4130_v30 = vmul.f32 %v7068_v15, %v9537_v61  ;;  %v4151_v48 = vmul.f32 %v9572_v36, %v4131_v13 }
 0xc96   :  { %6683 = vmatprep.mubr.msk.f32.mxu1 %vm733_vm3, %v4168_v53  ;;  %v4150_v18 = vmul.f32 %v9572_v36, %v4130_v30  ;;  %v4171_v61 = vadd.f32 %v9583_v34, %v4151_v48 }
 0xc98   :  { %v7070_v3 = vpop.eup %7069  ;;  %6684 = vmatmul.mubr.msk.f32.gmra.mxu1 %vm733_vm3, %v4169_v45  ;;  %v4170_v55 = vadd.f32 %v9583_v34, %v4150_v18 }
 0xc99   :  { %v4133_v24 = vmul.f32 %v7070_v3, %v9547_v40  ;;  %v4457_v40 = vld [vmem:[%s10113_s2 + $0xb0] sm:$0xff] }
 0xc9a   :  { %v7072_v8 = vpop.eup %7071  ;;  %6686 = vmatprep.mubr.msk.f32.mxu1 %vm733_vm3, %v4170_v55  ;;  %6694 = vmatprep.subr.mxu0 %v4457_v40 }
 0xc9b   :  { %v4132_v60 = vmul.f32 %v7072_v8, %v9550_v26  ;;  %v4153_v58 = vmul.f32 %v9572_v36, %v4133_v24  ;;  %6695 = vmatpush3.msra.mxu0 %v4457_v40  ;;  %v4456_v26 = vld [vmem:[%s10113_s2 + $0xa8] sm:$0xff] }
 0xc9c   :  { %6687 = vmatmul.mubr.msk.f32.gmra.mxu1 %vm733_vm3, %v4171_v61  ;;  %6696 = vmatprep.subr.mxu0 %v4456_v26 }
 0xc9d   :  { %v4152_v42 = vmul.f32 %v9572_v36, %v4132_v60  ;;  %v4173_v41 = vadd.f32 %v9583_v34, %v4153_v58  ;;  %6697 = vmatpush3.msra.mxu0 %v4456_v26  ;;  %v4455_v36 = vld [vmem:[%s10113_s2 + $0xa0] sm:$0xff] }
 0xc9e   :  { %6698 = vmatprep.subr.mxu0 %v4455_v36 }
 0xc9f   :  { %v4172_v31 = vadd.f32 %v9583_v34, %v4152_v42  ;;  %6699 = vmatpush3.msra.mxu0 %v4455_v36  ;;  %v10414_v34 = vsub.s32 1, %v10396_v62 }
 0xca1   :  { %6689 = vmatprep.mubr.msk.f32.mxu1 %vm733_vm3, %v4172_v31  ;;  %v9660_v21 = vrot.slane %v9577_v54, %v10414_v34 }
 0xca2   :  { %6690 = vmatmul.mubr.msk.f32.gmra.mxu1 %vm733_vm3, %v4173_v41 }
 0xd44   :  { %v6670_v46 = vpop.f32.mrf.mxu1 }
 0xd45   :  { %v4302_v19 = vadd.f32 %v6670_v46, %v9660_v21 }
 0xd46   :  { %v4296_v17 = vpop.f32.mrf.mxu1 }
 0xd47   :  { %v4392_v59 = vmul.f32 0.70710677, %v4302_v19  ;;  %v4297_v23 = vadd.f32 %v4296_v17, %v9660_v21  ;;  %v4376_v42 = vmul.f32 0.5, %v4302_v19 }
 0xd48   :  { %v6673_v25 = vpop.f32.mrf.mxu1 }
 0xd49   :  { %7073 = verf.f32 %v4392_v59  ;;  %v4391_v57 = vmul.f32 0.70710677, %v4297_v23  ;;  %v4312_v32 = vadd.f32 %v6673_v25, %v9660_v21  ;;  %v4375_v8 = vmul.f32 0.5, %v4297_v23 }
 0xd4a   :  { %v4306_v37 = vpop.f32.mrf.mxu1 }
 0xd4b   :  { %7075 = verf.f32 %v4391_v57  ;;  %v4394_v43 = vmul.f32 0.70710677, %v4312_v32  ;;  %v4307_v51 = vadd.f32 %v4306_v37, %v9660_v21  ;;  %v4378_v37 = vmul.f32 0.5, %v4312_v32 }
 0xd4c   :  { %v6676_v6 = vpop.f32.mrf.mxu1 }
 0xd4d   :  { %7077 = verf.f32 %v4394_v43  ;;  %v4393_v29 = vmul.f32 0.70710677, %v4307_v51  ;;  %v4322_v56 = vadd.f32 %v6676_v6, %v9660_v21  ;;  %v4377_v23 = vmul.f32 0.5, %v4307_v51 }
 0xd4e   :  { %v4316_v10 = vpop.f32.mrf.mxu1 }
 0xd4f   :  { %7079 = verf.f32 %v4393_v29  ;;  %v4396_v44 = vmul.f32 0.70710677, %v4322_v56  ;;  %v4317_v63 = vadd.f32 %v4316_v10, %v9660_v21  ;;  %v4380_v32 = vmul.f32 0.5, %v4322_v56 }
 0xd50   :  { %v6679_v27 = vpop.f32.mrf.mxu1 }
 0xd51   :  { %7081 = verf.f32 %v4396_v44  ;;  %v4395_v11 = vmul.f32 0.70710677, %v4317_v63  ;;  %v9669_v2 = vadd.f32 %v6679_v27, %v9660_v21 }
 0xd52   :  { %v4326_v13 = vpop.f32.mrf.mxu1 }
 0xd53   :  { %7083 = verf.f32 %v4395_v11  ;;  %v4398_v20 = vmul.f32 0.70710677, %v9669_v2  ;;  %v4327_v12 = vadd.f32 %v4326_v13, %v9660_v21  ;;  %v4379_v13 = vmul.f32 0.5, %v4317_v63 }
 0xd54   :  { %v6682_v35 = vpop.f32.mrf.mxu1  ;;  %v4382_v56 = vmul.f32 0.5, %v9669_v2 }
 0xd55   :  { %7085 = verf.f32 %v4398_v20  ;;  %v4397_v15 = vmul.f32 0.70710677, %v4327_v12  ;;  %v9674_v53 = vadd.f32 %v6682_v35, %v9660_v21 }
 0xd56   :  { %v7074_v30 = vpop.eup %7073  ;;  %v4336_v45 = vpop.f32.mrf.mxu1 }
 0xd57   :  { %7087 = verf.f32 %v4397_v15  ;;  %v4400_v18 = vmul.f32 0.70710677, %v9674_v53  ;;  %v4424_v3 = vadd.f32 1.0, %v7074_v30  ;;  %v9678_v55 = vadd.f32 %v4336_v45, %v9660_v21 }
 0xd58   :  { %v7076_v48 = vpop.eup %7075  ;;  %v6685_v24 = vpop.f32.mrf.mxu1  ;;  %v4384_v2 = vmul.f32 0.5, %v9674_v53 }
 0xd59   :  { %v4423_v61 = vadd.f32 1.0, %v7076_v48  ;;  %7089 = verf.f32 %v4400_v18  ;;  %v9681_v60 = vadd.f32 %v6685_v24, %v9660_v21  ;;  %v4399_v31 = vmul.f32 0.70710677, %v9678_v55 }
 0xd5a   :  { %v7078_v58 = vpop.eup %7077  ;;  %v4346_v41 = vpop.f32.mrf.mxu1  ;;  %v4440_v34 = vmul.f32 %v4424_v3, %v4376_v42 }
 0xd5b   :  { %v4439_v40 = vmul.f32 %v4423_v61, %v4375_v8  ;;  %v4402_v26 = vmul.f32 0.70710677, %v9681_v60  ;;  %v4426_v46 = vadd.f32 1.0, %v7078_v58  ;;  %7091 = verf.f32 %v4399_v31 }
 0xd5c   :  { %v7080_v36 = vpop.eup %7079  ;;  %v4347_v17 = vadd.f32 %v4346_v41, %v9660_v21  ;;  %v6688_v59 = vpop.f32.mrf.mxu1  ;;  %v4381_v61 = vmul.f32 0.5, %v4327_v12 }
 0xd5d   :  { %v4425_v25 = vadd.f32 1.0, %v7080_v36  ;;  %7093 = verf.f32 %v4402_v26  ;;  %v9687_v57 = vadd.f32 %v6688_v59, %v9660_v21  ;;  %6700 = vmatprep.mubr.msk.f32.mxu0 %vm733_vm3, %v4439_v40  ;;  %v4442_v27 = vmul.f32 %v4426_v46, %v4378_v37 }
 0xd5e   :  { %v7082_v19 = vpop.eup %7081  ;;  %v4401_v43 = vmul.f32 0.70710677, %v4347_v17  ;;  %v4356_v6 = vpop.f32.mrf.mxu1  ;;  %6701 = vmatmul.mubr.msk.f32.vlgmr.msra.gmra.mxu0 %vm733_vm3, %v4440_v34  ;;  %v4383_v46 = vmul.f32 0.5, %v9678_v55 }
 0xd5f   :  { %v4441_v29 = vmul.f32 %v4425_v25, %v4377_v23  ;;  %v4404_v10 = vmul.f32 0.70710677, %v9687_v57  ;;  %v4428_v11 = vadd.f32 1.0, %v7082_v19  ;;  %v4357_v51 = vadd.f32 %v4356_v6, %v9660_v21 }
 0xd60   :  { %v7084_v44 = vpop.eup %7083  ;;  %7095 = verf.f32 %v4401_v43  ;;  %v4385_v43 = vmul.f32 0.5, %v4347_v17  ;;  %v4388_v53 = vmul.f32 0.5, %v9687_v57  ;;  %v10415_v57 = vsub.s32 2, %v10396_v62 }
 0xd61   :  { %v4427_v20 = vadd.f32 1.0, %v7084_v44  ;;  %7097 = verf.f32 %v4404_v10  ;;  %6703 = vmatprep.mubr.msk.f32.mxu0 %vm733_vm3, %v4441_v29  ;;  %v4403_v15 = vmul.f32 0.70710677, %v4357_v51  ;;  %v4444_v3 = vmul.f32 %v4428_v11, %v4380_v32 }
 0xd62   :  { %v7086_v35 = vpop.eup %7085  ;;  %6704 = vmatmul.mubr.msk.f32.gmra.mxu0 %vm733_vm3, %v4442_v27  ;;  %v6691_v30 = vpop.f32.mrf.mxu1  ;;  %v4386_v29 = vmul.f32 0.5, %v9681_v60  ;;  %v4387_v11 = vmul.f32 0.5, %v4357_v51 }
 0xd63   :  { %v4443_v45 = vmul.f32 %v4427_v20, %v4379_v13  ;;  %v4372_v18 = vadd.f32 %v6691_v30, %v9660_v21  ;;  %v4430_v24 = vadd.f32 1.0, %v7086_v35  ;;  %7099 = verf.f32 %v4403_v15 }
 0xd64   :  { %v7088_v48 = vpop.eup %7087  ;;  %v4366_v8 = vpop.f32.mrf.mxu1 }
 0xd65   :  { %v4429_v63 = vadd.f32 1.0, %v7088_v48  ;;  %v4406_v58 = vmul.f32 0.70710677, %v4372_v18  ;;  %6706 = vmatprep.mubr.msk.f32.mxu0 %vm733_vm3, %v4443_v45  ;;  %v4367_v31 = vadd.f32 %v4366_v8, %v9660_v21  ;;  %v4446_v40 = vmul.f32 %v4430_v24, %v4382_v56 }
 0xd66   :  { %v7090_v42 = vpop.eup %7089  ;;  %6707 = vmatmul.mubr.msk.f32.gmra.mxu0 %vm733_vm3, %v4444_v3  ;;  %v4390_v45 = vmul.f32 0.5, %v4372_v18  ;;  %v9717_v3 = vrot.slane %v9577_v54, %v10415_v57 }
 0xd67   :  { %v4445_v41 = vmul.f32 %v4429_v63, %v4381_v61  ;;  %7101 = verf.f32 %v4406_v58  ;;  %v4405_v26 = vmul.f32 0.70710677, %v4367_v31  ;;  %v4432_v34 = vadd.f32 1.0, %v7090_v42 }
 0xd68   :  { %v7092_v36 = vpop.eup %7091  ;;  %v4389_v15 = vmul.f32 0.5, %v4367_v31 }
 0xd69   :  { %6709 = vmatprep.mubr.msk.f32.mxu0 %vm733_vm3, %v4445_v41  ;;  %v4431_v59 = vadd.f32 1.0, %v7092_v36  ;;  %7103 = verf.f32 %v4405_v26  ;;  %v4448_v25 = vmul.f32 %v4432_v34, %v4384_v2 }
 0xd6a   :  { %v7094_v12 = vpop.eup %7093  ;;  %6710 = vmatmul.mubr.msk.f32.gmra.mxu0 %vm733_vm3, %v4446_v40 }
 0xd6b   :  { %v4447_v21 = vmul.f32 %v4431_v59, %v4383_v46  ;;  %v4434_v19 = vadd.f32 1.0, %v7094_v12 }
 0xd6d   :  { %v7096_v23 = vpop.eup %7095  ;;  %6712 = vmatprep.mubr.msk.f32.mxu0 %vm733_vm3, %v4447_v21  ;;  %v4450_v44 = vmul.f32 %v4434_v19, %v4386_v29 }
 0xd6e   :  { %v7098_v37 = vpop.eup %7097  ;;  %v4433_v6 = vadd.f32 1.0, %v7096_v23  ;;  %6713 = vmatmul.mubr.msk.f32.gmra.mxu0 %vm733_vm3, %v4448_v25 }
 0xd6f   :  { %v4436_v27 = vadd.f32 1.0, %v7098_v37 }
 0xd70   :  { %v4449_v55 = vmul.f32 %v4433_v6, %v4385_v43  ;;  %v7100_v10 = vpop.eup %7099 }
 0xd71   :  { %v4435_v13 = vadd.f32 1.0, %v7100_v10  ;;  %v4452_v35 = vmul.f32 %v4436_v27, %v4388_v53 }
 0xd72   :  { %6715 = vmatprep.mubr.msk.f32.mxu0 %vm733_vm3, %v4449_v55 }
 0xd73   :  { %6716 = vmatmul.mubr.msk.f32.gmra.mxu0 %vm733_vm3, %v4450_v44  ;;  %v4451_v20 = vmul.f32 %v4435_v13, %v4387_v11 }
 0xd74   :  { %v7102_v17 = vpop.eup %7101 }
 0xd75   :  { %6718 = vmatprep.mubr.msk.f32.mxu0 %vm733_vm3, %v4451_v20  ;;  %v4438_v32 = vadd.f32 1.0, %v7102_v17 }
 0xd76   :  { %v7104_v60 = vpop.eup %7103 }
 0xd77   :  { %6719 = vmatmul.mubr.msk.f32.gmra.mxu0 %vm733_vm3, %v4452_v35  ;;  %v4437_v30 = vadd.f32 1.0, %v7104_v60  ;;  %v4454_v48 = vmul.f32 %v4438_v32, %v4390_v45 }
 0xd79   :  { %v4453_v51 = vmul.f32 %v4437_v30, %v4389_v15 }
 0xd7b   :  { %6721 = vmatprep.mubr.msk.f32.mxu0 %vm733_vm3, %v4453_v51 }
 0xd7c   :  { %6722 = vmatmul.mubr.msk.f32.gmra.mxu0 %vm733_vm3, %v4454_v48 }
 0xe1e   :  { %v6702_v24 = vpop.f32.mrf.mxu0 }
 0xe1f   :  { %v4653_v8 = vadd.f32 %v6702_v24, %v9365_v22 }
 0xe20   :  { %v4573_v61 = vpop.f32.mrf.mxu0 }
 0xe21   :  { %v9721_v63 = vadd.f32 %v9717_v3, %v4653_v8  ;;  %v4652_v18 = vadd.f32 %v4573_v61, %v9369_v38 }
 0xe22   :  { %v6705_v58 = vpop.f32.mrf.mxu0 }
 0xe23   :  { %v9725_v42 = vadd.f32 %v9717_v3, %v4652_v18  ;;  %v4655_v56 = vadd.f32 %v6705_v58, %v9375_v0 }
 0xe24   :  { %v4583_v31 = vpop.f32.mrf.mxu0 }
 0xe25   :  { %v9729_v41 = vadd.f32 %v9717_v3, %v4655_v56  ;;  %v4654_v40 = vadd.f32 %v4583_v31, %v9381_v14 }
 0xe26   :  { %v6708_v26 = vpop.f32.mrf.mxu0 }
 0xe27   :  { %v9733_v22 = vadd.f32 %v9717_v3, %v4654_v40  ;;  %v4657_v36 = vadd.f32 %v6708_v26, %v9387_v52  ;;  %v4697_v38 = vsel %vm733_vm3, %v9729_v41, 0.0 }
 0xe28   :  { %4698 = vadd.xlane.f32.xlu0 %v4697_v38  ;;  %v4593_v34 = vpop.f32.mrf.mxu0 }
 0xe29   :  { %v9739_v12 = vadd.f32 %v9717_v3, %v4657_v36  ;;  %v4656_v0 = vadd.f32 %v4593_v34, %v9393_v9  ;;  %v4694_v2 = vsel %vm733_vm3, %v9733_v22, 0.0 }
 0xe2a   :  { %v6711_v46 = vpop.f32.mrf.mxu0 }
 0xe2b   :  { %v9743_v59 = vadd.f32 %v9717_v3, %v4656_v0  ;;  %v4659_v14 = vadd.f32 %v6711_v46, %v9399_v1  ;;  %v4703_v52 = vsel %vm733_vm3, %v9739_v12, 0.0 }
 0xe2c   :  { %4695 = vadd.xlane.f32.xlu0 %v4694_v2  ;;  %4704 = vadd.xlane.f32.xlu1 %v4703_v52  ;;  %v4603_v21 = vpop.f32.mrf.mxu0 }
 0xe2d   :  { %v9751_v23 = vadd.f32 %v9717_v3, %v4659_v14  ;;  %v4658_v9 = vadd.f32 %v4603_v21, %v9405_v50  ;;  %v4700_v1 = vsel %vm733_vm3, %v9743_v59, 0.0 }
 0xe2e   :  { %v6714_v19 = vpop.f32.mrf.mxu0 }
 0xe2f   :  { %v9755_v25 = vadd.f32 %v9717_v3, %v4658_v9  ;;  %v4709_v37 = vsel %vm733_vm3, %v9751_v23, 0.0  ;;  %v4661_v43 = vadd.f32 %v6714_v19, %v9411_v4 }
 0xe30   :  { %4701 = vadd.xlane.f32.xlu0 %v4700_v1  ;;  %4710 = vadd.xlane.f32.xlu1 %v4709_v37  ;;  %v4613_v6 = vpop.f32.mrf.mxu0 }
 0xe31   :  { %v9763_v29 = vadd.f32 %v9717_v3, %v4661_v43  ;;  %v4660_v50 = vadd.f32 %v4613_v6, %v9417_v16  ;;  %v4706_v10 = vsel %vm733_vm3, %v9755_v25, 0.0 }
 0xe33   :  { %v6717_v55 = vpop.f32.mrf.mxu0  ;;  %v9769_v44 = vadd.f32 %v9717_v3, %v4660_v50  ;;  %v4715_v4 = vsel %vm733_vm3, %v9763_v29, 0.0 }
 0xe34   :  { %v4663_v27 = vadd.f32 %v6717_v55, %v9423_v5  ;;  %4707 = vadd.xlane.f32.xlu1 %v4706_v10  ;;  %4716 = vadd.xlane.f32.xlu0 %v4715_v4 }
 0xe35   :  { %v4623_v11 = vpop.f32.mrf.mxu0  ;;  %v4712_v17 = vsel %vm733_vm3, %v9769_v44, 0.0 }
 0xe36   :  { %v4662_v13 = vadd.f32 %v4623_v11, %v9429_v28  ;;  %v9776_v53 = vadd.f32 %v9717_v3, %v4663_v27 }
 0xe37   :  { %v6720_v16 = vpop.f32.mrf.mxu0 }
 0xe38   :  { %v9781_v20 = vadd.f32 %v9717_v3, %v4662_v13  ;;  %4713 = vadd.xlane.f32.xlu1 %v4712_v17  ;;  %v4665_v35 = vadd.f32 %v6720_v16, %v9435_v49  ;;  %v4721_v28 = vsel %vm733_vm3, %v9776_v53, 0.0 }
 0xe39   :  { %v4633_v5 = vpop.f32.mrf.mxu0 }
 0xe3a   :  { %v4664_v60 = vadd.f32 %v4633_v5, %v9441_v33  ;;  %v4718_v32 = vsel %vm733_vm3, %v9781_v20, 0.0  ;;  %v9793_v45 = vadd.f32 %v9717_v3, %v4665_v35 }
 0xe3b   :  { %4719 = vadd.xlane.f32.xlu0 %v4718_v32 }
 0xe3c   :  { %v9790_v15 = vadd.f32 %v9717_v3, %v4664_v60  ;;  %4722 = vadd.xlane.f32.xlu1 %v4721_v28  ;;  %v6723_v30 = vpop.f32.mrf.mxu0  ;;  %v4727_v24 = vsel %vm733_vm3, %v9793_v45, 0.0 }
 0xe3d   :  { %v4667_v51 = vadd.f32 %v6723_v30, %v9449_v39 }
 0xe3e   :  { %v4724_v49 = vsel %vm733_vm3, %v9790_v15, 0.0  ;;  %v4643_v33 = vpop.f32.mrf.mxu0 }
 0xe3f   :  { %4725 = vadd.xlane.f32.xlu0 %v4724_v49  ;;  %v4666_v48 = vadd.f32 %v4643_v33, %v9453_v47  ;;  %v9805_v8 = vadd.f32 %v9717_v3, %v4667_v51 }
 0xe41   :  { %v9800_v57 = vadd.f32 %v9717_v3, %v4666_v48  ;;  %v4733_v18 = vsel %vm733_vm3, %v9805_v8, 0.0 }
 0xe43   :  { %4728 = vadd.xlane.f32.xlu0 %v4727_v24  ;;  %v4730_v61 = vsel %vm733_vm3, %v9800_v57, 0.0 }
 0xe44   :  { %4731 = vadd.xlane.f32.xlu1 %v4730_v61 }
 0xe48   :  { %4734 = vadd.xlane.f32.xlu1 %v4733_v18 }
 0xeb1   :  { %v4699_v39 = vpop.xlane.xlu0 %4698 }
 0xeb2   :  { %v4739_v47 = vmul.f32 0.03125, %v4699_v39 }
 0xeb4   :  { %v9812_v58 = vsub.f32 %v9729_v41, %v4739_v47 }
 0xeb5   :  { %v4705_v56 = vpop.xlane.xlu1 %4704  ;;  %v4696_v31 = vpop.xlane.xlu0 %4695 }
 0xeb6   :  { %v4741_v40 = vmul.f32 0.03125, %v4705_v56  ;;  %v4738_v26 = vmul.f32 0.03125, %v4696_v31  ;;  %v4771_v3 = vmul.f32 %v9812_v58, %v9812_v58 }
 0xeb8   :  { %v9817_v36 = vsub.f32 %v9739_v12, %v4741_v40  ;;  %v9820_v38 = vsub.f32 %v9733_v22, %v4738_v26  ;;  %v4793_v34 = vsel %vm733_vm3, %v4771_v3, 0.0 }
 0xeb9   :  { %v4711_v0 = vpop.xlane.xlu1 %4710  ;;  %4794 = vadd.xlane.f32.xlu0 %v4793_v34  ;;  %v4702_v46 = vpop.xlane.xlu0 %4701 }
 0xeba   :  { %v4743_v41 = vmul.f32 0.03125, %v4711_v0  ;;  %v4740_v14 = vmul.f32 0.03125, %v4702_v46  ;;  %v4773_v2 = vmul.f32 %v9817_v36, %v9817_v36  ;;  %v4770_v52 = vmul.f32 %v9820_v38, %v9820_v38 }
 0xebc   :  { %v9828_v21 = vsub.f32 %v9751_v23, %v4743_v41  ;;  %v9831_v12 = vsub.f32 %v9743_v59, %v4740_v14  ;;  %v4799_v22 = vsel %vm733_vm3, %v4773_v2, 0.0  ;;  %v4790_v9 = vsel %vm733_vm3, %v4770_v52, 0.0 }
 0xebd   :  { %v4708_v19 = vpop.xlane.xlu1 %4707  ;;  %4800 = vadd.xlane.f32.xlu1 %v4799_v22  ;;  %4791 = vadd.xlane.f32.xlu0 %v4790_v9  ;;  %v4717_v37 = vpop.xlane.xlu0 %4716  ;;  %v4691_v52 = vsel %vm733_vm3, %v9721_v63, 0.0 }
 0xebe   :  { %v4742_v1 = vmul.f32 0.03125, %v4708_v19  ;;  %v4775_v43 = vmul.f32 %v9828_v21, %v9828_v21  ;;  %v4772_v6 = vmul.f32 %v9831_v12, %v9831_v12  ;;  %v4745_v23 = vmul.f32 0.03125, %v4717_v37 }
 0xec0   :  { %v9840_v50 = vsub.f32 %v9755_v25, %v4742_v1  ;;  %v4805_v59 = vsel %vm733_vm3, %v4775_v43, 0.0  ;;  %v4796_v55 = vsel %vm733_vm3, %v4772_v6, 0.0  ;;  %v9845_v10 = vsub.f32 %v9763_v29, %v4745_v23 }
 0xec1   :  { %v4714_v27 = vpop.xlane.xlu1 %4713  ;;  %4806 = vadd.xlane.f32.xlu1 %v4805_v59  ;;  %4797 = vadd.xlane.f32.xlu0 %v4796_v55 }
 0xec2   :  { %v4744_v4 = vmul.f32 0.03125, %v4714_v27  ;;  %v4774_v11 = vmul.f32 %v9840_v50, %v9840_v50  ;;  %v4777_v13 = vmul.f32 %v9845_v10, %v9845_v10 }
 0xec4   :  { %v9852_v25 = vsub.f32 %v9769_v44, %v4744_v4  ;;  %v4720_v16 = vpop.xlane.xlu0 %4719  ;;  %v4802_v17 = vsel %vm733_vm3, %v4774_v11, 0.0  ;;  %v4811_v29 = vsel %vm733_vm3, %v4777_v13, 0.0 }
 0xec5   :  { %v4746_v5 = vmul.f32 0.03125, %v4720_v16  ;;  %v4723_v35 = vpop.xlane.xlu1 %4722  ;;  %4803 = vadd.xlane.f32.xlu1 %v4802_v17  ;;  %4812 = vadd.xlane.f32.xlu0 %v4811_v29 }
 0xec6   :  { %v4747_v60 = vmul.f32 0.03125, %v4723_v35  ;;  %v4776_v32 = vmul.f32 %v9852_v25, %v9852_v25 }
 0xec7   :  { %v9859_v28 = vsub.f32 %v9781_v20, %v4746_v5 }
 0xec8   :  { %v9862_v30 = vsub.f32 %v9776_v53, %v4747_v60  ;;  %v4726_v44 = vpop.xlane.xlu0 %4725  ;;  %v4808_v49 = vsel %vm733_vm3, %v4776_v32, 0.0 }
 0xec9   :  { %v4748_v33 = vmul.f32 0.03125, %v4726_v44  ;;  %4809 = vadd.xlane.f32.xlu1 %v4808_v49  ;;  %v4778_v51 = vmul.f32 %v9859_v28, %v9859_v28  ;;  %v10416_v44 = vsub.s32 3, %v10396_v62 }
 0xeca   :  { %v4779_v48 = vmul.f32 %v9862_v30, %v9862_v30 }
 0xecb   :  { %v9870_v24 = vsub.f32 %v9790_v15, %v4748_v33  ;;  %v4814_v20 = vsel %vm733_vm3, %v4778_v51, 0.0  ;;  %v9902_v49 = vrot.slane %v9577_v54, %v10416_v44 }
 0xecc   :  { %4815 = vadd.xlane.f32.xlu0 %v4814_v20  ;;  %v4729_v61 = vpop.xlane.xlu0 %4728  ;;  %v4817_v53 = vsel %vm733_vm3, %v4779_v48, 0.0  ;;  %v10417_v48 = vsub.s32 4, %v10396_v62 }
 0xecd   :  { %v4749_v18 = vmul.f32 0.03125, %v4729_v61  ;;  %4818 = vadd.xlane.f32.xlu1 %v4817_v53  ;;  %v4780_v39 = vmul.f32 %v9870_v24, %v9870_v24  ;;  %v4732_v47 = vpop.xlane.xlu1 %4731 }
 0xece   :  { %v4750_v31 = vmul.f32 0.03125, %v4732_v47  ;;  %v9907_v20 = vrot.slane %v9577_v54, %v10417_v48 }
 0xecf   :  { %v9877_v56 = vsub.f32 %v9793_v45, %v4749_v18  ;;  %v4820_v40 = vsel %vm733_vm3, %v4780_v39, 0.0 }
 0xed0   :  { %4821 = vadd.xlane.f32.xlu0 %v4820_v40  ;;  %v9881_v15 = vsub.f32 %v9800_v57, %v4750_v31  ;;  %v4688_v57 = vsel %vm733_vm3, %v9725_v42, 0.0 }
 0xed1   :  { %v4781_v26 = vmul.f32 %v9877_v56, %v9877_v56  ;;  %v4735_v3 = vpop.xlane.xlu1 %4734 }
 0xed2   :  { %v4751_v34 = vmul.f32 0.03125, %v4735_v3  ;;  %v4782_v46 = vmul.f32 %v9881_v15, %v9881_v15 }
 0xed3   :  { %v4823_v0 = vsel %vm733_vm3, %v4781_v26, 0.0  ;;  %v10418_v26 = vsub.s32 5, %v10396_v62 }
 0xed4   :  { %4824 = vadd.xlane.f32.xlu0 %v4823_v0  ;;  %v9889_v45 = vsub.f32 %v9805_v8, %v4751_v34  ;;  %v4826_v41 = vsel %vm733_vm3, %v4782_v46, 0.0 }
 0xed5   :  { %4827 = vadd.xlane.f32.xlu1 %v4826_v41  ;;  %v9914_v3 = vrot.slane %v9577_v54, %v10418_v26 }
 0xed6   :  { %v4783_v14 = vmul.f32 %v9889_v45, %v9889_v45 }
 0xed8   :  { %4689 = vadd.xlane.f32.xlu0 %v4688_v57  ;;  %v4829_v2 = vsel %vm733_vm3, %v4783_v14, 0.0 }
 0xed9   :  { %4830 = vadd.xlane.f32.xlu1 %v4829_v2 }
 0xedd   :  { %4692 = vadd.xlane.f32.xlu1 %v4691_v52 }
 0xf42   :  { %v4795_v22 = vpop.xlane.xlu0 %4794 }
 0xf43   :  { %v4835_v8 = vmul.f32 0.03125, %v4795_v22 }
 0xf45   :  { %v4851_v9 = vadd.f32 1e-05, %v4835_v8 }
 0xf46   :  { %v4801_v19 = vpop.xlane.xlu1 %4800  ;;  %v4792_v1 = vpop.xlane.xlu0 %4791 }
 0xf47   :  { %7105 = vrsqrt.f32 %v4851_v9  ;;  %v4837_v37 = vmul.f32 0.03125, %v4801_v19  ;;  %v4834_v43 = vmul.f32 0.03125, %v4792_v1 }
 0xf49   :  { %v4853_v6 = vadd.f32 1e-05, %v4837_v37  ;;  %v4850_v23 = vadd.f32 1e-05, %v4834_v43 }
 0xf4a   :  { %v4807_v59 = vpop.xlane.xlu1 %4806  ;;  %v4798_v55 = vpop.xlane.xlu0 %4797 }
 0xf4b   :  { %7107 = vrsqrt.f32 %v4853_v6  ;;  %v4839_v27 = vmul.f32 0.03125, %v4807_v59  ;;  %v4836_v4 = vmul.f32 0.03125, %v4798_v55 }
 0xf4c   :  { %7109 = vrsqrt.f32 %v4850_v23 }
 0xf4d   :  { %v4855_v11 = vadd.f32 1e-05, %v4839_v27  ;;  %v4852_v13 = vadd.f32 1e-05, %v4836_v4 }
 0xf4e   :  { %v4804_v16 = vpop.xlane.xlu1 %4803  ;;  %v4813_v5 = vpop.xlane.xlu0 %4812 }
 0xf4f   :  { %7111 = vrsqrt.f32 %v4855_v11  ;;  %v4838_v17 = vmul.f32 0.03125, %v4804_v16  ;;  %v4841_v35 = vmul.f32 0.03125, %v4813_v5 }
 0xf50   :  { %7113 = vrsqrt.f32 %v4852_v13 }
 0xf51   :  { %v4854_v29 = vadd.f32 1e-05, %v4838_v17  ;;  %v4857_v60 = vadd.f32 1e-05, %v4841_v35 }
 0xf52   :  { %v4810_v32 = vpop.xlane.xlu1 %4809 }
 0xf53   :  { %7115 = vrsqrt.f32 %v4854_v29  ;;  %v4840_v33 = vmul.f32 0.03125, %v4810_v32 }
 0xf54   :  { %v7106_v51 = vpop.eup %7105  ;;  %7117 = vrsqrt.f32 %v4857_v60 }
 0xf55   :  { %v4856_v61 = vadd.f32 1e-05, %v4840_v33  ;;  %v4816_v53 = vpop.xlane.xlu0 %4815  ;;  %v4883_v18 = vmul.f32 %v7106_v51, %v9812_v58 }
 0xf56   :  { %v4842_v39 = vmul.f32 0.03125, %v4816_v53  ;;  %v4819_v47 = vpop.xlane.xlu1 %4818 }
 0xf57   :  { %7119 = vrsqrt.f32 %v4856_v61  ;;  %v4843_v31 = vmul.f32 0.03125, %v4819_v47  ;;  %v4903_v40 = vmul.f32 %v9902_v49, %v4883_v18 }
 0xf58   :  { %v7108_v34 = vpop.eup %7107  ;;  %v4858_v0 = vadd.f32 1e-05, %v4842_v39 }
 0xf59   :  { %v7110_v46 = vpop.eup %7109  ;;  %v4859_v41 = vadd.f32 1e-05, %v4843_v31  ;;  %v4822_v57 = vpop.xlane.xlu0 %4821  ;;  %v9917_v14 = vadd.f32 %v9907_v20, %v4903_v40  ;;  %v4885_v58 = vmul.f32 %v7108_v34, %v9817_v36 }
 0xf5a   :  { %7121 = vrsqrt.f32 %v4858_v0  ;;  %v4844_v2 = vmul.f32 0.03125, %v4822_v57  ;;  %v4882_v52 = vmul.f32 %v7110_v46, %v9820_v38 }
 0xf5b   :  { %7123 = vrsqrt.f32 %v4859_v41  ;;  %v4941_v22 = vmul.f32 %v9914_v3, %v9917_v14  ;;  %v4905_v54 = vmul.f32 %v9902_v49, %v4885_v58 }
 0xf5c   :  { %v7112_v8 = vpop.eup %7111  ;;  %v4860_v9 = vadd.f32 1e-05, %v4844_v2  ;;  %v4902_v19 = vmul.f32 %v9902_v49, %v4882_v52 }
 0xf5d   :  { %v7114_v1 = vpop.eup %7113  ;;  %v4825_v37 = vpop.xlane.xlu0 %4824  ;;  %v4957_v43 = vsel %vm733_vm3, %v4941_v22, 0.0  ;;  %v9927_v36 = vadd.f32 %v9907_v20, %v4905_v54  ;;  %v4887_v6 = vmul.f32 %v7112_v8, %v9828_v21 }
 0xf5e   :  { %7125 = vrsqrt.f32 %v4860_v9  ;;  %v4845_v38 = vmul.f32 0.03125, %v4825_v37  ;;  %4958 = vadd.xlane.f32.xlu0 %v4957_v43  ;;  %v9931_v23 = vadd.f32 %v9907_v20, %v4902_v19  ;;  %v4884_v59 = vmul.f32 %v7114_v1, %v9831_v12  ;;  %v4828_v55 = vpop.xlane.xlu1 %4827 }
 0xf5f   :  { %v4943_v27 = vmul.f32 %v9914_v3, %v9927_v36  ;;  %v4907_v4 = vmul.f32 %v9902_v49, %v4887_v6  ;;  %v4846_v16 = vmul.f32 0.03125, %v4828_v55 }
 0xf60   :  { %v7116_v11 = vpop.eup %7115  ;;  %v4861_v13 = vadd.f32 1e-05, %v4845_v38  ;;  %v4940_v21 = vmul.f32 %v9914_v3, %v9931_v23  ;;  %v4904_v17 = vmul.f32 %v9902_v49, %v4884_v59 }
 0xf61   :  { %v7118_v5 = vpop.eup %7117  ;;  %v4963_v35 = vsel %vm733_vm3, %v4943_v27, 0.0  ;;  %v9942_v29 = vadd.f32 %v9907_v20, %v4907_v4  ;;  %v4886_v12 = vmul.f32 %v7116_v11, %v9840_v50  ;;  %v4862_v60 = vadd.f32 1e-05, %v4846_v16  ;;  %v4690_v37 = vpop.xlane.xlu0 %4689 }
 0xf62   :  { %7127 = vrsqrt.f32 %v4861_v13  ;;  %4964 = vadd.xlane.f32.xlu1 %v4963_v35  ;;  %v4954_v32 = vsel %vm733_vm3, %v4940_v21, 0.0  ;;  %v4831_v44 = vpop.xlane.xlu1 %4830  ;;  %v9949_v51 = vadd.f32 %v9907_v20, %v4904_v17  ;;  %v4889_v61 = vmul.f32 %v7118_v5, %v9845_v10 }
 0xf63   :  { %4955 = vadd.xlane.f32.xlu0 %v4954_v32  ;;  %v4945_v33 = vmul.f32 %v9914_v3, %v9942_v29  ;;  %v4906_v48 = vmul.f32 %v9902_v49, %v4886_v12  ;;  %7129 = vrsqrt.f32 %v4862_v60  ;;  %v4847_v50 = vmul.f32 0.03125, %v4831_v44 }
 0xf64   :  { %v7120_v53 = vpop.eup %7119  ;;  %v4942_v39 = vmul.f32 %v9914_v3, %v9949_v51  ;;  %v4909_v31 = vmul.f32 %v9902_v49, %v4889_v61  ;;  %v4736_v4 = vmul.f32 0.03125, %v4690_v37 }
 0xf65   :  { %v4969_v18 = vsel %vm733_vm3, %v4945_v33, 0.0  ;;  %v9957_v47 = vadd.f32 %v9907_v20, %v4906_v48  ;;  %v4863_v40 = vadd.f32 1e-05, %v4847_v50  ;;  %v4888_v26 = vmul.f32 %v7120_v53, %v9852_v25 }
 0xf66   :  { %4970 = vadd.xlane.f32.xlu1 %v4969_v18  ;;  %v4960_v10 = vsel %vm733_vm3, %v4942_v39, 0.0  ;;  %v9965_v46 = vadd.f32 %v9907_v20, %v4909_v31  ;;  %v4693_v12 = vpop.xlane.xlu1 %4692  ;;  %v10005_v60 = vsub.f32 %v9725_v42, %v4736_v4 }
 0xf67   :  { %v7122_v34 = vpop.eup %7121  ;;  %v4944_v0 = vmul.f32 %v9914_v3, %v9957_v47  ;;  %7131 = vrsqrt.f32 %v4863_v40  ;;  %4961 = vadd.xlane.f32.xlu0 %v4960_v10  ;;  %v4908_v57 = vmul.f32 %v9902_v49, %v4888_v26  ;;  %v4737_v48 = vmul.f32 0.03125, %v4693_v12 }
 0xf68   :  { %v7124_v41 = vpop.eup %7123  ;;  %v4890_v58 = vmul.f32 %v7122_v34, %v9859_v28  ;;  %v4947_v25 = vmul.f32 %v9914_v3, %v9965_v46  ;;  %v4768_v18 = vmul.f32 %v10005_v60, %v10005_v60 }
 0xf69   :  { %v4966_v2 = vsel %vm733_vm3, %v4944_v0, 0.0  ;;  %v4891_v52 = vmul.f32 %v7124_v41, %v9862_v30  ;;  %v9974_v22 = vadd.f32 %v9907_v20, %v4908_v57  ;;  %v10025_v31 = vsub.f32 %v9721_v63, %v4737_v48  ;;  %v5123_v41 = vld [vmem:[%s10113_s2 + $0xd8] sm:$0xff]  ;;  %v5122_v57 = vld [vmem:[%s10113_s2 + $0xd0] sm:$0xff] }
 0xf6a   :  { %4967 = vadd.xlane.f32.xlu1 %v4966_v2  ;;  %v4910_v54 = vmul.f32 %v9902_v49, %v4890_v58  ;;  %v4975_v9 = vsel %vm733_vm3, %v4947_v25, 0.0  ;;  %6724 = vmatprep.subr.mxu1 %v5123_v41  ;;  %v5120_v58 = vld [vmem:[%s10113_s2 + $0xc0] sm:$0xff] }
 0xf6b   :  { %v7126_v8 = vpop.eup %7125  ;;  %v4911_v19 = vmul.f32 %v9902_v49, %v4891_v52  ;;  %4976 = vadd.xlane.f32.xlu0 %v4975_v9  ;;  %v4946_v28 = vmul.f32 %v9914_v3, %v9974_v22  ;;  %v4769_v0 = vmul.f32 %v10025_v31, %v10025_v31  ;;  %6725 = vmatpush3.msra.mxu1 %v5123_v41 }
 0xf6c   :  { %v9982_v1 = vadd.f32 %v9907_v20, %v4910_v54  ;;  %v4892_v30 = vmul.f32 %v7126_v8, %v9870_v24  ;;  %6726 = vmatprep.subr.mxu1 %v5122_v57 }
 0xf6d   :  { %v9986_v43 = vadd.f32 %v9907_v20, %v4911_v19  ;;  %v4972_v6 = vsel %vm733_vm3, %v4946_v28, 0.0  ;;  %v4787_v63 = vsel %vm733_vm3, %v4769_v0, 0.0  ;;  %6727 = vmatpush3.msra.mxu1 %v5122_v57 }
 0xf6e   :  { %v4948_v38 = vmul.f32 %v9914_v3, %v9982_v1  ;;  %v4912_v59 = vmul.f32 %v9902_v49, %v4892_v30  ;;  %4973 = vadd.xlane.f32.xlu1 %v4972_v6 }
 0xf6f   :  { %v7128_v55 = vpop.eup %7127  ;;  %v4949_v27 = vmul.f32 %v9914_v3, %v9986_v43 }
 0xf70   :  { %v4978_v11 = vsel %vm733_vm3, %v4948_v38, 0.0  ;;  %v9996_v24 = vadd.f32 %v9907_v20, %v4912_v59  ;;  %v4893_v13 = vmul.f32 %v7128_v55, %v9877_v56  ;;  %v7130_v16 = vpop.eup %7129 }
 0xf71   :  { %4979 = vadd.xlane.f32.xlu0 %v4978_v11  ;;  %v4981_v21 = vsel %vm733_vm3, %v4949_v27, 0.0  ;;  %v4894_v35 = vmul.f32 %v7130_v16, %v9881_v15 }
 0xf72   :  { %v4950_v17 = vmul.f32 %v9914_v3, %v9996_v24  ;;  %v4913_v5 = vmul.f32 %v9902_v49, %v4893_v13  ;;  %4982 = vadd.xlane.f32.xlu1 %v4981_v21 }
 0xf73   :  { %v4914_v44 = vmul.f32 %v9902_v49, %v4894_v35 }
 0xf74   :  { %v4984_v32 = vsel %vm733_vm3, %v4950_v17, 0.0  ;;  %v10009_v56 = vadd.f32 %v9907_v20, %v4913_v5  ;;  %v7132_v33 = vpop.eup %7131 }
 0xf75   :  { %4985 = vadd.xlane.f32.xlu0 %v4984_v32  ;;  %v10015_v15 = vadd.f32 %v9907_v20, %v4914_v44  ;;  %v4895_v53 = vmul.f32 %v7132_v33, %v9889_v45  ;;  %v4784_v45 = vsel %vm733_vm3, %v4768_v18, 0.0 }
 0xf76   :  { %v4951_v61 = vmul.f32 %v9914_v3, %v10009_v56 }
 0xf77   :  { %v4952_v50 = vmul.f32 %v9914_v3, %v10015_v15  ;;  %v4915_v39 = vmul.f32 %v9902_v49, %v4895_v53 }
 0xf78   :  { %v4987_v42 = vsel %vm733_vm3, %v4951_v61, 0.0 }
 0xf79   :  { %4988 = vadd.xlane.f32.xlu0 %v4987_v42  ;;  %v4990_v40 = vsel %vm733_vm3, %v4952_v50, 0.0  ;;  %v10029_v26 = vadd.f32 %v9907_v20, %v4915_v39 }
 0xf7a   :  { %4991 = vadd.xlane.f32.xlu1 %v4990_v40 }
 0xf7b   :  { %v4953_v34 = vmul.f32 %v9914_v3, %v10029_v26  ;;  %v5121_v3 = vld [vmem:[%s10113_s2 + $0xc8] sm:$0xff] }
 0xf7c   :  { %6728 = vmatprep.subr.mxu1 %v5121_v3 }
 0xf7d   :  { %4785 = vadd.xlane.f32.xlu0 %v4784_v45  ;;  %v4993_v10 = vsel %vm733_vm3, %v4953_v34, 0.0  ;;  %6729 = vmatpush3.msra.mxu1 %v5121_v3 }
 0xf7e   :  { %4994 = vadd.xlane.f32.xlu1 %v4993_v10  ;;  %6730 = vmatprep.subr.mxu1 %v5120_v58 }
 0xf7f   :  { %6731 = vmatpush3.msra.mxu1 %v5120_v58 }
 0xf82   :  { %4788 = vadd.xlane.f32.xlu1 %v4787_v63 }
 0xfe7   :  { %v4959_v2 = vpop.xlane.xlu0 %4958 }
 0xfeb   :  { %v4965_v25 = vpop.xlane.xlu1 %4964 }
 0xfec   :  { %v4956_v52 = vpop.xlane.xlu0 %4955 }
 0xfef   :  { %v4971_v54 = vpop.xlane.xlu1 %4970 }
 0xff0   :  { %v4962_v8 = vpop.xlane.xlu0 %4961  ;;  %v5002_v13 = vmax.f32 %v4959_v2, %v4971_v54 }
 0xff3   :  { %v4968_v9 = vpop.xlane.xlu1 %4967 }
 0xff4   :  { %v4977_v19 = vpop.xlane.xlu0 %4976  ;;  %v4996_v6 = vmax.f32 %v4956_v52, %v4968_v9 }
 0xff5   :  { %v5003_v17 = vmax.f32 %v4965_v25, %v4977_v19 }
 0xff7   :  { %v4974_v28 = vpop.xlane.xlu1 %4973 }
 0xff8   :  { %v4997_v59 = vmax.f32 %v4962_v8, %v4974_v28 }
 0xffa   :  { %v4980_v30 = vpop.xlane.xlu0 %4979 }
 0xffb   :  { %v4983_v37 = vpop.xlane.xlu1 %4982  ;;  %v4998_v55 = vmax.f32 %v4996_v6, %v4980_v30 }
 0xffc   :  { %v5004_v35 = vmax.f32 %v5002_v13, %v4983_v37 }
 0xffe   :  { %v4986_v38 = vpop.xlane.xlu0 %4985 }
 0xfff   :  { %v4999_v4 = vmax.f32 %v4997_v59, %v4986_v38 }
0x1002   :  { %v4989_v16 = vpop.xlane.xlu0 %4988 }
0x1003   :  { %v4992_v27 = vpop.xlane.xlu1 %4991  ;;  %v5005_v33 = vmax.f32 %v5003_v17, %v4989_v16 }
0x1004   :  { %v5000_v11 = vmax.f32 %v4998_v55, %v4992_v27 }
0x1006   :  { %v5001_v21 = vmax.f32 %v5000_v11, %v4999_v4 }
0x1007   :  { %v4995_v5 = vpop.xlane.xlu1 %4994 }
0x1008   :  { %v5008_v12 = vsub.f32 %v4956_v52, %v5001_v21  ;;  %v5010_v32 = vsub.f32 %v4962_v8, %v5001_v21  ;;  %v5012_v44 = vsub.f32 %v4968_v9, %v5001_v21  ;;  %v5014_v48 = vsub.f32 %v4974_v28, %v5001_v21 }
0x1009   :  { %v5016_v61 = vsub.f32 %v4980_v30, %v5001_v21  ;;  %v5006_v50 = vmax.f32 %v5004_v35, %v4995_v5  ;;  %v5018_v40 = vsub.f32 %v4986_v38, %v5001_v21  ;;  %v5020_v41 = vsub.f32 %v4992_v27, %v5001_v21  ;;  %v4786_v21 = vpop.xlane.xlu0 %4785 }
0x100a   :  { %v5022_v53 = vmul.f32 1.442695, %v5008_v12  ;;  %v5026_v42 = vmul.f32 1.442695, %v5010_v32  ;;  %v5030_v18 = vmul.f32 1.442695, %v5012_v44 }
0x100b   :  { %v5007_v39 = vmax.f32 %v5006_v50, %v5005_v33  ;;  %v5034_v45 = vmul.f32 1.442695, %v5014_v48  ;;  %v5038_v34 = vmul.f32 1.442695, %v5016_v61  ;;  %v5042_v52 = vmul.f32 1.442695, %v5018_v40 }
0x100c   :  { %7133 = vpow2.f32 %v5022_v53  ;;  %v5046_v28 = vmul.f32 1.442695, %v5020_v41  ;;  %v4832_v33 = vmul.f32 0.03125, %v4786_v21 }
0x100d   :  { %7135 = vpow2.f32 %v5026_v42  ;;  %v5009_v10 = vsub.f32 %v4959_v2, %v5007_v39  ;;  %v5011_v0 = vsub.f32 %v4965_v25, %v5007_v39  ;;  %v5013_v63 = vsub.f32 %v4971_v54, %v5007_v39 }
0x100e   :  { %7137 = vpow2.f32 %v5030_v18  ;;  %v5015_v57 = vsub.f32 %v4977_v19, %v5007_v39  ;;  %v5017_v8 = vsub.f32 %v4983_v37, %v5007_v39  ;;  %v5019_v30 = vsub.f32 %v4989_v16, %v5007_v39 }
0x100f   :  { %v5024_v3 = vmul.f32 1.442695, %v5009_v10  ;;  %v5028_v58 = vmul.f32 1.442695, %v5011_v0  ;;  %7139 = vpow2.f32 %v5034_v45  ;;  %v5032_v9 = vmul.f32 1.442695, %v5013_v63  ;;  %v4789_v45 = vpop.xlane.xlu1 %4788 }
0x1010   :  { %7141 = vpow2.f32 %v5038_v34  ;;  %v5036_v6 = vmul.f32 1.442695, %v5015_v57  ;;  %v5021_v38 = vsub.f32 %v4995_v5, %v5007_v39  ;;  %v5040_v2 = vmul.f32 1.442695, %v5017_v8 }
0x1011   :  { %7143 = vpow2.f32 %v5024_v3  ;;  %v5044_v25 = vmul.f32 1.442695, %v5019_v30  ;;  %v4848_v39 = vadd.f32 1e-05, %v4832_v33  ;;  %v4833_v63 = vmul.f32 0.03125, %v4789_v45 }
0x1012   :  { %7145 = vpow2.f32 %v5028_v58  ;;  %v5048_v59 = vmul.f32 1.442695, %v5021_v38 }
0x1013   :  { %7147 = vpow2.f32 %v5042_v52  ;;  %v4849_v57 = vadd.f32 1e-05, %v4833_v63 }
0x1014   :  { %7149 = vpow2.f32 %v5032_v9 }
0x1015   :  { %7151 = vpow2.f32 %v5046_v28 }
0x1016   :  { %7153 = vpow2.f32 %v5036_v6 }
0x1017   :  { %7155 = vpow2.f32 %v5040_v2 }
0x1018   :  { %7157 = vpow2.f32 %v5044_v25 }
0x1019   :  { %v7134_v54 = vpop.eup %7133  ;;  %7159 = vpow2.f32 %v5048_v59 }
0x101a   :  { %v7136_v19 = vpop.eup %7135 }
0x101b   :  { %v5050_v55 = vadd.f32 %v7136_v19, %v7134_v54  ;;  %v7138_v27 = vpop.eup %7137 }
0x101c   :  { %v7140_v4 = vpop.eup %7139 }
0x101d   :  { %v5051_v37 = vadd.f32 %v7138_v27, %v5050_v55  ;;  %v7142_v11 = vpop.eup %7141 }
0x101e   :  { %v7144_v16 = vpop.eup %7143 }
0x101f   :  { %v5052_v13 = vadd.f32 %v7140_v4, %v5051_v37  ;;  %v7146_v17 = vpop.eup %7145 }
0x1020   :  { %v7148_v35 = vpop.eup %7147  ;;  %v5056_v12 = vadd.f32 %v7146_v17, %v7144_v16 }
0x1021   :  { %v5053_v5 = vadd.f32 %v7142_v11, %v5052_v13  ;;  %v7150_v32 = vpop.eup %7149 }
0x1022   :  { %v7152_v48 = vpop.eup %7151  ;;  %v5057_v61 = vadd.f32 %v7150_v32, %v5056_v12 }
0x1023   :  { %v5054_v44 = vadd.f32 %v7148_v35, %v5053_v5  ;;  %v7154_v53 = vpop.eup %7153 }
0x1024   :  { %v5058_v50 = vadd.f32 %v7154_v53, %v5057_v61  ;;  %v7156_v18 = vpop.eup %7155 }
0x1025   :  { %v5055_v42 = vadd.f32 %v7152_v48, %v5054_v44  ;;  %v7158_v34 = vpop.eup %7157 }
0x1026   :  { %v5059_v40 = vadd.f32 %v7156_v18, %v5058_v50  ;;  %v7160_v0 = vpop.eup %7159 }
0x1027   :  { %7161 = vrcp.f32 %v5055_v42 }
0x1028   :  { %v5060_v10 = vadd.f32 %v7158_v34, %v5059_v40  ;;  %7163 = vrsqrt.f32 %v4848_v39 }
0x102a   :  { %v5061_v41 = vadd.f32 %v7160_v0, %v5060_v10 }
0x102c   :  { %7165 = vrcp.f32 %v5061_v41 }
0x102d   :  { %7167 = vrsqrt.f32 %v4849_v57 }
0x1034   :  { %v7162_v3 = vpop.eup %7161 }
0x1035   :  { %v5064_v58 = vmul.f32 %v7162_v3, %v7134_v54  ;;  %v5066_v52 = vmul.f32 %v7162_v3, %v7136_v19  ;;  %v5068_v8 = vmul.f32 %v7162_v3, %v7138_v27  ;;  %v5070_v9 = vmul.f32 %v7162_v3, %v7140_v4  ;;  %v7164_v38 = vpop.eup %7163 }
0x1036   :  { %v5072_v2 = vmul.f32 %v7162_v3, %v7142_v11  ;;  %v4880_v54 = vmul.f32 %v7164_v38, %v10005_v60  ;;  %v5074_v19 = vmul.f32 %v7162_v3, %v7148_v35  ;;  %v7171_v38 = vld [vmem:[%s10113_s2 + $0xe8] sm:$0xff] }
0x1037   :  { %v5078_v28 = vmul.f32 %v5064_v58, %v9931_v23  ;;  %v5080_v30 = vmul.f32 %v5066_v52, %v9949_v51  ;;  %v5082_v6 = vmul.f32 %v5068_v8, %v9957_v47  ;;  %v5084_v25 = vmul.f32 %v5070_v9, %v9974_v22 }
0x1038   :  { %v5076_v47 = vmul.f32 %v7162_v3, %v7152_v48  ;;  %v5086_v11 = vmul.f32 %v5072_v2, %v9982_v1  ;;  %v5088_v35 = vmul.f32 %v5074_v19, %v9996_v24  ;;  %v4900_v42 = vmul.f32 %v9902_v49, %v4880_v54 }
0x1039   :  { %v5092_v59 = vsel %vm733_vm3, %v5078_v28, 0.0  ;;  %v5093_v55 = vsel %vm733_vm3, %v5080_v30, 0.0  ;;  %v7166_v13 = vpop.eup %7165  ;;  %v5095_v27 = vsel %vm733_vm3, %v5082_v6, 0.0  ;;  %v5097_v22 = vsel %vm733_vm3, %v5084_v25, 0.0  ;;  %v5214_v30 = vld [vmem:[%s10114_s3 + $0x18] sm:$0xff]  ;;  %v5212_v6 = vld [vmem:[%s10114_s3 + $0x8] sm:$0xff] }
0x103a   :  { %v5094_v37 = vadd.f32 %v5093_v55, %v5092_v59  ;;  %v5065_v23 = vmul.f32 %v7166_v13, %v7144_v16  ;;  %v5067_v4 = vmul.f32 %v7166_v13, %v7146_v17  ;;  %v5069_v51 = vmul.f32 %v7166_v13, %v7150_v32  ;;  %v7168_v16 = vpop.eup %7167  ;;  %6735 = vmatprep.subr.mxu1 %v5214_v30 }
0x103b   :  { %v5071_v21 = vmul.f32 %v7166_v13, %v7154_v53  ;;  %v5073_v12 = vmul.f32 %v7166_v13, %v7156_v18  ;;  %v5075_v17 = vmul.f32 %v7166_v13, %v7158_v34  ;;  %v5077_v50 = vmul.f32 %v7166_v13, %v7160_v0 }
0x103c   :  { %v5096_v5 = vadd.f32 %v5095_v27, %v5094_v37  ;;  %v5079_v44 = vmul.f32 %v5065_v23, %v9917_v14  ;;  %v5081_v33 = vmul.f32 %v5067_v4, %v9927_v36  ;;  %v5083_v60 = vmul.f32 %v5069_v51, %v9942_v29 }
0x103d   :  { %v5085_v32 = vmul.f32 %v5071_v21, %v9965_v46  ;;  %v5090_v14 = vmul.f32 %v5076_v47, %v10015_v15  ;;  %v5099_v36 = vsel %vm733_vm3, %v5086_v11, 0.0  ;;  %v5087_v29 = vmul.f32 %v5073_v12, %v9986_v43 }
0x103e   :  { %v5098_v61 = vadd.f32 %v5097_v22, %v5096_v5  ;;  %v5105_v48 = vsel %vm733_vm3, %v5079_v44, 0.0  ;;  %v5106_v1 = vsel %vm733_vm3, %v5081_v33, 0.0  ;;  %v5108_v24 = vsel %vm733_vm3, %v5083_v60, 0.0 }
0x103f   :  { %v5107_v53 = vadd.f32 %v5106_v1, %v5105_v48  ;;  %v4881_v46 = vmul.f32 %v7168_v16, %v10025_v31  ;;  %v5101_v40 = vsel %vm733_vm3, %v5088_v35, 0.0  ;;  %v5089_v45 = vmul.f32 %v5075_v17, %v10009_v56 }
0x1040   :  { %v5100_v18 = vadd.f32 %v5099_v36, %v5098_v61  ;;  %v5110_v34 = vsel %vm733_vm3, %v5085_v32, 0.0  ;;  %v5103_v15 = vsel %vm733_vm3, %v5090_v14, 0.0  ;;  %v5091_v0 = vmul.f32 %v5077_v50, %v10029_v26 }
0x1041   :  { %v5109_v39 = vadd.f32 %v5108_v24, %v5107_v53  ;;  %v5112_v43 = vsel %vm733_vm3, %v5087_v29, 0.0  ;;  %v4920_v41 = vadd.f32 %v9907_v20, %v4900_v42  ;;  %v4901_v31 = vmul.f32 %v9902_v49, %v4881_v46  ;;  %v5213_v49 = vld [vmem:[%s10114_s3 + $0x10] sm:$0xff] }
0x1042   :  { %v5102_v10 = vadd.f32 %v5101_v40, %v5100_v18  ;;  %v5114_v58 = vsel %vm733_vm3, %v5089_v45, 0.0  ;;  %v5116_v8 = vsel %vm733_vm3, %v5091_v0, 0.0  ;;  %v5127_v2 = vrot.slane %v7171_v38, %v3908_v7  ;;  %v5305_v7 = vld [vmem:[%s10114_s3 + $0x20] sm:$0x1] }
0x1043   :  { %v5111_v63 = vadd.f32 %v5110_v34, %v5109_v39  ;;  %v4921_v28 = vadd.f32 %v9907_v20, %v4901_v31  ;;  %v5211_v20 = vld [vmem:[%s10114_s3] sm:$0xff] }
0x1044   :  { %v5104_v57 = vadd.f32 %v5103_v15, %v5102_v10 }
0x1045   :  { %v5113_v3 = vadd.f32 %v5112_v43, %v5111_v63 }
0x1046   :  { %v5118_v52 = vadd.f32 %v5104_v57, %v4920_v41 }
0x1047   :  { %v5115_v56 = vadd.f32 %v5114_v58, %v5113_v3 }
0x1048   :  { %6732 = vmatprep.mubr.msk.f32.mxu1 %vm733_vm3, %v5118_v52 }
0x1049   :  { %v5117_v9 = vadd.f32 %v5116_v8, %v5115_v56 }
0x104b   :  { %v5119_v26 = vadd.f32 %v5117_v9, %v4921_v28 }
0x104d   :  { %6733 = vmatmul.mubr.msk.f32.vlgmr.msra.gmra.mxu1 %vm733_vm3, %v5119_v26 }
0x104e   :  { %6736 = vmatpush3.msra.mxu1 %v5214_v30 }
0x104f   :  { %6737 = vmatprep.subr.mxu1 %v5213_v49 }
0x1050   :  { %6738 = vmatpush3.msra.mxu1 %v5213_v49 }
0x1051   :  { %6739 = vmatprep.subr.mxu1 %v5212_v6 }
0x1052   :  { %6740 = vmatpush3.msra.mxu1 %v5212_v6 }
0x1053   :  { %6741 = vmatprep.subr.mxu1 %v5211_v20 }
0x1054   :  { %6742 = vmatpush3.msra.mxu1 %v5211_v20 }
0x110d   :  { %v6734_v25 = vpop.f32.mrf.mxu1 }
0x110e   :  { %v5206_v59 = vadd.f32 %v6734_v25, %v5127_v2 }
0x110f   :  { %v5200_v55 = vpop.f32.mrf.mxu1 }
0x1110   :  { %v5201_v37 = vadd.f32 %v5200_v55, %v5127_v2  ;;  %v5210_v54 = vmax.f32 %v5206_v59, 0.0 }
0x1112   :  { %v5209_v13 = vmax.f32 %v5201_v37, 0.0 }
0x1114   :  { %6743 = vmatprep.mubr.msk.f32.mxu1 %vm733_vm3, %v5209_v13 }
0x1115   :  { %6744 = vmatmul.mubr.msk.f32.vlgmr.msra.gmra.mxu1 %vm733_vm3, %v5210_v54 }
0x11d5   :  { %v6745_v19 = vpop.f32.mrf.mxu1 }
0x11d7   :  { %v5287_v27 = vpop.f32.mrf.mxu1 }
0x11d8   :  { %v5296_v23 = vadd.f32 %v6745_v19, %v5287_v27 }
0x11da   :  { %v5297_v4 = vrot.slane %v5296_v23, 4 }
0x11dc   :  { %v5298_v51 = vadd.f32 %v5297_v4, %v5296_v23 }
0x11de   :  { %v5299_v21 = vrot.slane %v5298_v51, 2 }
0x11e0   :  { %v5300_v47 = vadd.f32 %v5299_v21, %v5298_v51 }
0x11e2   :  { %v5301_v11 = vrot.slane %v5300_v47, 1 }
0x11e4   :  { %v5302_v62 = vadd.f32 %v5301_v11, %v5300_v47 }
0x11e6   :  { %v5304_v5 = vmul.f32 0.0625, %v5302_v62 }
0x11e8   :  { %v5306_v22 = vadd.f32 %v5305_v7, %v5304_v5 }
0x11ea   :  { %5307 = vst [vmem:[#allocation3] sm:$0x1] %v5306_v22 }
0x11eb   :  { %7183 = shalt.err (!%p7180_p4)
}
0x11ec   :  { %5317 = dma.vmem_to_hbm [thread:$0]  %s5315_s15, 16, %s10115_s4, [#allocation4]  }
0x11ed   :  { %7192 = dma.done.wait [#allocation4], 16  }
0x11ee   :  { %7193 = vsyncadd [#allocation4], 4294967280 }
0x11ef   :  { %5321 = vsyncpa [#allocation4], 1 }

</bundles_post_ra>
